<compile_context>
chip_gen: v7x
topology: tpu7x:2x2x1
jax: 0.10.0
libtpu: 0.0.40
codegen_flags: <defaults>
</compile_context>

<pallas_src>
import math
from functools import partial

import numpy as np
import jax
import jax.numpy as jnp
from jax import lax
from jax.experimental import pallas as pl
from jax.experimental.pallas import tpu as pltpu

LANE = 128
EPS = 1e-5


# --------------------------------------------------------------------------
# helpers
# --------------------------------------------------------------------------
def _round_up(x, m):
    return (x + m - 1) // m * m


def _pick_row_tile(P):
    """Largest multiple-of-8 divisor of P that is <= min(1024, P//2) so we get
    >= 2 row tiles when possible (megacore / pipelining); falls back to P."""
    cap = min(1024, max(8, P // 2))
    best = None
    t = 8
    while t <= cap:
        if P % t == 0:
            best = t
        t += 8
    return best if best is not None else P


def _nbytes(shape, dtype):
    return int(np.prod(shape)) * np.dtype(dtype).itemsize


def _compiler_params(block_bytes):
    # Sized to the real double-buffered per-step footprint instead of the
    # 16/32 MiB scoped default; kept below v7x's 64 MiB physical VMEM.
    limit = int(min(max(2 * block_bytes + (1 << 20), 4 << 20), 60 << 20))
    return pltpu.CompilerParams(
        dimension_semantics=("parallel",), vmem_limit_bytes=limit)


def _bn_scale_shift(ssum, ssq, gamma, beta, count, eps=EPS):
    """Fold train-mode batch stats + affine params into per-channel scale/shift."""
    s = jnp.sum(ssum, axis=(0, 1))
    q = jnp.sum(ssq, axis=(0, 1))
    mean = s / count
    var = jnp.maximum(q / count - mean * mean, 0.0)
    scale = gamma * lax.rsqrt(var + eps)
    shift = beta - mean * scale
    return (scale.reshape(1, -1).astype(jnp.float32),
            shift.reshape(1, -1).astype(jnp.float32))


# --------------------------------------------------------------------------
# K1 / K3: (optional BN+ReLU) -> 1x1 conv as lane-dense matmul + partial stats
# --------------------------------------------------------------------------
def _make_matmul_stats_kernel(apply_bn_relu):
    def _core(a, w_ref, o_ref, ssum_ref, ssq_ref):
        h = jnp.dot(a.astype(jnp.bfloat16), w_ref[...],
                    preferred_element_type=jnp.float32)
        o_ref[...] = h
        ssum_ref[0] = jnp.sum(h, axis=0, keepdims=True)
        ssq_ref[0] = jnp.sum(h * h, axis=0, keepdims=True)

    if apply_bn_relu:
        def kernel(a_ref, sc_ref, sh_ref, w_ref, o_ref, ssum_ref, ssq_ref):
            a = jnp.maximum(a_ref[...] * sc_ref[...] + sh_ref[...], 0.0)
            _core(a, w_ref, o_ref, ssum_ref, ssq_ref)
    else:
        def kernel(a_ref, w_ref, o_ref, ssum_ref, ssq_ref):
            _core(a_ref[...], w_ref, o_ref, ssum_ref, ssq_ref)
    return kernel


def _matmul_stats(a, w_bf16, scale=None, shift=None, *, tile):
    P, Ci = a.shape
    Co = w_bf16.shape[1]
    nt = P // tile
    apply_bn = scale is not None
    kernel = _make_matmul_stats_kernel(apply_bn)

    arrays = [a]
    in_specs = [pl.BlockSpec((tile, Ci), lambda i: (i, 0))]
    if apply_bn:
        arrays += [scale, shift]
        in_specs += [pl.BlockSpec((1, Ci), lambda i: (0, 0)),
                     pl.BlockSpec((1, Ci), lambda i: (0, 0))]
    arrays += [w_bf16]
    in_specs += [pl.BlockSpec(w_bf16.shape, lambda i: (0, 0))]

    out_shape = (jax.ShapeDtypeStruct((P, Co), jnp.float32),
                 jax.ShapeDtypeStruct((nt, 1, Co), jnp.float32),
                 jax.ShapeDtypeStruct((nt, 1, Co), jnp.float32))
    out_specs = (pl.BlockSpec((tile, Co), lambda i: (i, 0)),
                 pl.BlockSpec((1, 1, Co), lambda i: (i, 0, 0)),
                 pl.BlockSpec((1, 1, Co), lambda i: (i, 0, 0)))

    blk = (_nbytes((tile, Ci), jnp.float32)
           + _nbytes(w_bf16.shape, jnp.bfloat16)
           + _nbytes((tile, Co), jnp.float32)
           + 4 * _nbytes((1, max(Ci, Co)), jnp.float32))

    h, ssum, ssq = pl.pallas_call(
        kernel,
        grid=(nt,),
        in_specs=in_specs,
        out_specs=out_specs,
        out_shape=out_shape,
        compiler_params=_compiler_params(blk),
    )(*arrays)
    return h, ssum, ssq


# --------------------------------------------------------------------------
# K2: BN1(+ReLU) -> 3x3 depthwise conv (stride 1, pad 1) per image + stats
# --------------------------------------------------------------------------
def _make_dwconv_kernel(H, W, Ce, relu_in):
    HW = H * W
    PADR = W + 1  # zero fringe rows; covers all +-1 row shifts (incl. col shift)

    def kernel(h1_ref, sc_ref, sh_ref, w2_ref, h2_ref, ssum_ref, ssq_ref, pad_ref):
        a = h1_ref[0] * sc_ref[...] + sh_ref[...]
        if relu_in:
            a = jnp.maximum(a, 0.0)

        # zero only the 2*PADR fringe rows, then drop the activation in the middle
        fringe = jnp.zeros((PADR, Ce), jnp.float32)
        pad_ref[0:PADR, :] = fringe
        pad_ref[PADR + HW:PADR + HW + PADR, :] = fringe
        pad_ref[PADR:PADR + HW, :] = a

        # hoisted column-boundary masks (row boundaries are handled by the
        # zeroed fringe rows, so no h-mask is needed)
        w_idx = lax.broadcasted_iota(jnp.int32, (HW, 1), 0) % W
        w_valid = {-1: (w_idx >= 1).astype(jnp.float32),
                   0: None,
                   1: (w_idx < W - 1).astype(jnp.float32)}

        acc = jnp.zeros((HW, Ce), jnp.float32)
        for kh in range(3):
            for kw in range(3):
                dh, dw = kh - 1, kw - 1
                start = PADR + dh * W + dw
                win = pad_ref[start:start + HW, :]
                m = w_valid[dw]
                if m is not None:
                    win = win * m
                tap = w2_ref[kh * 3 + kw:kh * 3 + kw + 1, :]   # (1, Ce)
                acc = acc + win * tap

        h2_ref[0] = acc
        ssum_ref[0] = jnp.sum(acc, axis=0, keepdims=True)
        ssq_ref[0] = jnp.sum(acc * acc, axis=0, keepdims=True)

    return kernel, PADR


def _dwconv_stats(h1, scale, shift, w2_taps, N, H, W, *, relu_in):
    HW = H * W
    Ce = h1.shape[-1]
    h1_img = h1.reshape(N, HW, Ce)
    kernel, PADR = _make_dwconv_kernel(H, W, Ce, relu_in)

    in_specs = [pl.BlockSpec((1, HW, Ce), lambda n: (n, 0, 0)),
                pl.BlockSpec((1, Ce), lambda n: (0, 0)),
                pl.BlockSpec((1, Ce), lambda n: (0, 0)),
                pl.BlockSpec(w2_taps.shape, lambda n: (0, 0))]
    out_shape = (jax.ShapeDtypeStruct((N, HW, Ce), jnp.float32),
                 jax.ShapeDtypeStruct((N, 1, Ce), jnp.float32),
                 jax.ShapeDtypeStruct((N, 1, Ce), jnp.float32))
    out_specs = (pl.BlockSpec((1, HW, Ce), lambda n: (n, 0, 0)),
                 pl.BlockSpec((1, 1, Ce), lambda n: (n, 0, 0)),
                 pl.BlockSpec((1, 1, Ce), lambda n: (n, 0, 0)))

    blk = (2 * _nbytes((HW, Ce), jnp.float32)
           + _nbytes((HW + 2 * PADR, Ce), jnp.float32)
           + _nbytes(w2_taps.shape, jnp.float32)
           + 4 * _nbytes((1, Ce), jnp.float32))

    h2, ssum, ssq = pl.pallas_call(
        kernel,
        grid=(N,),
        in_specs=in_specs,
        out_specs=out_specs,
        out_shape=out_shape,
        scratch_shapes=[pltpu.VMEM((HW + 2 * PADR, Ce), jnp.float32)],
        compiler_params=_compiler_params(blk),
    )(h1_img, scale, shift, w2_taps)
    return h2.reshape(N * HW, Ce), ssum, ssq


# --------------------------------------------------------------------------
# K4: BN3 (+ identity residual) -- no final ReLU in MBBlock
# --------------------------------------------------------------------------
def _make_bn_residual_kernel(add_residual):
    if add_residual:
        def kernel(h_ref, sc_ref, sh_ref, x_ref, o_ref):
            o_ref[...] = h_ref[...] * sc_ref[...] + sh_ref[...] + x_ref[...]
    else:
        def kernel(h_ref, sc_ref, sh_ref, o_ref):
            o_ref[...] = h_ref[...] * sc_ref[...] + sh_ref[...]
    return kernel


def _bn_residual(h3, scale, shift, x_res, *, tile):
    P, Co = h3.shape
    nt = P // tile
    add_res = x_res is not None
    kernel = _make_bn_residual_kernel(add_res)

    arrays = [h3, scale, shift]
    in_specs = [pl.BlockSpec((tile, Co), lambda i: (i, 0)),
                pl.BlockSpec((1, Co), lambda i: (0, 0)),
                pl.BlockSpec((1, Co), lambda i: (0, 0))]
    if add_res:
        arrays.append(x_res)
        in_specs.append(pl.BlockSpec((tile, Co), lambda i: (i, 0)))

    blk = (2 + int(add_res)) * _nbytes((tile, Co), jnp.float32) \
        + 2 * _nbytes((1, Co), jnp.float32)

    return pl.pallas_call(
        kernel,
        grid=(nt,),
        in_specs=in_specs,
        out_specs=pl.BlockSpec((tile, Co), lambda i: (i, 0)),
        out_shape=jax.ShapeDtypeStruct((P, Co), jnp.float32),
        compiler_params=_compiler_params(blk),
    )(*arrays)


# --------------------------------------------------------------------------
# wrapper: MBBlock forward
# --------------------------------------------------------------------------
def mbblock_forward(x_nchw, params, *, expansion, stride=1, kernel_size=3,
                    padding=1):
    if stride != 1 or kernel_size != 3 or padding != 1:
        # TODO(synk): stride>1 / non-3x3 depthwise needs a strided output
        # gather in the conv2 stage; only the module defaults are kernelized.
        raise NotImplementedError("only stride=1, kernel_size=3, padding=1")

    N, Cin, H, W = x_nchw.shape
    Cexp = Cin * expansion
    Cout = params["w3"].shape[0]
    add_residual = (Cin == Cout and stride == 1)

    Cin_p = _round_up(Cin, LANE)
    Ce_p = _round_up(Cexp, LANE)
    Co_p = _round_up(Cout, LANE)

    P = N * H * W
    tile = _pick_row_tile(P)
    count = float(P)

    def pad2(a, r, c):
        return jnp.pad(a, ((0, r - a.shape[0]), (0, c - a.shape[1])))

    def pad1(a, c):
        return jnp.pad(a, (0, c - a.shape[0]))

    # channels-last, lane-padded activations (lane-dense layout for the kernels)
    x2d = jnp.transpose(x_nchw, (0, 2, 3, 1)).reshape(P, Cin)
    x2d = jnp.pad(x2d, ((0, 0), (0, Cin_p - Cin))).astype(jnp.float32)

    # weights in kernel layout; matmul weights pre-cast to bf16, depthwise f32
    w2_taps = jnp.transpose(params["w2"][:, 0], (1, 2, 0)).reshape(9, Cexp)
    w2_taps = pad2(w2_taps, 9, Ce_p).astype(jnp.float32)
    w3_k = pad2(params["w3"].T, Ce_p, Co_p).astype(jnp.bfloat16)
    g2, b2 = pad1(params["g2"], Ce_p), pad1(params["b2"], Ce_p)
    g3, b3 = pad1(params["g3"], Co_p), pad1(params["b3"], Co_p)

    if expansion != 1:
        w1_k = pad2(params["w1"].T, Cin_p, Ce_p).astype(jnp.bfloat16)
        g1, b1 = pad1(params["g1"], Ce_p), pad1(params["b1"], Ce_p)
        # K1: 1x1 expansion conv + BN1 partial stats
        h1, s1, q1 = _matmul_stats(x2d, w1_k, tile=tile)
        sc1, sh1 = _bn_scale_shift(s1, q1, g1, b1, count)
        relu_in = True
    else:
        h1 = x2d  # Ce_p == Cin_p; module skips conv1/bn1/relu entirely
        sc1 = jnp.ones((1, Ce_p), jnp.float32)
        sh1 = jnp.zeros((1, Ce_p), jnp.float32)
        relu_in = False

    # K2: BN1+ReLU -> 3x3 depthwise conv + BN2 partial stats (per image)
    h2, s2, q2 = _dwconv_stats(h1, sc1, sh1, w2_taps, N, H, W, relu_in=relu_in)
    sc2, sh2 = _bn_scale_shift(s2, q2, g2, b2, count)

    # K3: BN2+ReLU -> 1x1 projection conv + BN3 partial stats
    h3, s3, q3 = _matmul_stats(h2, w3_k, sc2, sh2, tile=tile)
    sc3, sh3 = _bn_scale_shift(s3, q3, g3, b3, count)

    # K4: BN3 (+ identity residual); MBBlock has no final ReLU
    out2d = _bn_residual(h3, sc3, sh3, x2d if add_residual else None, tile=tile)

    out = out2d[:, :Cout].reshape(N, H, W, Cout)
    return jnp.transpose(out, (0, 3, 1, 2))


# --------------------------------------------------------------------------
# pure-JAX reference mirroring the PyTorch module (train-mode BN)
# --------------------------------------------------------------------------
def mbblock_ref(x, p, *, expansion, stride=1, eps=EPS):
    def bn(h, g, b):
        m = h.mean(axis=(0, 2, 3), keepdims=True)
        v = ((h - m) ** 2).mean(axis=(0, 2, 3), keepdims=True)
        return ((h - m) / jnp.sqrt(v + eps) * g.reshape(1, -1, 1, 1)
                + b.reshape(1, -1, 1, 1))

    N, Cin, H, W = x.shape
    Cout = p["w3"].shape[0]
    out = x
    if expansion != 1:
        out = jnp.einsum('nihw,oi->nohw', x, p["w1"])
        out = jax.nn.relu(bn(out, p["g1"], p["b1"]))
    out = lax.conv_general_dilated(
        out, p["w2"], window_strides=(stride, stride),
        padding=((1, 1), (1, 1)),
        dimension_numbers=('NCHW', 'OIHW', 'NCHW'),
        feature_group_count=out.shape[1])
    out = jax.nn.relu(bn(out, p["g2"], p["b2"]))
    out = jnp.einsum('nihw,oi->nohw', out, p["w3"])
    out = bn(out, p["g3"], p["b3"])
    if Cin == Cout and stride == 1:
        out = out + x
    return out


if __name__ == "__main__":
    N, H, W = 2, 16, 16
    in_channels, out_channels, expansion = 4, 4, 4
    Cexp = in_channels * expansion

    ks = jax.random.split(jax.random.PRNGKey(0), 10)
    params = {
        "w1": jax.random.normal(ks[0], (Cexp, in_channels), jnp.float32) * 0.3,
        "g1": jax.random.uniform(ks[1], (Cexp,), jnp.float32, 0.5, 1.5),
        "b1": jax.random.normal(ks[2], (Cexp,), jnp.float32) * 0.1,
        "w2": jax.random.normal(ks[3], (Cexp, 1, 3, 3), jnp.float32) * 0.3,
        "g2": jax.random.uniform(ks[4], (Cexp,), jnp.float32, 0.5, 1.5),
        "b2": jax.random.normal(ks[5], (Cexp,), jnp.float32) * 0.1,
        "w3": jax.random.normal(ks[6], (out_channels, Cexp), jnp.float32) * 0.3,
        "g3": jax.random.uniform(ks[7], (out_channels,), jnp.float32, 0.5, 1.5),
        "b3": jax.random.normal(ks[8], (out_channels,), jnp.float32) * 0.1,
    }
    x = jax.random.normal(ks[9], (N, in_channels, H, W), jnp.float32)

    fwd = jax.jit(partial(mbblock_forward, expansion=expansion, stride=1))
    out = jax.block_until_ready(fwd(x, params))

    ref = mbblock_ref(x, params, expansion=expansion, stride=1)
    err = float(jnp.max(jnp.abs(out - ref)))
    assert out.shape == (N, out_channels, H, W), out.shape
    # bf16 matmul operands (f32 accumulate) -> loosened tolerance vs f32 ref
    assert err < 1e-1, f"max abs err {err}"
    print("KERNEL_OK")
</pallas_src>

<mosaic_0001>
module attributes {stable_mosaic.version = 11 : i64} {
  func.func @kernel(%arg0: i32, %arg1: memref<256x128xf32, #tpu.memory_space<vmem>>, %arg2: memref<128x128xbf16, #tpu.memory_space<vmem>>, %arg3: memref<256x128xf32, #tpu.memory_space<vmem>>, %arg4: memref<1x1x128xf32, #tpu.memory_space<vmem>>, %arg5: memref<1x1x128xf32, #tpu.memory_space<vmem>>) attributes {dimension_semantics = [#tpu.dimension_semantics<parallel>], iteration_bounds = array<i64: 2>, scalar_prefetch = 0 : i64, scratch_operands = 0 : i64, tpu.core_type = #tpu.core_type<tc>, window_params = [{transform_indices = @transform_0, window_bounds = array<i64: 256, 128>}, {pipeline_mode = #tpu.pipeline_mode<synchronous>, transform_indices = @transform_1, window_bounds = array<i64: 128, 128>}, {transform_indices = @transform_2, window_bounds = array<i64: 256, 128>}, {transform_indices = @transform_3, window_bounds = array<i64: 1, 1, 128>}, {transform_indices = @transform_4, window_bounds = array<i64: 1, 1, 128>}]} {
    %c0 = arith.constant 0 : index
    %c0_0 = arith.constant 0 : index
    %0 = vector.load %arg1[%c0, %c0_0] : memref<256x128xf32, #tpu.memory_space<vmem>>, vector<256x128xf32>
    %1 = arith.truncf %0 : vector<256x128xf32> to vector<256x128xbf16>
    %c0_1 = arith.constant 0 : index
    %c0_2 = arith.constant 0 : index
    %2 = vector.load %arg2[%c0_1, %c0_2] : memref<128x128xbf16, #tpu.memory_space<vmem>>, vector<128x128xbf16>
    %cst = arith.constant dense<0.000000e+00> : vector<256x128xf32>
    %3 = tpu.matmul %1, %2, %cst {dimension_numbers = #tpu.dot_dimension_numbers<[1], [0], [0], [1], [0, 0, 1, 1], [], []>} : vector<256x128xbf16>, vector<128x128xbf16>, vector<256x128xf32> -> vector<256x128xf32>
    %c0_3 = arith.constant 0 : index
    %c0_4 = arith.constant 0 : index
    %4 = vector.load %arg3[%c0_3, %c0_4] : memref<256x128xf32, #tpu.memory_space<vmem>>, vector<256x128xf32>
    tpu.vector_store %arg3[%c0_3, %c0_4], %3 {strides = array<i32>} : memref<256x128xf32, #tpu.memory_space<vmem>>, vector<256x128xf32>,
    %cst_5 = arith.constant dense<0.000000e+00> : vector<128xf32>
    %5 = vector.multi_reduction <add>, %3, %cst_5 [0] : vector<256x128xf32> to vector<128xf32>
    %6 = vector.shape_cast %5 : vector<128xf32> to vector<1x128xf32>
    %c0_6 = arith.constant 0 : index
    %c0_7 = arith.constant 0 : index
    %c0_8 = arith.constant 0 : index
    %7 = vector.load %arg4[%c0_6, %c0_7, %c0_8] : memref<1x1x128xf32, #tpu.memory_space<vmem>>, vector<1x1x128xf32>
    %8 = vector.shape_cast %7 : vector<1x1x128xf32> to vector<1x128xf32>
    %9 = vector.shape_cast %6 : vector<1x128xf32> to vector<1x1x128xf32>
    tpu.vector_store %arg4[%c0_6, %c0_7, %c0_8], %9 {strides = array<i32>} : memref<1x1x128xf32, #tpu.memory_space<vmem>>, vector<1x1x128xf32>,
    %10 = arith.mulf %3, %3 : vector<256x128xf32>
    %cst_9 = arith.constant dense<0.000000e+00> : vector<128xf32>
    %11 = vector.multi_reduction <add>, %10, %cst_9 [0] : vector<256x128xf32> to vector<128xf32>
    %12 = vector.shape_cast %11 : vector<128xf32> to vector<1x128xf32>
    %c0_10 = arith.constant 0 : index
    %c0_11 = arith.constant 0 : index
    %c0_12 = arith.constant 0 : index
    %13 = vector.load %arg5[%c0_10, %c0_11, %c0_12] : memref<1x1x128xf32, #tpu.memory_space<vmem>>, vector<1x1x128xf32>
    %14 = vector.shape_cast %13 : vector<1x1x128xf32> to vector<1x128xf32>
    %15 = vector.shape_cast %12 : vector<1x128xf32> to vector<1x1x128xf32>
    tpu.vector_store %arg5[%c0_10, %c0_11, %c0_12], %15 {strides = array<i32>} : memref<1x1x128xf32, #tpu.memory_space<vmem>>, vector<1x1x128xf32>,
    return
  }
  func.func @transform_0(%arg0: i32) -> (i32, i32) {
    %c0_i32 = arith.constant 0 : i32
    %c0_i32_0 = arith.constant 0 : i32
    return %arg0, %c0_i32 : i32, i32
  }
  func.func @transform_1(%arg0: i32) -> (i32, i32) {
    %c0_i32 = arith.constant 0 : i32
    %c0_i32_0 = arith.constant 0 : i32
    %c0_i32_1 = arith.constant 0 : i32
    return %c0_i32, %c0_i32_0 : i32, i32
  }
  func.func @transform_2(%arg0: i32) -> (i32, i32) {
    %c0_i32 = arith.constant 0 : i32
    %c0_i32_0 = arith.constant 0 : i32
    return %arg0, %c0_i32 : i32, i32
  }
  func.func @transform_3(%arg0: i32) -> (i32, i32, i32) {
    %c0_i32 = arith.constant 0 : i32
    %c0_i32_0 = arith.constant 0 : i32
    %c0_i32_1 = arith.constant 0 : i32
    return %arg0, %c0_i32, %c0_i32_0 : i32, i32, i32
  }
  func.func @transform_4(%arg0: i32) -> (i32, i32, i32) {
    %c0_i32 = arith.constant 0 : i32
    %c0_i32_0 = arith.constant 0 : i32
    %c0_i32_1 = arith.constant 0 : i32
    return %arg0, %c0_i32, %c0_i32_0 : i32, i32, i32
  }
}

module attributes {stable_mosaic.version = 11 : i64} {
  func.func @kernel(%arg0: i32, %arg1: memref<1x256x128xf32, #tpu.memory_space<vmem>>, %arg2: memref<1x128xf32, #tpu.memory_space<vmem>>, %arg3: memref<1x128xf32, #tpu.memory_space<vmem>>, %arg4: memref<9x128xf32, #tpu.memory_space<vmem>>, %arg5: memref<1x256x128xf32, #tpu.memory_space<vmem>>, %arg6: memref<1x1x128xf32, #tpu.memory_space<vmem>>, %arg7: memref<1x1x128xf32, #tpu.memory_space<vmem>>, %arg8: memref<290x128xf32, #tpu.memory_space<vmem>>) attributes {dimension_semantics = [#tpu.dimension_semantics<parallel>], iteration_bounds = array<i64: 2>, scalar_prefetch = 0 : i64, scratch_operands = 1 : i64, tpu.core_type = #tpu.core_type<tc>, window_params = [{transform_indices = @transform_0, window_bounds = array<i64: 1, 256, 128>}, {pipeline_mode = #tpu.pipeline_mode<synchronous>, transform_indices = @transform_1, window_bounds = array<i64: 1, 128>}, {pipeline_mode = #tpu.pipeline_mode<synchronous>, transform_indices = @transform_2, window_bounds = array<i64: 1, 128>}, {pipeline_mode = #tpu.pipeline_mode<synchronous>, transform_indices = @transform_3, window_bounds = array<i64: 9, 128>}, {transform_indices = @transform_4, window_bounds = array<i64: 1, 256, 128>}, {transform_indices = @transform_5, window_bounds = array<i64: 1, 1, 128>}, {transform_indices = @transform_6, window_bounds = array<i64: 1, 1, 128>}]} {
    %c0 = arith.constant 0 : index
    %c0_0 = arith.constant 0 : index
    %c0_1 = arith.constant 0 : index
    %0 = vector.load %arg1[%c0, %c0_0, %c0_1] : memref<1x256x128xf32, #tpu.memory_space<vmem>>, vector<1x256x128xf32>
    %1 = vector.shape_cast %0 : vector<1x256x128xf32> to vector<256x128xf32>
    %c0_2 = arith.constant 0 : index
    %c0_3 = arith.constant 0 : index
    %2 = vector.load %arg2[%c0_2, %c0_3] : memref<1x128xf32, #tpu.memory_space<vmem>>, vector<1x128xf32>
    %3 = vector.broadcast %2 : vector<1x128xf32> to vector<256x128xf32>
    %4 = arith.mulf %1, %3 : vector<256x128xf32>
    %c0_4 = arith.constant 0 : index
    %c0_5 = arith.constant 0 : index
    %5 = vector.load %arg3[%c0_4, %c0_5] : memref<1x128xf32, #tpu.memory_space<vmem>>, vector<1x128xf32>
    %6 = vector.broadcast %5 : vector<1x128xf32> to vector<256x128xf32>
    %7 = arith.addf %4, %6 : vector<256x128xf32>
    %cst = arith.constant 0.000000e+00 : f32
    %8 = vector.broadcast %cst : f32 to vector<256x128xf32>
    %9 = arith.maximumf %7, %8 : vector<256x128xf32>
    %cst_6 = arith.constant 0.000000e+00 : f32
    %10 = vector.broadcast %cst_6 : f32 to vector<17x128xf32>
    %c0_7 = arith.constant 0 : index
    %c0_8 = arith.constant 0 : index
    %11 = vector.load %arg8[%c0_7, %c0_8] : memref<290x128xf32, #tpu.memory_space<vmem>>, vector<17x128xf32>
    tpu.vector_store %arg8[%c0_7, %c0_8], %10 {strides = array<i32>} : memref<290x128xf32, #tpu.memory_space<vmem>>, vector<17x128xf32>,
    %c273 = arith.constant 273 : index
    %c0_9 = arith.constant 0 : index
    %12 = vector.load %arg8[%c273, %c0_9] : memref<290x128xf32, #tpu.memory_space<vmem>>, vector<17x128xf32>
    tpu.vector_store %arg8[%c273, %c0_9], %10 {strides = array<i32>} : memref<290x128xf32, #tpu.memory_space<vmem>>, vector<17x128xf32>,
    %c17 = arith.constant 17 : index
    %c0_10 = arith.constant 0 : index
    %13 = vector.load %arg8[%c17, %c0_10] : memref<290x128xf32, #tpu.memory_space<vmem>>, vector<256x128xf32>
    tpu.vector_store %arg8[%c17, %c0_10], %9 {strides = array<i32>} : memref<290x128xf32, #tpu.memory_space<vmem>>, vector<256x128xf32>,
    %14 = tpu.iota {dimensions = array<i32: 0>} : vector<256x1xi32>
    %c16_i32 = arith.constant 16 : i32
    %c0_i32 = arith.constant 0 : i32
    %15 = arith.cmpi eq, %c16_i32, %c0_i32 : i32
    %c1_i32 = arith.constant 1 : i32
    %16 = arith.select %15, %c1_i32, %c16_i32 : i32
    %17 = vector.broadcast %16 : i32 to vector<256x1xi32>
    %18 = arith.remsi %14, %17 : vector<256x1xi32>
    %c0_i32_11 = arith.constant 0 : i32
    %19 = vector.broadcast %c0_i32_11 : i32 to vector<256x1xi32>
    %20 = arith.cmpi ne, %18, %19 : vector<256x1xi32>
    %c0_i32_12 = arith.constant 0 : i32
    %21 = vector.broadcast %c0_i32_12 : i32 to vector<256x1xi32>
    %22 = arith.cmpi slt, %18, %21 : vector<256x1xi32>
    %c0_i32_13 = arith.constant 0 : i32
    %23 = arith.cmpi slt, %16, %c0_i32_13 : i32
    %24 = vector.broadcast %23 : i1 to vector<256x1xi1>
    %25 = vector.broadcast %24 : vector<256x1xi1> to vector<256x1xi1>
    %26 = arith.xori %22, %25 : vector<256x1xi1>
    %27 = arith.andi %26, %20 : vector<256x1xi1>
    %28 = vector.broadcast %16 : i32 to vector<256x1xi32>
    %29 = arith.addi %18, %28 : vector<256x1xi32>
    %30 = arith.select %27, %29, %18 : vector<256x1xi1>, vector<256x1xi32>
    %c1_i32_14 = arith.constant 1 : i32
    %31 = vector.broadcast %c1_i32_14 : i32 to vector<256x1xi32>
    %32 = arith.cmpi sge, %30, %31 : vector<256x1xi32>
    %33 = arith.extui %32 : vector<256x1xi1> to vector<256x1xi32>
    %34 = arith.sitofp %33 : vector<256x1xi32> to vector<256x1xf32>
    %c15_i32 = arith.constant 15 : i32
    %35 = vector.broadcast %c15_i32 : i32 to vector<256x1xi32>
    %36 = arith.cmpi slt, %30, %35 : vector<256x1xi32>
    %37 = arith.extui %36 : vector<256x1xi1> to vector<256x1xi32>
    %38 = arith.sitofp %37 : vector<256x1xi32> to vector<256x1xf32>
    %cst_15 = arith.constant 0.000000e+00 : f32
    %39 = vector.broadcast %cst_15 : f32 to vector<256x128xf32>
    %c0_16 = arith.constant 0 : index
    %c0_17 = arith.constant 0 : index
    %40 = vector.load %arg8[%c0_16, %c0_17] : memref<290x128xf32, #tpu.memory_space<vmem>>, vector<256x128xf32>
    %41 = vector.broadcast %34 : vector<256x1xf32> to vector<256x128xf32>
    %42 = arith.mulf %40, %41 : vector<256x128xf32>
    %c0_18 = arith.constant 0 : index
    %c0_19 = arith.constant 0 : index
    %43 = vector.load %arg4[%c0_18, %c0_19] : memref<9x128xf32, #tpu.memory_space<vmem>>, vector<1x128xf32>
    %44 = vector.broadcast %43 : vector<1x128xf32> to vector<256x128xf32>
    %45 = arith.mulf %42, %44 : vector<256x128xf32>
    %46 = arith.addf %39, %45 : vector<256x128xf32>
    %c1 = arith.constant 1 : index
    %c0_20 = arith.constant 0 : index
    %47 = vector.load %arg8[%c1, %c0_20] : memref<290x128xf32, #tpu.memory_space<vmem>>, vector<256x128xf32>
    %c1_21 = arith.constant 1 : index
    %c0_22 = arith.constant 0 : index
    %48 = vector.load %arg4[%c1_21, %c0_22] : memref<9x128xf32, #tpu.memory_space<vmem>>, vector<1x128xf32>
    %49 = vector.broadcast %48 : vector<1x128xf32> to vector<256x128xf32>
    %50 = arith.mulf %47, %49 : vector<256x128xf32>
    %51 = arith.addf %46, %50 : vector<256x128xf32>
    %c2 = arith.constant 2 : index
    %c0_23 = arith.constant 0 : index
    %52 = vector.load %arg8[%c2, %c0_23] : memref<290x128xf32, #tpu.memory_space<vmem>>, vector<256x128xf32>
    %53 = vector.broadcast %38 : vector<256x1xf32> to vector<256x128xf32>
    %54 = arith.mulf %52, %53 : vector<256x128xf32>
    %c2_24 = arith.constant 2 : index
    %c0_25 = arith.constant 0 : index
    %55 = vector.load %arg4[%c2_24, %c0_25] : memref<9x128xf32, #tpu.memory_space<vmem>>, vector<1x128xf32>
    %56 = vector.broadcast %55 : vector<1x128xf32> to vector<256x128xf32>
    %57 = arith.mulf %54, %56 : vector<256x128xf32>
    %58 = arith.addf %51, %57 : vector<256x128xf32>
    %c16 = arith.constant 16 : index
    %c0_26 = arith.constant 0 : index
    %59 = vector.load %arg8[%c16, %c0_26] : memref<290x128xf32, #tpu.memory_space<vmem>>, vector<256x128xf32>
    %60 = vector.broadcast %34 : vector<256x1xf32> to vector<256x128xf32>
    %61 = arith.mulf %59, %60 : vector<256x128xf32>
    %c3 = arith.constant 3 : index
    %c0_27 = arith.constant 0 : index
    %62 = vector.load %arg4[%c3, %c0_27] : memref<9x128xf32, #tpu.memory_space<vmem>>, vector<1x128xf32>
    %63 = vector.broadcast %62 : vector<1x128xf32> to vector<256x128xf32>
    %64 = arith.mulf %61, %63 : vector<256x128xf32>
    %65 = arith.addf %58, %64 : vector<256x128xf32>
    %c17_28 = arith.constant 17 : index
    %c0_29 = arith.constant 0 : index
    %66 = vector.load %arg8[%c17_28, %c0_29] : memref<290x128xf32, #tpu.memory_space<vmem>>, vector<256x128xf32>
    %c4 = arith.constant 4 : index
    %c0_30 = arith.constant 0 : index
    %67 = vector.load %arg4[%c4, %c0_30] : memref<9x128xf32, #tpu.memory_space<vmem>>, vector<1x128xf32>
    %68 = vector.broadcast %67 : vector<1x128xf32> to vector<256x128xf32>
    %69 = arith.mulf %66, %68 : vector<256x128xf32>
    %70 = arith.addf %65, %69 : vector<256x128xf32>
    %c18 = arith.constant 18 : index
    %c0_31 = arith.constant 0 : index
    %71 = vector.load %arg8[%c18, %c0_31] : memref<290x128xf32, #tpu.memory_space<vmem>>, vector<256x128xf32>
    %72 = vector.broadcast %38 : vector<256x1xf32> to vector<256x128xf32>
    %73 = arith.mulf %71, %72 : vector<256x128xf32>
    %c5 = arith.constant 5 : index
    %c0_32 = arith.constant 0 : index
    %74 = vector.load %arg4[%c5, %c0_32] : memref<9x128xf32, #tpu.memory_space<vmem>>, vector<1x128xf32>
    %75 = vector.broadcast %74 : vector<1x128xf32> to vector<256x128xf32>
    %76 = arith.mulf %73, %75 : vector<256x128xf32>
    %77 = arith.addf %70, %76 : vector<256x128xf32>
    %c32 = arith.constant 32 : index
    %c0_33 = arith.constant 0 : index
    %78 = vector.load %arg8[%c32, %c0_33] : memref<290x128xf32, #tpu.memory_space<vmem>>, vector<256x128xf32>
    %79 = vector.broadcast %34 : vector<256x1xf32> to vector<256x128xf32>
    %80 = arith.mulf %78, %79 : vector<256x128xf32>
    %c6 = arith.constant 6 : index
    %c0_34 = arith.constant 0 : index
    %81 = vector.load %arg4[%c6, %c0_34] : memref<9x128xf32, #tpu.memory_space<vmem>>, vector<1x128xf32>
    %82 = vector.broadcast %81 : vector<1x128xf32> to vector<256x128xf32>
    %83 = arith.mulf %80, %82 : vector<256x128xf32>
    %84 = arith.addf %77, %83 : vector<256x128xf32>
    %c33 = arith.constant 33 : index
    %c0_35 = arith.constant 0 : index
    %85 = vector.load %arg8[%c33, %c0_35] : memref<290x128xf32, #tpu.memory_space<vmem>>, vector<256x128xf32>
    %c7 = arith.constant 7 : index
    %c0_36 = arith.constant 0 : index
    %86 = vector.load %arg4[%c7, %c0_36] : memref<9x128xf32, #tpu.memory_space<vmem>>, vector<1x128xf32>
    %87 = vector.broadcast %86 : vector<1x128xf32> to vector<256x128xf32>
    %88 = arith.mulf %85, %87 : vector<256x128xf32>
    %89 = arith.addf %84, %88 : vector<256x128xf32>
    %c34 = arith.constant 34 : index
    %c0_37 = arith.constant 0 : index
    %90 = vector.load %arg8[%c34, %c0_37] : memref<290x128xf32, #tpu.memory_space<vmem>>, vector<256x128xf32>
    %91 = vector.broadcast %38 : vector<256x1xf32> to vector<256x128xf32>
    %92 = arith.mulf %90, %91 : vector<256x128xf32>
    %c8 = arith.constant 8 : index
    %c0_38 = arith.constant 0 : index
    %93 = vector.load %arg4[%c8, %c0_38] : memref<9x128xf32, #tpu.memory_space<vmem>>, vector<1x128xf32>
    %94 = vector.broadcast %93 : vector<1x128xf32> to vector<256x128xf32>
    %95 = arith.mulf %92, %94 : vector<256x128xf32>
    %96 = arith.addf %89, %95 : vector<256x128xf32>
    %c0_39 = arith.constant 0 : index
    %c0_40 = arith.constant 0 : index
    %c0_41 = arith.constant 0 : index
    %97 = vector.load %arg5[%c0_39, %c0_40, %c0_41] : memref<1x256x128xf32, #tpu.memory_space<vmem>>, vector<1x256x128xf32>
    %98 = vector.shape_cast %97 : vector<1x256x128xf32> to vector<256x128xf32>
    %99 = vector.shape_cast %96 : vector<256x128xf32> to vector<1x256x128xf32>
    tpu.vector_store %arg5[%c0_39, %c0_40, %c0_41], %99 {strides = array<i32>} : memref<1x256x128xf32, #tpu.memory_space<vmem>>, vector<1x256x128xf32>,
    %cst_42 = arith.constant dense<0.000000e+00> : vector<128xf32>
    %100 = vector.multi_reduction <add>, %96, %cst_42 [0] : vector<256x128xf32> to vector<128xf32>
    %101 = vector.shape_cast %100 : vector<128xf32> to vector<1x128xf32>
    %c0_43 = arith.constant 0 : index
    %c0_44 = arith.constant 0 : index
    %c0_45 = arith.constant 0 : index
    %102 = vector.load %arg6[%c0_43, %c0_44, %c0_45] : memref<1x1x128xf32, #tpu.memory_space<vmem>>, vector<1x1x128xf32>
    %103 = vector.shape_cast %102 : vector<1x1x128xf32> to vector<1x128xf32>
    %104 = vector.shape_cast %101 : vector<1x128xf32> to vector<1x1x128xf32>
    tpu.vector_store %arg6[%c0_43, %c0_44, %c0_45], %104 {strides = array<i32>} : memref<1x1x128xf32, #tpu.memory_space<vmem>>, vector<1x1x128xf32>,
    %105 = arith.mulf %96, %96 : vector<256x128xf32>
    %cst_46 = arith.constant dense<0.000000e+00> : vector<128xf32>
    %106 = vector.multi_reduction <add>, %105, %cst_46 [0] : vector<256x128xf32> to vector<128xf32>
    %107 = vector.shape_cast %106 : vector<128xf32> to vector<1x128xf32>
    %c0_47 = arith.constant 0 : index
    %c0_48 = arith.constant 0 : index
    %c0_49 = arith.constant 0 : index
    %108 = vector.load %arg7[%c0_47, %c0_48, %c0_49] : memref<1x1x128xf32, #tpu.memory_space<vmem>>, vector<1x1x128xf32>
    %109 = vector.shape_cast %108 : vector<1x1x128xf32> to vector<1x128xf32>
    %110 = vector.shape_cast %107 : vector<1x128xf32> to vector<1x1x128xf32>
    tpu.vector_store %arg7[%c0_47, %c0_48, %c0_49], %110 {strides = array<i32>} : memref<1x1x128xf32, #tpu.memory_space<vmem>>, vector<1x1x128xf32>,
    return
  }
  func.func @transform_0(%arg0: i32) -> (i32, i32, i32) {
    %c0_i32 = arith.constant 0 : i32
    %c0_i32_0 = arith.constant 0 : i32
    %c0_i32_1 = arith.constant 0 : i32
    return %arg0, %c0_i32, %c0_i32_0 : i32, i32, i32
  }
  func.func @transform_1(%arg0: i32) -> (i32, i32) {
    %c0_i32 = arith.constant 0 : i32
    %c0_i32_0 = arith.constant 0 : i32
    %c0_i32_1 = arith.constant 0 : i32
    return %c0_i32, %c0_i32_0 : i32, i32
  }
  func.func @transform_2(%arg0: i32) -> (i32, i32) {
    %c0_i32 = arith.constant 0 : i32
    %c0_i32_0 = arith.constant 0 : i32
    %c0_i32_1 = arith.constant 0 : i32
    return %c0_i32, %c0_i32_0 : i32, i32
  }
  func.func @transform_3(%arg0: i32) -> (i32, i32) {
    %c0_i32 = arith.constant 0 : i32
    %c0_i32_0 = arith.constant 0 : i32
    %c0_i32_1 = arith.constant 0 : i32
    return %c0_i32, %c0_i32_0 : i32, i32
  }
  func.func @transform_4(%arg0: i32) -> (i32, i32, i32) {
    %c0_i32 = arith.constant 0 : i32
    %c0_i32_0 = arith.constant 0 : i32
    %c0_i32_1 = arith.constant 0 : i32
    return %arg0, %c0_i32, %c0_i32_0 : i32, i32, i32
  }
  func.func @transform_5(%arg0: i32) -> (i32, i32, i32) {
    %c0_i32 = arith.constant 0 : i32
    %c0_i32_0 = arith.constant 0 : i32
    %c0_i32_1 = arith.constant 0 : i32
    return %arg0, %c0_i32, %c0_i32_0 : i32, i32, i32
  }
  func.func @transform_6(%arg0: i32) -> (i32, i32, i32) {
    %c0_i32 = arith.constant 0 : i32
    %c0_i32_0 = arith.constant 0 : i32
    %c0_i32_1 = arith.constant 0 : i32
    return %arg0, %c0_i32, %c0_i32_0 : i32, i32, i32
  }
}

module attributes {stable_mosaic.version = 11 : i64} {
  func.func @kernel(%arg0: i32, %arg1: memref<256x128xf32, #tpu.memory_space<vmem>>, %arg2: memref<1x128xf32, #tpu.memory_space<vmem>>, %arg3: memref<1x128xf32, #tpu.memory_space<vmem>>, %arg4: memref<128x128xbf16, #tpu.memory_space<vmem>>, %arg5: memref<256x128xf32, #tpu.memory_space<vmem>>, %arg6: memref<1x1x128xf32, #tpu.memory_space<vmem>>, %arg7: memref<1x1x128xf32, #tpu.memory_space<vmem>>) attributes {dimension_semantics = [#tpu.dimension_semantics<parallel>], iteration_bounds = array<i64: 2>, scalar_prefetch = 0 : i64, scratch_operands = 0 : i64, tpu.core_type = #tpu.core_type<tc>, window_params = [{transform_indices = @transform_0, window_bounds = array<i64: 256, 128>}, {pipeline_mode = #tpu.pipeline_mode<synchronous>, transform_indices = @transform_1, window_bounds = array<i64: 1, 128>}, {pipeline_mode = #tpu.pipeline_mode<synchronous>, transform_indices = @transform_2, window_bounds = array<i64: 1, 128>}, {pipeline_mode = #tpu.pipeline_mode<synchronous>, transform_indices = @transform_3, window_bounds = array<i64: 128, 128>}, {transform_indices = @transform_4, window_bounds = array<i64: 256, 128>}, {transform_indices = @transform_5, window_bounds = array<i64: 1, 1, 128>}, {transform_indices = @transform_6, window_bounds = array<i64: 1, 1, 128>}]} {
    %c0 = arith.constant 0 : index
    %c0_0 = arith.constant 0 : index
    %0 = vector.load %arg1[%c0, %c0_0] : memref<256x128xf32, #tpu.memory_space<vmem>>, vector<256x128xf32>
    %c0_1 = arith.constant 0 : index
    %c0_2 = arith.constant 0 : index
    %1 = vector.load %arg2[%c0_1, %c0_2] : memref<1x128xf32, #tpu.memory_space<vmem>>, vector<1x128xf32>
    %2 = vector.broadcast %1 : vector<1x128xf32> to vector<256x128xf32>
    %3 = arith.mulf %0, %2 : vector<256x128xf32>
    %c0_3 = arith.constant 0 : index
    %c0_4 = arith.constant 0 : index
    %4 = vector.load %arg3[%c0_3, %c0_4] : memref<1x128xf32, #tpu.memory_space<vmem>>, vector<1x128xf32>
    %5 = vector.broadcast %4 : vector<1x128xf32> to vector<256x128xf32>
    %6 = arith.addf %3, %5 : vector<256x128xf32>
    %cst = arith.constant 0.000000e+00 : f32
    %7 = vector.broadcast %cst : f32 to vector<256x128xf32>
    %8 = arith.maximumf %6, %7 : vector<256x128xf32>
    %9 = arith.truncf %8 : vector<256x128xf32> to vector<256x128xbf16>
    %c0_5 = arith.constant 0 : index
    %c0_6 = arith.constant 0 : index
    %10 = vector.load %arg4[%c0_5, %c0_6] : memref<128x128xbf16, #tpu.memory_space<vmem>>, vector<128x128xbf16>
    %cst_7 = arith.constant dense<0.000000e+00> : vector<256x128xf32>
    %11 = tpu.matmul %9, %10, %cst_7 {dimension_numbers = #tpu.dot_dimension_numbers<[1], [0], [0], [1], [0, 0, 1, 1], [], []>} : vector<256x128xbf16>, vector<128x128xbf16>, vector<256x128xf32> -> vector<256x128xf32>
    %c0_8 = arith.constant 0 : index
    %c0_9 = arith.constant 0 : index
    %12 = vector.load %arg5[%c0_8, %c0_9] : memref<256x128xf32, #tpu.memory_space<vmem>>, vector<256x128xf32>
    tpu.vector_store %arg5[%c0_8, %c0_9], %11 {strides = array<i32>} : memref<256x128xf32, #tpu.memory_space<vmem>>, vector<256x128xf32>,
    %cst_10 = arith.constant dense<0.000000e+00> : vector<128xf32>
    %13 = vector.multi_reduction <add>, %11, %cst_10 [0] : vector<256x128xf32> to vector<128xf32>
    %14 = vector.shape_cast %13 : vector<128xf32> to vector<1x128xf32>
    %c0_11 = arith.constant 0 : index
    %c0_12 = arith.constant 0 : index
    %c0_13 = arith.constant 0 : index
    %15 = vector.load %arg6[%c0_11, %c0_12, %c0_13] : memref<1x1x128xf32, #tpu.memory_space<vmem>>, vector<1x1x128xf32>
    %16 = vector.shape_cast %15 : vector<1x1x128xf32> to vector<1x128xf32>
    %17 = vector.shape_cast %14 : vector<1x128xf32> to vector<1x1x128xf32>
    tpu.vector_store %arg6[%c0_11, %c0_12, %c0_13], %17 {strides = array<i32>} : memref<1x1x128xf32, #tpu.memory_space<vmem>>, vector<1x1x128xf32>,
    %18 = arith.mulf %11, %11 : vector<256x128xf32>
    %cst_14 = arith.constant dense<0.000000e+00> : vector<128xf32>
    %19 = vector.multi_reduction <add>, %18, %cst_14 [0] : vector<256x128xf32> to vector<128xf32>
    %20 = vector.shape_cast %19 : vector<128xf32> to vector<1x128xf32>
    %c0_15 = arith.constant 0 : index
    %c0_16 = arith.constant 0 : index
    %c0_17 = arith.constant 0 : index
    %21 = vector.load %arg7[%c0_15, %c0_16, %c0_17] : memref<1x1x128xf32, #tpu.memory_space<vmem>>, vector<1x1x128xf32>
    %22 = vector.shape_cast %21 : vector<1x1x128xf32> to vector<1x128xf32>
    %23 = vector.shape_cast %20 : vector<1x128xf32> to vector<1x1x128xf32>
    tpu.vector_store %arg7[%c0_15, %c0_16, %c0_17], %23 {strides = array<i32>} : memref<1x1x128xf32, #tpu.memory_space<vmem>>, vector<1x1x128xf32>,
    return
  }
  func.func @transform_0(%arg0: i32) -> (i32, i32) {
    %c0_i32 = arith.constant 0 : i32
    %c0_i32_0 = arith.constant 0 : i32
    return %arg0, %c0_i32 : i32, i32
  }
  func.func @transform_1(%arg0: i32) -> (i32, i32) {
    %c0_i32 = arith.constant 0 : i32
    %c0_i32_0 = arith.constant 0 : i32
    %c0_i32_1 = arith.constant 0 : i32
    return %c0_i32, %c0_i32_0 : i32, i32
  }
  func.func @transform_2(%arg0: i32) -> (i32, i32) {
    %c0_i32 = arith.constant 0 : i32
    %c0_i32_0 = arith.constant 0 : i32
    %c0_i32_1 = arith.constant 0 : i32
    return %c0_i32, %c0_i32_0 : i32, i32
  }
  func.func @transform_3(%arg0: i32) -> (i32, i32) {
    %c0_i32 = arith.constant 0 : i32
    %c0_i32_0 = arith.constant 0 : i32
    %c0_i32_1 = arith.constant 0 : i32
    return %c0_i32, %c0_i32_0 : i32, i32
  }
  func.func @transform_4(%arg0: i32) -> (i32, i32) {
    %c0_i32 = arith.constant 0 : i32
    %c0_i32_0 = arith.constant 0 : i32
    return %arg0, %c0_i32 : i32, i32
  }
  func.func @transform_5(%arg0: i32) -> (i32, i32, i32) {
    %c0_i32 = arith.constant 0 : i32
    %c0_i32_0 = arith.constant 0 : i32
    %c0_i32_1 = arith.constant 0 : i32
    return %arg0, %c0_i32, %c0_i32_0 : i32, i32, i32
  }
  func.func @transform_6(%arg0: i32) -> (i32, i32, i32) {
    %c0_i32 = arith.constant 0 : i32
    %c0_i32_0 = arith.constant 0 : i32
    %c0_i32_1 = arith.constant 0 : i32
    return %arg0, %c0_i32, %c0_i32_0 : i32, i32, i32
  }
}

module attributes {stable_mosaic.version = 11 : i64} {
  func.func @kernel(%arg0: i32, %arg1: memref<256x128xf32, #tpu.memory_space<vmem>>, %arg2: memref<1x128xf32, #tpu.memory_space<vmem>>, %arg3: memref<1x128xf32, #tpu.memory_space<vmem>>, %arg4: memref<256x128xf32, #tpu.memory_space<vmem>>, %arg5: memref<256x128xf32, #tpu.memory_space<vmem>>) attributes {dimension_semantics = [#tpu.dimension_semantics<parallel>], iteration_bounds = array<i64: 2>, scalar_prefetch = 0 : i64, scratch_operands = 0 : i64, tpu.core_type = #tpu.core_type<tc>, window_params = [{transform_indices = @transform_0, window_bounds = array<i64: 256, 128>}, {pipeline_mode = #tpu.pipeline_mode<synchronous>, transform_indices = @transform_1, window_bounds = array<i64: 1, 128>}, {pipeline_mode = #tpu.pipeline_mode<synchronous>, transform_indices = @transform_2, window_bounds = array<i64: 1, 128>}, {transform_indices = @transform_3, window_bounds = array<i64: 256, 128>}, {transform_indices = @transform_4, window_bounds = array<i64: 256, 128>}]} {
    %c0 = arith.constant 0 : index
    %c0_0 = arith.constant 0 : index
    %0 = vector.load %arg1[%c0, %c0_0] : memref<256x128xf32, #tpu.memory_space<vmem>>, vector<256x128xf32>
    %c0_1 = arith.constant 0 : index
    %c0_2 = arith.constant 0 : index
    %1 = vector.load %arg2[%c0_1, %c0_2] : memref<1x128xf32, #tpu.memory_space<vmem>>, vector<1x128xf32>
    %2 = vector.broadcast %1 : vector<1x128xf32> to vector<256x128xf32>
    %3 = arith.mulf %0, %2 : vector<256x128xf32>
    %c0_3 = arith.constant 0 : index
    %c0_4 = arith.constant 0 : index
    %4 = vector.load %arg3[%c0_3, %c0_4] : memref<1x128xf32, #tpu.memory_space<vmem>>, vector<1x128xf32>
    %5 = vector.broadcast %4 : vector<1x128xf32> to vector<256x128xf32>
    %6 = arith.addf %3, %5 : vector<256x128xf32>
    %c0_5 = arith.constant 0 : index
    %c0_6 = arith.constant 0 : index
    %7 = vector.load %arg4[%c0_5, %c0_6] : memref<256x128xf32, #tpu.memory_space<vmem>>, vector<256x128xf32>
    %8 = arith.addf %6, %7 : vector<256x128xf32>
    %c0_7 = arith.constant 0 : index
    %c0_8 = arith.constant 0 : index
    %9 = vector.load %arg5[%c0_7, %c0_8] : memref<256x128xf32, #tpu.memory_space<vmem>>, vector<256x128xf32>
    tpu.vector_store %arg5[%c0_7, %c0_8], %8 {strides = array<i32>} : memref<256x128xf32, #tpu.memory_space<vmem>>, vector<256x128xf32>,
    return
  }
  func.func @transform_0(%arg0: i32) -> (i32, i32) {
    %c0_i32 = arith.constant 0 : i32
    %c0_i32_0 = arith.constant 0 : i32
    return %arg0, %c0_i32 : i32, i32
  }
  func.func @transform_1(%arg0: i32) -> (i32, i32) {
    %c0_i32 = arith.constant 0 : i32
    %c0_i32_0 = arith.constant 0 : i32
    %c0_i32_1 = arith.constant 0 : i32
    return %c0_i32, %c0_i32_0 : i32, i32
  }
  func.func @transform_2(%arg0: i32) -> (i32, i32) {
    %c0_i32 = arith.constant 0 : i32
    %c0_i32_0 = arith.constant 0 : i32
    %c0_i32_1 = arith.constant 0 : i32
    return %c0_i32, %c0_i32_0 : i32, i32
  }
  func.func @transform_3(%arg0: i32) -> (i32, i32) {
    %c0_i32 = arith.constant 0 : i32
    %c0_i32_0 = arith.constant 0 : i32
    return %arg0, %c0_i32 : i32, i32
  }
  func.func @transform_4(%arg0: i32) -> (i32, i32) {
    %c0_i32 = arith.constant 0 : i32
    %c0_i32_0 = arith.constant 0 : i32
    return %arg0, %c0_i32 : i32, i32
  }
}

</mosaic_0001>

<bundles_post_ra>
// kernel: mbblock_forward.7
= control target key start
LH: loop header
LB: loop body
LE: loop exit
PB: predicated region body
PF: predicated region fallthrough
CT: control target
= control target key end

     0   :  { %s553_s15 = smov 0   ;;  %s749_s0 = inlined_call_operand.vmem [shape: f32[512,128], index: 0, kind: input, shape index: {}]   ;;  %s750_s1 = inlined_call_operand.vmem [shape: f32[1,128], index: 1, kind: input, shape index: {}]   ;;  %s751_s2 = inlined_call_operand.vmem [shape: f32[1,128], index: 2, kind: input, shape index: {}]   ;;  %s752_s3 = inlined_call_operand.vmem [shape: f32[512,128], index: 3, kind: input, shape index: {}]   ;;  %s753_s4 = inlined_call_operand.vmem [shape: f32[512,128], index: 4, kind: output, shape index: {}]  }
   0x1 LB: > { %s497_s16 = sadd.s32 4294967295, %s526_s15   ;;  %p501_p0 = scmp.ge.s32.totalorder %s526_s15, 1  ;;  %s526_s15 = sphi %s553_s15, %s14_s15  }
   0x2   : > { %p174_p1 = scmp.lt.s32.totalorder %s526_s15, 3 }
   0x4   : > { %p175_p2 = pnand %p501_p0, %p174_p1 }
   0x5   : > { %s502_s17 = sshll.u32 (!%p175_p2), %s497_s16, 5  ;;  %v564_v0 = vld [vmem:[%s750_s1] ss:$0 sm:$0xff] (!%p175_p2) }
   0x6   : > { %178 = sbr.rel (%p175_p2) target bundleno = 49 (0x31), region = 36  ;;  %p206_p3 = scmp.lt.s32.totalorder (!%p175_p2), %s502_s17, 63  ;;  %v580_v2 = vld [vmem:[%s751_s2] ss:$0 sm:$0xff] (!%p175_p2) }
   0xd   : > { %s755_s17 = smov (!%p206_p3, %s502_s17), 63 }
   0xe   : > { %s503_s18 = sshll.u32 %s755_s17, 3 }
   0xf   : > { %s569_s23 = scalar_lea.vmem %s749_s0, %s503_s18  ;;  %s574_s26 = scalar_lea.vmem %s752_s3, %s503_s18 }
  0x10   : > { %v223_v1 = vld [vmem:[%s569_s23] sm:$0xff]  ;;  %v224_v3 = vld [vmem:[%s569_s23 + $0x8] sm:$0xff]  ;;  %v225_v7 = vld [vmem:[%s569_s23 + $0x10] sm:$0xff]  ;;  %s601_s5 = scalar_lea.vmem %s753_s4, %s503_s18 }
  0x11   : > { %v262_v4 = vmul.f32 %v564_v0, %v223_v1  ;;  %v333_v5 = vld [vmem:[%s574_s26] sm:$0xff]  ;;  %v263_v6 = vmul.f32 %v564_v0, %v224_v3  ;;  %v334_v8 = vld [vmem:[%s574_s26 + $0x8] sm:$0xff]  ;;  %v264_v9 = vmul.f32 %v564_v0, %v225_v7  ;;  %v226_v10 = vld [vmem:[%s569_s23 + $0x18] sm:$0xff] }
  0x12   : > { %v227_v11 = vld [vmem:[%s569_s23 + $0x20] sm:$0xff]  ;;  %v335_v14 = vld [vmem:[%s574_s26 + $0x10] sm:$0xff]  ;;  %v265_v15 = vmul.f32 %v564_v0, %v226_v10  ;;  %v336_v16 = vld [vmem:[%s574_s26 + $0x18] sm:$0xff] }
  0x13   : > { %v301_v12 = vadd.f32 %v580_v2, %v262_v4  ;;  %v302_v13 = vadd.f32 %v580_v2, %v263_v6  ;;  %v266_v17 = vmul.f32 %v564_v0, %v227_v11  ;;  %v228_v18 = vld [vmem:[%s569_s23 + $0x28] sm:$0xff]  ;;  %v303_v19 = vadd.f32 %v580_v2, %v264_v9  ;;  %v337_v20 = vld [vmem:[%s574_s26 + $0x20] sm:$0xff]  ;;  %v229_v22 = vld [vmem:[%s569_s23 + $0x30] sm:$0xff] }
  0x14   : > { %v267_v21 = vmul.f32 %v564_v0, %v228_v18  ;;  %v230_v23 = vld [vmem:[%s569_s23 + $0x38] sm:$0xff]  ;;  %v304_v26 = vadd.f32 %v580_v2, %v265_v15  ;;  %v338_v28 = vld [vmem:[%s574_s26 + $0x28] sm:$0xff]  ;;  %v231_v29 = vld [vmem:[%s569_s23 + $0x40] sm:$0xff]  ;;  %v268_v32 = vmul.f32 %v564_v0, %v229_v22 }
  0x15   : > { %v365_v24 = vadd.f32 %v333_v5, %v301_v12  ;;  %v366_v25 = vadd.f32 %v334_v8, %v302_v13  ;;  %v305_v27 = vadd.f32 %v580_v2, %v266_v17  ;;  %v367_v30 = vadd.f32 %v335_v14, %v303_v19  ;;  %v339_v33 = vld [vmem:[%s574_s26 + $0x30] sm:$0xff]  ;;  %v232_v35 = vld [vmem:[%s569_s23 + $0x48] sm:$0xff]  ;;  %v340_v39 = vld [vmem:[%s574_s26 + $0x38] sm:$0xff] }
  0x16   : > { %v306_v31 = vadd.f32 %v580_v2, %v267_v21  ;;  %v269_v34 = vmul.f32 %v564_v0, %v230_v23  ;;  %v233_v36 = vld [vmem:[%s569_s23 + $0x50] sm:$0xff]  ;;  %v368_v37 = vadd.f32 %v336_v16, %v304_v26  ;;  %v270_v40 = vmul.f32 %v564_v0, %v231_v29  ;;  %v341_v41 = vld [vmem:[%s574_s26 + $0x40] sm:$0xff]  ;;  %v234_v43 = vld [vmem:[%s569_s23 + $0x58] sm:$0xff] }
  0x17   : > { %397 = vst [vmem:[%s601_s5] sm:$0xff] %v365_v24  ;;  %398 = vst [vmem:[%s601_s5 + $0x8] sm:$0xff] %v366_v25  ;;  %v369_v38 = vadd.f32 %v337_v20, %v305_v27  ;;  %v271_v42 = vmul.f32 %v564_v0, %v232_v35  ;;  %v307_v45 = vadd.f32 %v580_v2, %v268_v32  ;;  %v342_v47 = vld [vmem:[%s574_s26 + $0x48] sm:$0xff]  ;;  %v235_v49 = vld [vmem:[%s569_s23 + $0x60] sm:$0xff] }
  0x18   : > { %399 = vst [vmem:[%s601_s5 + $0x10] sm:$0xff] %v367_v30  ;;  %v370_v44 = vadd.f32 %v338_v28, %v306_v31  ;;  %v308_v46 = vadd.f32 %v580_v2, %v269_v34  ;;  %v272_v48 = vmul.f32 %v564_v0, %v233_v36  ;;  %v236_v50 = vld [vmem:[%s569_s23 + $0x68] sm:$0xff]  ;;  %400 = vst [vmem:[%s601_s5 + $0x18] sm:$0xff] %v368_v37  ;;  %v343_v53 = vld [vmem:[%s574_s26 + $0x50] sm:$0xff] }
  0x19   : > { %401 = vst [vmem:[%s601_s5 + $0x20] sm:$0xff] %v369_v38  ;;  %v309_v51 = vadd.f32 %v580_v2, %v270_v40  ;;  %v310_v52 = vadd.f32 %v580_v2, %v271_v42  ;;  %v273_v54 = vmul.f32 %v564_v0, %v234_v43  ;;  %v344_v55 = vld [vmem:[%s574_s26 + $0x58] sm:$0xff]  ;;  %v274_v56 = vmul.f32 %v564_v0, %v235_v49  ;;  %v237_v57 = vld [vmem:[%s569_s23 + $0x70] sm:$0xff]  ;;  %v345_v61 = vld [vmem:[%s574_s26 + $0x60] sm:$0xff] }
  0x1a   : > { %402 = vst [vmem:[%s601_s5 + $0x28] sm:$0xff] %v370_v44  ;;  %v371_v58 = vadd.f32 %v339_v33, %v307_v45  ;;  %v372_v59 = vadd.f32 %v340_v39, %v308_v46  ;;  %v311_v60 = vadd.f32 %v580_v2, %v272_v48  ;;  %v275_v62 = vmul.f32 %v564_v0, %v236_v50  ;;  %v238_v63 = vld [vmem:[%s569_s23 + $0x78] sm:$0xff]  ;;  %v239_v1 = vld [vmem:[%s569_s23 + $0x80] sm:$0xff]  ;;  %v346_v7 = vld [vmem:[%s574_s26 + $0x68] sm:$0xff] }
  0x1b   : > { %v373_v3 = vadd.f32 %v341_v41, %v309_v51  ;;  %v374_v4 = vadd.f32 %v342_v47, %v310_v52  ;;  %v312_v5 = vadd.f32 %v580_v2, %v273_v54  ;;  %v313_v6 = vadd.f32 %v580_v2, %v274_v56  ;;  %v240_v8 = vld [vmem:[%s569_s23 + $0x88] sm:$0xff]  ;;  %v347_v12 = vld [vmem:[%s574_s26 + $0x70] sm:$0xff]  ;;  %v242_v15 = vld [vmem:[%s569_s23 + $0x98] sm:$0xff] }
  0x1c   : > { %403 = vst [vmem:[%s601_s5 + $0x30] sm:$0xff] %v371_v58  ;;  %404 = vst [vmem:[%s601_s5 + $0x38] sm:$0xff] %v372_v59  ;;  %v375_v9 = vadd.f32 %v343_v53, %v311_v60  ;;  %v314_v10 = vadd.f32 %v580_v2, %v275_v62  ;;  %v276_v11 = vmul.f32 %v564_v0, %v237_v57  ;;  %v241_v14 = vld [vmem:[%s569_s23 + $0x90] sm:$0xff]  ;;  %v348_v18 = vld [vmem:[%s574_s26 + $0x78] sm:$0xff] }
  0x1d   : > { %v277_v13 = vmul.f32 %v564_v0, %v238_v63  ;;  %405 = vst [vmem:[%s601_s5 + $0x40] sm:$0xff] %v373_v3  ;;  %406 = vst [vmem:[%s601_s5 + $0x48] sm:$0xff] %v374_v4  ;;  %v376_v16 = vadd.f32 %v344_v55, %v312_v5  ;;  %v377_v17 = vadd.f32 %v345_v61, %v313_v6  ;;  %v349_v20 = vld [vmem:[%s574_s26 + $0x80] sm:$0xff]  ;;  %v350_v26 = vld [vmem:[%s574_s26 + $0x88] sm:$0xff] }
  0x1e   : > { %v278_v19 = vmul.f32 %v564_v0, %v239_v1  ;;  %v279_v21 = vmul.f32 %v564_v0, %v240_v8  ;;  %v243_v22 = vld [vmem:[%s569_s23 + $0xa0] sm:$0xff]  ;;  %407 = vst [vmem:[%s601_s5 + $0x50] sm:$0xff] %v375_v9  ;;  %v378_v23 = vadd.f32 %v346_v7, %v314_v10  ;;  %v315_v24 = vadd.f32 %v580_v2, %v276_v11  ;;  %v351_v28 = vld [vmem:[%s574_s26 + $0x90] sm:$0xff]  ;;  %v244_v29 = vld [vmem:[%s569_s23 + $0xa8] sm:$0xff] }
  0x1f   : > { %v316_v25 = vadd.f32 %v580_v2, %v277_v13  ;;  %v280_v27 = vmul.f32 %v564_v0, %v241_v14  ;;  %408 = vst [vmem:[%s601_s5 + $0x58] sm:$0xff] %v376_v16  ;;  %409 = vst [vmem:[%s601_s5 + $0x60] sm:$0xff] %v377_v17  ;;  %v281_v32 = vmul.f32 %v564_v0, %v242_v15  ;;  %v352_v33 = vld [vmem:[%s574_s26 + $0x98] sm:$0xff]  ;;  %v245_v35 = vld [vmem:[%s569_s23 + $0xb0] sm:$0xff] }
  0x20   : > { %v317_v30 = vadd.f32 %v580_v2, %v278_v19  ;;  %v318_v31 = vadd.f32 %v580_v2, %v279_v21  ;;  %v282_v34 = vmul.f32 %v564_v0, %v243_v22  ;;  %v246_v36 = vld [vmem:[%s569_s23 + $0xb8] sm:$0xff]  ;;  %410 = vst [vmem:[%s601_s5 + $0x68] sm:$0xff] %v378_v23  ;;  %v379_v37 = vadd.f32 %v347_v12, %v315_v24  ;;  %v353_v40 = vld [vmem:[%s574_s26 + $0xa0] sm:$0xff]  ;;  %v248_v43 = vld [vmem:[%s569_s23 + $0xc8] sm:$0xff] }
  0x21   : > { %v380_v38 = vadd.f32 %v348_v18, %v316_v25  ;;  %v319_v39 = vadd.f32 %v580_v2, %v280_v27  ;;  %v283_v41 = vmul.f32 %v564_v0, %v244_v29  ;;  %v247_v42 = vld [vmem:[%s569_s23 + $0xc0] sm:$0xff]  ;;  %v320_v46 = vadd.f32 %v580_v2, %v281_v32  ;;  %v354_v48 = vld [vmem:[%s574_s26 + $0xa8] sm:$0xff]  ;;  %v249_v49 = vld [vmem:[%s569_s23 + $0xd0] sm:$0xff] }
  0x22   : > { %v381_v44 = vadd.f32 %v349_v20, %v317_v30  ;;  %v382_v45 = vadd.f32 %v350_v26, %v318_v31  ;;  %v321_v47 = vadd.f32 %v580_v2, %v282_v34  ;;  %411 = vst [vmem:[%s601_s5 + $0x70] sm:$0xff] %v379_v37  ;;  %v284_v52 = vmul.f32 %v564_v0, %v245_v35  ;;  %v250_v54 = vld [vmem:[%s569_s23 + $0xd8] sm:$0xff]  ;;  %v251_v55 = vld [vmem:[%s569_s23 + $0xe0] sm:$0xff]  ;;  %v355_v58 = vld [vmem:[%s574_s26 + $0xb0] sm:$0xff] }
  0x23   : > { %412 = vst [vmem:[%s601_s5 + $0x78] sm:$0xff] %v380_v38  ;;  %v383_v50 = vadd.f32 %v351_v28, %v319_v39  ;;  %v322_v51 = vadd.f32 %v580_v2, %v283_v41  ;;  %v285_v53 = vmul.f32 %v564_v0, %v246_v36  ;;  %v384_v56 = vadd.f32 %v352_v33, %v320_v46  ;;  %v356_v59 = vld [vmem:[%s574_s26 + $0xb8] sm:$0xff]  ;;  %v252_v62 = vld [vmem:[%s569_s23 + $0xe8] sm:$0xff]  ;;  %v357_v4 = vld [vmem:[%s574_s26 + $0xc0] sm:$0xff] }
  0x24   : > { %413 = vst [vmem:[%s601_s5 + $0x80] sm:$0xff] %v381_v44  ;;  %414 = vst [vmem:[%s601_s5 + $0x88] sm:$0xff] %v382_v45  ;;  %v385_v57 = vadd.f32 %v353_v40, %v321_v47  ;;  %v286_v60 = vmul.f32 %v564_v0, %v247_v42  ;;  %v287_v61 = vmul.f32 %v564_v0, %v248_v43  ;;  %v358_v5 = vld [vmem:[%s574_s26 + $0xc8] sm:$0xff]  ;;  %v359_v9 = vld [vmem:[%s574_s26 + $0xd0] sm:$0xff] }
  0x25   : > { %415 = vst [vmem:[%s601_s5 + $0x90] sm:$0xff] %v383_v50  ;;  %v386_v63 = vadd.f32 %v354_v48, %v322_v51  ;;  %v323_v1 = vadd.f32 %v580_v2, %v284_v52  ;;  %v324_v3 = vadd.f32 %v580_v2, %v285_v53  ;;  %v288_v6 = vmul.f32 %v564_v0, %v249_v49  ;;  %v253_v12 = vld [vmem:[%s569_s23 + $0xf0] sm:$0xff]  ;;  %v254_v13 = vld [vmem:[%s569_s23 + $0xf8] sm:$0xff]  ;;  %v361_v18 = vld [vmem:[%s574_s26 + $0xe0] sm:$0xff] }
  0x26   : > { %416 = vst [vmem:[%s601_s5 + $0x98] sm:$0xff] %v384_v56  ;;  %417 = vst [vmem:[%s601_s5 + $0xa0] sm:$0xff] %v385_v57  ;;  %v325_v7 = vadd.f32 %v580_v2, %v286_v60  ;;  %v326_v8 = vadd.f32 %v580_v2, %v287_v61  ;;  %v289_v10 = vmul.f32 %v564_v0, %v250_v54  ;;  %v360_v17 = vld [vmem:[%s574_s26 + $0xd8] sm:$0xff]  ;;  %v362_v24 = vld [vmem:[%s574_s26 + $0xe8] sm:$0xff] }
  0x27   : > { %v290_v11 = vmul.f32 %v564_v0, %v251_v55  ;;  %418 = vst [vmem:[%s601_s5 + $0xa8] sm:$0xff] %v386_v63  ;;  %v387_v14 = vadd.f32 %v355_v58, %v323_v1  ;;  %v388_v15 = vadd.f32 %v356_v59, %v324_v3  ;;  %v327_v16 = vadd.f32 %v580_v2, %v288_v6  ;;  %v363_v31 = vld [vmem:[%s574_s26 + $0xf0] sm:$0xff]  ;;  %v364_v32 = vld [vmem:[%s574_s26 + $0xf8] sm:$0xff] }
  0x28   : > { %v291_v19 = vmul.f32 %v564_v0, %v252_v62  ;;  %v389_v20 = vadd.f32 %v357_v4, %v325_v7  ;;  %v390_v21 = vadd.f32 %v358_v5, %v326_v8  ;;  %v328_v22 = vadd.f32 %v580_v2, %v289_v10 }
  0x29   : > { %v329_v23 = vadd.f32 %v580_v2, %v290_v11  ;;  %419 = vst [vmem:[%s601_s5 + $0xb0] sm:$0xff] %v387_v14  ;;  %420 = vst [vmem:[%s601_s5 + $0xb8] sm:$0xff] %v388_v15  ;;  %v391_v25 = vadd.f32 %v359_v9, %v327_v16  ;;  %v292_v27 = vmul.f32 %v564_v0, %v253_v12 }
  0x2a   : > { %v330_v26 = vadd.f32 %v580_v2, %v291_v19  ;;  %v293_v28 = vmul.f32 %v564_v0, %v254_v13  ;;  %421 = vst [vmem:[%s601_s5 + $0xc0] sm:$0xff] %v389_v20  ;;  %422 = vst [vmem:[%s601_s5 + $0xc8] sm:$0xff] %v390_v21  ;;  %v392_v29 = vadd.f32 %v360_v17, %v328_v22 }
  0x2b   : > { %v393_v30 = vadd.f32 %v361_v18, %v329_v23  ;;  %423 = vst [vmem:[%s601_s5 + $0xd0] sm:$0xff] %v391_v25  ;;  %v331_v34 = vadd.f32 %v580_v2, %v292_v27 }
  0x2c   : > { %v394_v33 = vadd.f32 %v362_v24, %v330_v26  ;;  %v332_v35 = vadd.f32 %v580_v2, %v293_v28  ;;  %424 = vst [vmem:[%s601_s5 + $0xd8] sm:$0xff] %v392_v29 }
  0x2d   : > { %425 = vst [vmem:[%s601_s5 + $0xe0] sm:$0xff] %v393_v30  ;;  %v395_v36 = vadd.f32 %v363_v31, %v331_v34 }
  0x2e   : > { %426 = vst [vmem:[%s601_s5 + $0xe8] sm:$0xff] %v394_v33  ;;  %v396_v37 = vadd.f32 %v364_v32, %v332_v35 }
  0x2f   : > { %427 = vst [vmem:[%s601_s5 + $0xf0] sm:$0xff] %v395_v36 }
  0x30   : > { %428 = vst [vmem:[%s601_s5 + $0xf8] sm:$0xff] %v396_v37 }
  0x31 PF: > { %s14_s15 = sadd.s32 1, %s526_s15  }
  0x32   : > { %p11_p4 = scmp.ge.s32.totalorder %s14_s15, 4  }
  0x34   :  { %13 = sbr.rel (!%p11_p4) target bundleno = 1 (0x1), region = 69 }

// kernel: mbblock_forward.4
= control target key start
LH: loop header
LB: loop body
LE: loop exit
PB: predicated region body
PF: predicated region fallthrough
CT: control target
= control target key end

     0   :  { %s894_s15 = smov 0   ;;  %s1099_s0 = inlined_call_operand.vmem [shape: f32[512,128], index: 0, kind: input, shape index: {}]   ;;  %s1100_s1 = inlined_call_operand.vmem [shape: bf16[128,128], index: 1, kind: input, shape index: {}]   ;;  %s1101_s2 = inlined_call_operand.vmem [shape: f32[512,128], index: 2, kind: output, shape index: {0}]   ;;  %s1102_s3 = inlined_call_operand.vmem [shape: f32[2,1,128], index: 3, kind: output, shape index: {1}]   ;;  %s1103_s4 = inlined_call_operand.vmem [shape: f32[2,1,128], index: 4, kind: output, shape index: {2}]  }
   0x1 LB: > { %s900_s16 = sadd.s32 4294967295, %s867_s15   ;;  %p742_p0 = scmp.ge.s32.totalorder %s867_s15, 1  ;;  %s867_s15 = sphi %s894_s15, %s15_s15  }
   0x2   : > { %p168_p1 = scmp.lt.s32.totalorder %s867_s15, 3 }
   0x4   : > { %p169_p2 = pnand %p742_p0, %p168_p1 }
   0x5   : > { %v853_v0 = vld [vmem:[%s1100_s1] sm:$0xff] (!%p169_p2)   ;;  %s743_s19 = sshll.u32 (!%p169_p2), %s900_s16, 5  ;;  %v854_v1 = vld [vmem:[%s1100_s1 + $0x8] sm:$0xff] (!%p169_p2)   ;;  %v855_v2 = vld [vmem:[%s1100_s1 + $0x10] sm:$0xff] (!%p169_p2)   ;;  %p212_p4 = scmp.lt.s32.totalorder (!%p169_p2), %s900_s16, 1 }
   0x6   : > { %172 = sbr.rel (%p169_p2) target bundleno = 330 (0x14a), region = 28  ;;  %p201_p3 = scmp.lt.s32.totalorder (!%p169_p2), %s743_s19, 63  ;;  %781 = vmatprep.subr.bf16.mxu0 (!%p169_p2), %v853_v0  ;;  %829 = vmatprep.subr.bf16.mxu1 (!%p169_p2), %v853_v0  ;;  %v856_v3 = vld [vmem:[%s1100_s1 + $0x18] sm:$0xff] (!%p169_p2)   ;;  %v857_v7 = vld [vmem:[%s1100_s1 + $0x20] sm:$0xff] (!%p169_p2)   ;;  %v858_v11 = vld [vmem:[%s1100_s1 + $0x28] sm:$0xff] (!%p169_p2)  }
   0x7   : > { %782 = vmatpush3.bf16.msra.mxu0 (!%p169_p2), %v853_v0  ;;  %837 = vmatpush3.bf16.msra.mxu1 (!%p169_p2), %v853_v0  ;;  %v859_v12 = vld [vmem:[%s1100_s1 + $0x30] sm:$0xff] (!%p169_p2)   ;;  %v860_v13 = vld [vmem:[%s1100_s1 + $0x38] sm:$0xff] (!%p169_p2)  }
   0x8   : > { %783 = vmatprep.subr.bf16.mxu0 (!%p169_p2), %v854_v1  ;;  %830 = vmatprep.subr.bf16.mxu1 (!%p169_p2), %v854_v1 }
   0xb   : > { %784 = vmatpush3.bf16.msra.mxu0 (!%p169_p2), %v854_v1  ;;  %838 = vmatpush3.bf16.msra.mxu1 (!%p169_p2), %v854_v1 }
   0xc   : > { %785 = vmatprep.subr.bf16.mxu0 (!%p169_p2), %v855_v2  ;;  %831 = vmatprep.subr.bf16.mxu1 (!%p169_p2), %v855_v2 }
   0xd   : > { %s1105_s19 = smov (!%p201_p3, %s743_s19), 63  ;;  %s1107_s16 = smov (!%p212_p4, %s900_s16), 1 }
   0xe   : > { %s744_s24 = sshll.u32 %s1105_s19, 3  ;;  %s214_s19 = scalar_lea.vmem %s1102_s3, %s1107_s16 }
   0xf   : > { %s922_s27 = scalar_lea.vmem %s1099_s0, %s744_s24  ;;  %786 = vmatpush3.bf16.msra.mxu0 %v855_v2  ;;  %839 = vmatpush3.bf16.msra.mxu1 %v855_v2  ;;  %s976_s14 = scalar_lea.vmem %s1101_s2, %s744_s24 }
  0x10   : > { %v219_v4 = vld [vmem:[%s922_s27] sm:$0xff]  ;;  %v220_v5 = vld [vmem:[%s922_s27 + $0x8] sm:$0xff]  ;;  %787 = vmatprep.subr.bf16.mxu0 %v856_v3  ;;  %832 = vmatprep.subr.bf16.mxu1 %v856_v3  ;;  %v221_v14 = vld [vmem:[%s922_s27 + $0x10] sm:$0xff]  ;;  %s217_s22 = scalar_lea.vmem %s1103_s4, %s1107_s16 }
  0x11   : > { %v251_v6 = vpack.c.bf16 %v220_v5, %v219_v4  ;;  %v235_v8 = vld [vmem:[%s922_s27 + $0x80] sm:$0xff]  ;;  %v236_v9 = vld [vmem:[%s922_s27 + $0x88] sm:$0xff]  ;;  %v222_v15 = vld [vmem:[%s922_s27 + $0x18] sm:$0xff] }
  0x12   : > { %v259_v10 = vpack.c.bf16 %v236_v9, %v235_v8  ;;  %v223_v16 = vld [vmem:[%s922_s27 + $0x20] sm:$0xff]  ;;  %v224_v17 = vld [vmem:[%s922_s27 + $0x28] sm:$0xff]  ;;  %v237_v18 = vld [vmem:[%s922_s27 + $0x90] sm:$0xff]  ;;  %v252_v22 = vpack.c.bf16 %v222_v15, %v221_v14 }
  0x13   : > { %797 = vmatprep.mubr.bf16.mxu0 %v251_v6  ;;  %788 = vmatpush3.bf16.msra.mxu0 %v856_v3  ;;  %v238_v19 = vld [vmem:[%s922_s27 + $0x98] sm:$0xff]  ;;  %v239_v20 = vld [vmem:[%s922_s27 + $0xa0] sm:$0xff]  ;;  %v240_v21 = vld [vmem:[%s922_s27 + $0xa8] sm:$0xff]  ;;  %v253_v23 = vpack.c.bf16 %v224_v17, %v223_v16 }
  0x14   : > { %789 = vmatprep.subr.bf16.mxu0 %v857_v7  ;;  %840 = vmatpush3.bf16.msra.mxu1 %v856_v3  ;;  %v260_v24 = vpack.c.bf16 %v238_v19, %v237_v18  ;;  %v261_v25 = vpack.c.bf16 %v240_v21, %v239_v20  ;;  %v225_v26 = vld [vmem:[%s922_s27 + $0x30] sm:$0xff]  ;;  %v226_v27 = vld [vmem:[%s922_s27 + $0x38] sm:$0xff]  ;;  %v227_v28 = vld [vmem:[%s922_s27 + $0x40] sm:$0xff] }
  0x15   : > { %833 = vmatprep.subr.bf16.mxu1 %v857_v7  ;;  %813 = vmatprep.mubr.bf16.mxu1 %v259_v10  ;;  %v228_v29 = vld [vmem:[%s922_s27 + $0x48] sm:$0xff]  ;;  %v241_v30 = vld [vmem:[%s922_s27 + $0xb0] sm:$0xff]  ;;  %v242_v31 = vld [vmem:[%s922_s27 + $0xb8] sm:$0xff]  ;;  %v254_v34 = vpack.c.bf16 %v226_v27, %v225_v26 }
  0x16   : > { %v243_v32 = vld [vmem:[%s922_s27 + $0xc0] sm:$0xff]  ;;  %v244_v33 = vld [vmem:[%s922_s27 + $0xc8] sm:$0xff]  ;;  %v255_v35 = vpack.c.bf16 %v228_v29, %v227_v28  ;;  %v262_v36 = vpack.c.bf16 %v242_v31, %v241_v30  ;;  %v229_v38 = vld [vmem:[%s922_s27 + $0x50] sm:$0xff] }
  0x17   : > { %790 = vmatpush3.bf16.msra.mxu0 %v857_v7  ;;  %v263_v37 = vpack.c.bf16 %v244_v33, %v243_v32  ;;  %v230_v39 = vld [vmem:[%s922_s27 + $0x58] sm:$0xff]  ;;  %v231_v40 = vld [vmem:[%s922_s27 + $0x60] sm:$0xff]  ;;  %v232_v41 = vld [vmem:[%s922_s27 + $0x68] sm:$0xff] }
  0x18   : > { %791 = vmatprep.subr.bf16.mxu0 %v858_v11  ;;  %841 = vmatpush3.bf16.msra.mxu1 %v857_v7  ;;  %v245_v42 = vld [vmem:[%s922_s27 + $0xd0] sm:$0xff]  ;;  %v246_v43 = vld [vmem:[%s922_s27 + $0xd8] sm:$0xff]  ;;  %v247_v44 = vld [vmem:[%s922_s27 + $0xe0] sm:$0xff]  ;;  %v256_v46 = vpack.c.bf16 %v230_v39, %v229_v38  ;;  %v257_v47 = vpack.c.bf16 %v232_v41, %v231_v40 }
  0x19   : > { %834 = vmatprep.subr.bf16.mxu1 %v858_v11  ;;  %v248_v45 = vld [vmem:[%s922_s27 + $0xe8] sm:$0xff]  ;;  %v264_v48 = vpack.c.bf16 %v246_v43, %v245_v42  ;;  %v233_v50 = vld [vmem:[%s922_s27 + $0x70] sm:$0xff]  ;;  %v234_v51 = vld [vmem:[%s922_s27 + $0x78] sm:$0xff] }
  0x1a   : > { %v265_v49 = vpack.c.bf16 %v248_v45, %v247_v44  ;;  %v249_v52 = vld [vmem:[%s922_s27 + $0xf0] sm:$0xff]  ;;  %v250_v53 = vld [vmem:[%s922_s27 + $0xf8] sm:$0xff]  ;;  %v258_v54 = vpack.c.bf16 %v234_v51, %v233_v50 }
  0x1b   : > { %792 = vmatpush3.bf16.msra.mxu0 %v858_v11  ;;  %v266_v55 = vpack.c.bf16 %v250_v53, %v249_v52 }
  0x1c   : > { %793 = vmatprep.subr.bf16.mxu0 %v859_v12  ;;  %842 = vmatpush3.bf16.msra.mxu1 %v858_v11 }
  0x1d   : > { %835 = vmatprep.subr.bf16.mxu1 %v859_v12 }
  0x1f   : > { %794 = vmatpush3.bf16.msra.mxu0 %v859_v12 }
  0x20   : > { %795 = vmatprep.subr.bf16.mxu0 %v860_v13  ;;  %843 = vmatpush3.bf16.msra.mxu1 %v859_v12 }
  0x21   : > { %836 = vmatprep.subr.bf16.mxu1 %v860_v13 }
  0x23   : > { %796 = vmatpush3.bf16.msra.mxu0 %v860_v13 }
  0x24   : > { %844 = vmatpush3.bf16.msra.mxu1 %v860_v13 }
  0x26   : > { %798 = vmatmul.mubr.bf16.vlgmr.msra.gmra.mrb[0].mxu0 %v252_v22 }
  0x27   : > { %801 = vmatprep.mubr.bf16.mxu0 %v253_v23  ;;  %814 = vmatmul.mubr.bf16.vlgmr.msra.gmra.mrb[0].mxu1 %v260_v24 }
  0x28   : > { %817 = vmatprep.mubr.bf16.mxu1 %v261_v25 }
  0x2e   : > { %802 = vmatmul.mubr.bf16.gmra.mrb[4].mxu0 %v254_v34 }
  0x2f   : > { %805 = vmatprep.mubr.bf16.mxu0 %v255_v35  ;;  %818 = vmatmul.mubr.bf16.gmra.mrb[4].mxu1 %v262_v36 }
  0x30   : > { %821 = vmatprep.mubr.bf16.mxu1 %v263_v37 }
  0x36   : > { %806 = vmatmul.mubr.bf16.gmra.mrb[8].mxu0 %v256_v46 }
  0x37   : > { %809 = vmatprep.mubr.bf16.mxu0 %v257_v47  ;;  %822 = vmatmul.mubr.bf16.gmra.mrb[8].mxu1 %v264_v48 }
  0x38   : > { %825 = vmatprep.mubr.bf16.mxu1 %v265_v49 }
  0x3e   : > { %810 = vmatmul.mubr.bf16.gmra.mrb[12].mxu0 %v258_v54 }
  0x3f   : > { %826 = vmatmul.mubr.bf16.gmra.mrb[12].mxu1 %v266_v55 }
  0xf9   : > { %v799_v56 = vpop.f32.mrb[0].mxu0 }
  0xfa   : > { %494 = vst [vmem:[%s976_s14 + $0x10] sm:$0xff] %v799_v56  ;;  %v365_v57 = vpop.f32.mrb[1].mxu0  ;;  %v979_v58 = vpop.f32.mrb[0].mxu1  ;;  %v564_v3 = vmul.f32 %v799_v56, %v799_v56 }
  0xfb   : > { %492 = vst [vmem:[%s976_s14] sm:$0xff] %v365_v57  ;;  %v800_v59 = vpop.f32.mrb[2].mxu0  ;;  %510 = vst [vmem:[%s976_s14 + $0x90] sm:$0xff] %v979_v58  ;;  %v984_v60 = vpop.f32.mrb[1].mxu1  ;;  %v562_v63 = vmul.f32 %v365_v57, %v365_v57 }
  0xfc   : > { %495 = vst [vmem:[%s976_s14 + $0x18] sm:$0xff] %v800_v59  ;;  %v368_v61 = vpop.f32.mrb[3].mxu0  ;;  %508 = vst [vmem:[%s976_s14 + $0x80] sm:$0xff] %v984_v60  ;;  %v989_v62 = vpop.f32.mrb[2].mxu1  ;;  %v565_v6 = vmul.f32 %v800_v59, %v800_v59 }
  0xfd   : > { %493 = vst [vmem:[%s976_s14 + $0x8] sm:$0xff] %v368_v61  ;;  %v524_v0 = vadd.f32 %v368_v61, %v365_v57  ;;  %v563_v1 = vmul.f32 %v368_v61, %v368_v61  ;;  %511 = vst [vmem:[%s976_s14 + $0x98] sm:$0xff] %v989_v62  ;;  %v994_v2 = vpop.f32.mrb[3].mxu1 }
  0xfe   : > { %509 = vst [vmem:[%s976_s14 + $0x88] sm:$0xff] %v994_v2 }
  0xff   : > { %v525_v4 = vadd.f32 %v799_v56, %v524_v0  ;;  %v594_v5 = vadd.f32 %v563_v1, %v562_v63 }
 0x101   : > { %v595_v7 = vadd.f32 %v594_v5, %v564_v3  ;;  %v803_v8 = vpop.f32.mrb[4].mxu0  ;;  %v526_v9 = vadd.f32 %v800_v59, %v525_v4 }
 0x102   : > { %498 = vst [vmem:[%s976_s14 + $0x30] sm:$0xff] %v803_v8  ;;  %v381_v10 = vpop.f32.mrb[5].mxu0  ;;  %v999_v11 = vpop.f32.mrb[4].mxu1  ;;  %v568_v23 = vmul.f32 %v803_v8, %v803_v8 }
 0x103   : > { %496 = vst [vmem:[%s976_s14 + $0x20] sm:$0xff] %v381_v10  ;;  %v527_v12 = vadd.f32 %v526_v9, %v381_v10  ;;  %v566_v13 = vmul.f32 %v381_v10, %v381_v10  ;;  %v596_v14 = vadd.f32 %v595_v7, %v565_v6  ;;  %v804_v15 = vpop.f32.mrb[6].mxu0  ;;  %514 = vst [vmem:[%s976_s14 + $0xb0] sm:$0xff] %v999_v11  ;;  %v1004_v16 = vpop.f32.mrb[5].mxu1 }
 0x104   : > { %499 = vst [vmem:[%s976_s14 + $0x38] sm:$0xff] %v804_v15  ;;  %v384_v17 = vpop.f32.mrb[7].mxu0  ;;  %512 = vst [vmem:[%s976_s14 + $0xa0] sm:$0xff] %v1004_v16  ;;  %v1009_v18 = vpop.f32.mrb[6].mxu1  ;;  %v569_v26 = vmul.f32 %v804_v15, %v804_v15  ;;  %v578_v9 = vmul.f32 %v984_v60, %v984_v60 }
 0x105   : > { %v597_v19 = vadd.f32 %v596_v14, %v566_v13  ;;  %497 = vst [vmem:[%s976_s14 + $0x28] sm:$0xff] %v384_v17  ;;  %v528_v20 = vadd.f32 %v527_v12, %v384_v17  ;;  %v567_v21 = vmul.f32 %v384_v17, %v384_v17  ;;  %515 = vst [vmem:[%s976_s14 + $0xb8] sm:$0xff] %v1009_v18  ;;  %v1014_v22 = vpop.f32.mrb[7].mxu1 }
 0x106   : > { %513 = vst [vmem:[%s976_s14 + $0xa8] sm:$0xff] %v1014_v22  ;;  %v580_v17 = vmul.f32 %v979_v58, %v979_v58 }
 0x107   : > { %v529_v24 = vadd.f32 %v803_v8, %v528_v20  ;;  %v598_v25 = vadd.f32 %v597_v19, %v567_v21  ;;  %v581_v21 = vmul.f32 %v989_v62, %v989_v62 }
 0x109   : > { %v599_v27 = vadd.f32 %v598_v25, %v568_v23  ;;  %v807_v28 = vpop.f32.mrb[8].mxu0  ;;  %v530_v29 = vadd.f32 %v804_v15, %v529_v24  ;;  %v579_v15 = vmul.f32 %v994_v2, %v994_v2 }
 0x10a   : > { %502 = vst [vmem:[%s976_s14 + $0x50] sm:$0xff] %v807_v28  ;;  %v397_v30 = vpop.f32.mrb[9].mxu0  ;;  %v1019_v31 = vpop.f32.mrb[8].mxu1  ;;  %v572_v43 = vmul.f32 %v807_v28, %v807_v28 }
 0x10b   : > { %500 = vst [vmem:[%s976_s14 + $0x40] sm:$0xff] %v397_v30  ;;  %v531_v32 = vadd.f32 %v530_v29, %v397_v30  ;;  %v570_v33 = vmul.f32 %v397_v30, %v397_v30  ;;  %v600_v34 = vadd.f32 %v599_v27, %v569_v26  ;;  %v808_v35 = vpop.f32.mrb[10].mxu0  ;;  %518 = vst [vmem:[%s976_s14 + $0xd0] sm:$0xff] %v1019_v31  ;;  %v1024_v36 = vpop.f32.mrb[9].mxu1 }
 0x10c   : > { %503 = vst [vmem:[%s976_s14 + $0x58] sm:$0xff] %v808_v35  ;;  %v400_v37 = vpop.f32.mrb[11].mxu0  ;;  %516 = vst [vmem:[%s976_s14 + $0xc0] sm:$0xff] %v1024_v36  ;;  %v1029_v38 = vpop.f32.mrb[10].mxu1  ;;  %v573_v46 = vmul.f32 %v808_v35, %v808_v35 }
 0x10d   : > { %v601_v39 = vadd.f32 %v600_v34, %v570_v33  ;;  %501 = vst [vmem:[%s976_s14 + $0x48] sm:$0xff] %v400_v37  ;;  %v532_v40 = vadd.f32 %v531_v32, %v400_v37  ;;  %v571_v41 = vmul.f32 %v400_v37, %v400_v37  ;;  %519 = vst [vmem:[%s976_s14 + $0xd8] sm:$0xff] %v1029_v38  ;;  %v1034_v42 = vpop.f32.mrb[11].mxu1 }
 0x10e   : > { %517 = vst [vmem:[%s976_s14 + $0xc8] sm:$0xff] %v1034_v42 }
 0x10f   : > { %v533_v44 = vadd.f32 %v807_v28, %v532_v40  ;;  %v602_v45 = vadd.f32 %v601_v39, %v571_v41  ;;  %v583_v28 = vmul.f32 %v1014_v22, %v1014_v22  ;;  %v587_v39 = vmul.f32 %v1034_v42, %v1034_v42 }
 0x111   : > { %v603_v47 = vadd.f32 %v602_v45, %v572_v43  ;;  %v811_v48 = vpop.f32.mrb[12].mxu0  ;;  %v534_v49 = vadd.f32 %v808_v35, %v533_v44 }
 0x112   : > { %506 = vst [vmem:[%s976_s14 + $0x70] sm:$0xff] %v811_v48  ;;  %v413_v50 = vpop.f32.mrb[13].mxu0  ;;  %v1039_v51 = vpop.f32.mrb[12].mxu1  ;;  %v576_v3 = vmul.f32 %v811_v48, %v811_v48 }
 0x113   : > { %504 = vst [vmem:[%s976_s14 + $0x60] sm:$0xff] %v413_v50  ;;  %v535_v52 = vadd.f32 %v534_v49, %v413_v50  ;;  %v574_v53 = vmul.f32 %v413_v50, %v413_v50  ;;  %v604_v54 = vadd.f32 %v603_v47, %v573_v46  ;;  %v812_v55 = vpop.f32.mrb[14].mxu0  ;;  %522 = vst [vmem:[%s976_s14 + $0xf0] sm:$0xff] %v1039_v51  ;;  %v477_v56 = vpop.f32.mrb[13].mxu1 }
 0x114   : > { %507 = vst [vmem:[%s976_s14 + $0x78] sm:$0xff] %v812_v55  ;;  %v416_v57 = vpop.f32.mrb[15].mxu0  ;;  %520 = vst [vmem:[%s976_s14 + $0xe0] sm:$0xff] %v477_v56  ;;  %v828_v59 = vpop.f32.mrb[14].mxu1  ;;  %v577_v6 = vmul.f32 %v812_v55, %v812_v55  ;;  %v590_v44 = vmul.f32 %v477_v56, %v477_v56  ;;  %v592_v49 = vmul.f32 %v1039_v51, %v1039_v51 }
 0x115   : > { %v605_v61 = vadd.f32 %v604_v54, %v574_v53  ;;  %505 = vst [vmem:[%s976_s14 + $0x68] sm:$0xff] %v416_v57  ;;  %v536_v63 = vadd.f32 %v535_v52, %v416_v57  ;;  %v575_v0 = vmul.f32 %v416_v57, %v416_v57  ;;  %523 = vst [vmem:[%s976_s14 + $0xf8] sm:$0xff] %v828_v59  ;;  %v480_v1 = vpop.f32.mrb[15].mxu1 }
 0x116   : > { %521 = vst [vmem:[%s976_s14 + $0xe8] sm:$0xff] %v480_v1  ;;  %v593_v52 = vmul.f32 %v828_v59, %v828_v59 }
 0x117   : > { %v537_v4 = vadd.f32 %v811_v48, %v536_v63  ;;  %v606_v5 = vadd.f32 %v605_v61, %v575_v0 }
 0x119   : > { %v607_v7 = vadd.f32 %v606_v5, %v576_v3  ;;  %v538_v8 = vadd.f32 %v812_v55, %v537_v4 }
 0x11b   : > { %v539_v10 = vadd.f32 %v538_v8, %v984_v60  ;;  %v608_v12 = vadd.f32 %v607_v7, %v577_v6  ;;  %v582_v60 = vmul.f32 %v1004_v16, %v1004_v16 }
 0x11d   : > { %v609_v13 = vadd.f32 %v608_v12, %v578_v9  ;;  %v540_v14 = vadd.f32 %v539_v10, %v994_v2 }
 0x11f   : > { %v541_v19 = vadd.f32 %v979_v58, %v540_v14  ;;  %v610_v20 = vadd.f32 %v609_v13, %v579_v15  ;;  %v584_v58 = vmul.f32 %v999_v11, %v999_v11 }
 0x121   : > { %v611_v23 = vadd.f32 %v610_v20, %v580_v17  ;;  %v542_v24 = vadd.f32 %v989_v62, %v541_v19  ;;  %v585_v62 = vmul.f32 %v1009_v18, %v1009_v18 }
 0x123   : > { %v543_v25 = vadd.f32 %v542_v24, %v1004_v16  ;;  %v612_v26 = vadd.f32 %v611_v23, %v581_v21  ;;  %v586_v16 = vmul.f32 %v1024_v36, %v1024_v36 }
 0x125   : > { %v613_v27 = vadd.f32 %v612_v26, %v582_v60  ;;  %v544_v2 = vadd.f32 %v543_v25, %v1014_v22 }
 0x127   : > { %v545_v29 = vadd.f32 %v999_v11, %v544_v2  ;;  %v614_v30 = vadd.f32 %v613_v27, %v583_v28  ;;  %v588_v11 = vmul.f32 %v1019_v31, %v1019_v31 }
 0x129   : > { %v615_v32 = vadd.f32 %v614_v30, %v584_v58  ;;  %v546_v33 = vadd.f32 %v1009_v18, %v545_v29  ;;  %v589_v18 = vmul.f32 %v1029_v38, %v1029_v38 }
 0x12b   : > { %v547_v34 = vadd.f32 %v546_v33, %v1024_v36  ;;  %v616_v35 = vadd.f32 %v615_v32, %v585_v62 }
 0x12d   : > { %v617_v37 = vadd.f32 %v616_v35, %v586_v16  ;;  %v548_v22 = vadd.f32 %v547_v34, %v1034_v42  ;;  %v591_v42 = vmul.f32 %v480_v1, %v480_v1 }
 0x12f   : > { %v549_v40 = vadd.f32 %v1019_v31, %v548_v22  ;;  %v618_v41 = vadd.f32 %v617_v37, %v587_v39 }
 0x131   : > { %v619_v43 = vadd.f32 %v618_v41, %v588_v11  ;;  %v550_v36 = vadd.f32 %v1029_v38, %v549_v40 }
 0x133   : > { %v551_v45 = vadd.f32 %v550_v36, %v477_v56  ;;  %v620_v46 = vadd.f32 %v619_v43, %v589_v18 }
 0x135   : > { %v621_v47 = vadd.f32 %v620_v46, %v590_v44  ;;  %v552_v48 = vadd.f32 %v551_v45, %v480_v1 }
 0x137   : > { %v553_v31 = vadd.f32 %v1039_v51, %v552_v48  ;;  %v622_v50 = vadd.f32 %v621_v47, %v591_v42 }
 0x139   : > { %v554_v53 = vadd.f32 %v828_v59, %v553_v31  ;;  %v623_v54 = vadd.f32 %v622_v50, %v592_v49 }
 0x13b   : > { %v555_v55 = vrot.slane %v554_v53, 4  ;;  %v624_v57 = vadd.f32 %v623_v54, %v593_v52 }
 0x13d   : > { %v556_v38 = vadd.f32 %v555_v55, %v554_v53  ;;  %v625_v61 = vrot.slane %v624_v57, 4 }
 0x13f   : > { %v557_v56 = vrot.slane %v556_v38, 2  ;;  %v626_v63 = vadd.f32 %v625_v61, %v624_v57 }
 0x141   : > { %v558_v0 = vadd.f32 %v557_v56, %v556_v38  ;;  %v627_v3 = vrot.slane %v626_v63, 2 }
 0x143   : > { %v559_v1 = vrot.slane %v558_v0, 1  ;;  %v628_v4 = vadd.f32 %v627_v3, %v626_v63 }
 0x145   : > { %v560_v51 = vadd.f32 %v559_v1, %v558_v0  ;;  %v629_v5 = vrot.slane %v628_v4, 1 }
 0x147   : > { %561 = vst [vmem:[%s214_s19] sm:$0x1] %v560_v51  ;;  %v630_v59 = vadd.f32 %v629_v5, %v628_v4 }
 0x149   : > { %631 = vst [vmem:[%s217_s22] sm:$0x1] %v630_v59 }
 0x14a PF: > { %s15_s15 = sadd.s32 1, %s867_s15  }
 0x14b   : > { %p12_p5 = scmp.ge.s32.totalorder %s15_s15, 4  }
 0x14d   :  { %14 = sbr.rel (!%p12_p5) target bundleno = 1 (0x1), region = 82 }

// kernel: mbblock_forward.6
= control target key start
LH: loop header
LB: loop body
LE: loop exit
PB: predicated region body
PF: predicated region fallthrough
CT: control target
= control target key end

     0   :  { %s1070_s21 = smov 0   ;;  %s1369_s0 = inlined_call_operand.vmem [shape: f32[512,128], index: 0, kind: input, shape index: {}]   ;;  %s1370_s1 = inlined_call_operand.vmem [shape: f32[1,128], index: 1, kind: input, shape index: {}]   ;;  %s1371_s2 = inlined_call_operand.vmem [shape: f32[1,128], index: 2, kind: input, shape index: {}]   ;;  %s1372_s3 = inlined_call_operand.vmem [shape: bf16[128,128], index: 3, kind: input, shape index: {}]   ;;  %s1373_s4 = inlined_call_operand.vmem [shape: f32[512,128], index: 4, kind: output, shape index: {0}]   ;;  %s1374_s5 = inlined_call_operand.vmem [shape: f32[2,1,128], index: 5, kind: output, shape index: {1}]   ;;  %s1375_s6 = inlined_call_operand.vmem [shape: f32[2,1,128], index: 6, kind: output, shape index: {2}]  }
   0x1 LB: > { %s1076_s22 = sadd.s32 4294967295, %s1033_s21   ;;  %p906_p0 = scmp.ge.s32.totalorder %s1033_s21, 1  ;;  %s1033_s21 = sphi %s1070_s21, %s17_s21  }
   0x2   : > { %p218_p1 = scmp.lt.s32.totalorder %s1033_s21, 3 }
   0x4   : > { %p219_p2 = pnand %p906_p0, %p218_p1 }
   0x5   : > { %v1019_v0 = vld [vmem:[%s1372_s3] sm:$0xff] (!%p219_p2)   ;;  %s907_s25 = sshll.u32 (!%p219_p2), %s1076_s22, 5  ;;  %v1020_v1 = vld [vmem:[%s1372_s3 + $0x8] sm:$0xff] (!%p219_p2)   ;;  %v1021_v2 = vld [vmem:[%s1372_s3 + $0x10] sm:$0xff] (!%p219_p2)   ;;  %p266_p4 = scmp.lt.s32.totalorder (!%p219_p2), %s1076_s22, 1 }
   0x6   : > { %222 = sbr.rel (%p219_p2) target bundleno = 330 (0x14a), region = 36  ;;  %p255_p3 = scmp.lt.s32.totalorder (!%p219_p2), %s907_s25, 63  ;;  %947 = vmatprep.subr.bf16.mxu0 (!%p219_p2), %v1019_v0  ;;  %995 = vmatprep.subr.bf16.mxu1 (!%p219_p2), %v1019_v0  ;;  %v1022_v3 = vld [vmem:[%s1372_s3 + $0x18] sm:$0xff] (!%p219_p2)   ;;  %v1108_v6 = vld [vmem:[%s1370_s1] ss:$0 sm:$0xff] (!%p219_p2)  ;;  %v1024_v27 = vld [vmem:[%s1372_s3 + $0x28] sm:$0xff] (!%p219_p2)  }
   0x7   : > { %948 = vmatpush3.bf16.msra.mxu0 (!%p219_p2), %v1019_v0  ;;  %1003 = vmatpush3.bf16.msra.mxu1 (!%p219_p2), %v1019_v0  ;;  %v1115_v9 = vld [vmem:[%s1371_s2] ss:$0 sm:$0xff] (!%p219_p2)  ;;  %v1025_v35 = vld [vmem:[%s1372_s3 + $0x30] sm:$0xff] (!%p219_p2)   ;;  %v1026_v52 = vld [vmem:[%s1372_s3 + $0x38] sm:$0xff] (!%p219_p2)  }
   0x8   : > { %949 = vmatprep.subr.bf16.mxu0 (!%p219_p2), %v1020_v1  ;;  %996 = vmatprep.subr.bf16.mxu1 (!%p219_p2), %v1020_v1  ;;  %v1023_v17 = vld [vmem:[%s1372_s3 + $0x20] sm:$0xff] (!%p219_p2)  }
   0xb   : > { %950 = vmatpush3.bf16.msra.mxu0 (!%p219_p2), %v1020_v1  ;;  %1004 = vmatpush3.bf16.msra.mxu1 (!%p219_p2), %v1020_v1 }
   0xc   : > { %951 = vmatprep.subr.bf16.mxu0 (!%p219_p2), %v1021_v2  ;;  %997 = vmatprep.subr.bf16.mxu1 (!%p219_p2), %v1021_v2 }
   0xd   : > { %s1377_s25 = smov (!%p255_p3, %s907_s25), 63  ;;  %s1379_s22 = smov (!%p266_p4, %s1076_s22), 1 }
   0xe   : > { %s908_s30 = sshll.u32 %s1377_s25, 3  ;;  %s268_s7 = scalar_lea.vmem %s1374_s5, %s1379_s22 }
   0xf   : > { %s1098_s9 = scalar_lea.vmem %s1369_s0, %s908_s30  ;;  %952 = vmatpush3.bf16.msra.mxu0 %v1021_v2  ;;  %1005 = vmatpush3.bf16.msra.mxu1 %v1021_v2  ;;  %s1246_s29 = scalar_lea.vmem %s1373_s4, %s908_s30 }
  0x10   : > { %v273_v4 = vld [vmem:[%s1098_s9] sm:$0xff]  ;;  %v274_v5 = vld [vmem:[%s1098_s9 + $0x8] sm:$0xff]  ;;  %v275_v10 = vld [vmem:[%s1098_s9 + $0x10] sm:$0xff]  ;;  %953 = vmatprep.subr.bf16.mxu0 %v1022_v3  ;;  %998 = vmatprep.subr.bf16.mxu1 %v1022_v3  ;;  %s271_s10 = scalar_lea.vmem %s1375_s6, %s1379_s22 }
  0x11   : > { %v312_v7 = vmul.f32 %v1108_v6, %v273_v4  ;;  %v313_v8 = vmul.f32 %v1108_v6, %v274_v5  ;;  %v276_v11 = vld [vmem:[%s1098_s9 + $0x18] sm:$0xff]  ;;  %v314_v12 = vmul.f32 %v1108_v6, %v275_v10  ;;  %v277_v16 = vld [vmem:[%s1098_s9 + $0x20] sm:$0xff]  ;;  %v278_v20 = vld [vmem:[%s1098_s9 + $0x28] sm:$0xff] }
  0x12   : > { %v315_v15 = vmul.f32 %v1108_v6, %v276_v11  ;;  %v316_v21 = vmul.f32 %v1108_v6, %v277_v16  ;;  %v279_v22 = vld [vmem:[%s1098_s9 + $0x30] sm:$0xff]  ;;  %v280_v26 = vld [vmem:[%s1098_s9 + $0x38] sm:$0xff]  ;;  %v317_v28 = vmul.f32 %v1108_v6, %v278_v20  ;;  %v289_v31 = vld [vmem:[%s1098_s9 + $0x80] sm:$0xff] }
  0x13   : > { %v351_v13 = vadd.f32 %v1115_v9, %v312_v7  ;;  %v352_v14 = vadd.f32 %v1115_v9, %v313_v8  ;;  %954 = vmatpush3.bf16.msra.mxu0 %v1022_v3  ;;  %v353_v24 = vadd.f32 %v1115_v9, %v314_v12  ;;  %1006 = vmatpush3.bf16.msra.mxu1 %v1022_v3  ;;  %v281_v37 = vld [vmem:[%s1098_s9 + $0x40] sm:$0xff]  ;;  %v290_v38 = vld [vmem:[%s1098_s9 + $0x88] sm:$0xff]  ;;  %v291_v42 = vld [vmem:[%s1098_s9 + $0x90] sm:$0xff] }
  0x14   : > { %v354_v25 = vadd.f32 %v1115_v9, %v315_v15  ;;  %955 = vmatprep.subr.bf16.mxu0 %v1023_v17  ;;  %999 = vmatprep.subr.bf16.mxu1 %v1023_v17  ;;  %v318_v29 = vmul.f32 %v1108_v6, %v279_v22  ;;  %v319_v30 = vmul.f32 %v1108_v6, %v280_v26  ;;  %v282_v40 = vld [vmem:[%s1098_s9 + $0x48] sm:$0xff]  ;;  %v292_v44 = vld [vmem:[%s1098_s9 + $0x98] sm:$0xff]  ;;  %v293_v45 = vld [vmem:[%s1098_s9 + $0xa0] sm:$0xff] }
  0x15   : > { %v383_v18 = vmax.f32 %v351_v13, 0.0  ;;  %v384_v19 = vmax.f32 %v352_v14, 0.0  ;;  %v385_v32 = vmax.f32 %v353_v24, 0.0  ;;  %v1141_v34 = vadd.f32 %v1115_v9, %v316_v21  ;;  %v294_v50 = vld [vmem:[%s1098_s9 + $0xa8] sm:$0xff]  ;;  %v295_v51 = vld [vmem:[%s1098_s9 + $0xb0] sm:$0xff]  ;;  %v296_v61 = vld [vmem:[%s1098_s9 + $0xb8] sm:$0xff] }
  0x16   : > { %v386_v33 = vmax.f32 %v354_v25, 0.0  ;;  %v1147_v36 = vadd.f32 %v1115_v9, %v317_v28  ;;  %v1152_v39 = vadd.f32 %v1115_v9, %v318_v29  ;;  %v328_v41 = vmul.f32 %v1108_v6, %v289_v31  ;;  %v297_v2 = vld [vmem:[%s1098_s9 + $0xc0] sm:$0xff]  ;;  %v298_v8 = vld [vmem:[%s1098_s9 + $0xc8] sm:$0xff]  ;;  %v283_v14 = vld [vmem:[%s1098_s9 + $0x50] sm:$0xff] }
  0x17   : > { %v415_v23 = vpack.c.bf16 %v384_v19, %v383_v18  ;;  %956 = vmatpush3.bf16.msra.mxu0 %v1023_v17  ;;  %1007 = vmatpush3.bf16.msra.mxu1 %v1023_v17  ;;  %v1158_v43 = vadd.f32 %v1115_v9, %v319_v30  ;;  %v387_v47 = vmax.f32 %v1141_v34, 0.0  ;;  %v320_v48 = vmul.f32 %v1108_v6, %v281_v37  ;;  %v284_v15 = vld [vmem:[%s1098_s9 + $0x58] sm:$0xff]  ;;  %v285_v20 = vld [vmem:[%s1098_s9 + $0x60] sm:$0xff]  ;;  %v286_v21 = vld [vmem:[%s1098_s9 + $0x68] sm:$0xff] }
  0x18   : > { %957 = vmatprep.subr.bf16.mxu0 %v1024_v27  ;;  %1000 = vmatprep.subr.bf16.mxu1 %v1024_v27  ;;  %v1162_v46 = vpack.c.bf16 %v386_v33, %v385_v32  ;;  %v329_v49 = vmul.f32 %v1108_v6, %v290_v38  ;;  %v388_v53 = vmax.f32 %v1147_v36, 0.0  ;;  %v321_v54 = vmul.f32 %v1108_v6, %v282_v40  ;;  %v299_v30 = vld [vmem:[%s1098_s9 + $0xd0] sm:$0xff]  ;;  %v300_v31 = vld [vmem:[%s1098_s9 + $0xd8] sm:$0xff]  ;;  %v301_v36 = vld [vmem:[%s1098_s9 + $0xe0] sm:$0xff] }
  0x19   : > { %963 = vmatprep.mubr.bf16.mxu0 %v415_v23  ;;  %v367_v55 = vadd.f32 %v1115_v9, %v328_v41  ;;  %v330_v56 = vmul.f32 %v1108_v6, %v291_v42  ;;  %v389_v57 = vmax.f32 %v1152_v39, 0.0  ;;  %v331_v59 = vmul.f32 %v1108_v6, %v292_v44  ;;  %v302_v37 = vld [vmem:[%s1098_s9 + $0xe8] sm:$0xff] }
  0x1a   : > { %v368_v58 = vadd.f32 %v1115_v9, %v329_v49  ;;  %v332_v60 = vmul.f32 %v1108_v6, %v293_v45  ;;  %v333_v0 = vmul.f32 %v1108_v6, %v294_v50  ;;  %v334_v1 = vmul.f32 %v1108_v6, %v295_v51 }
  0x1b   : > { %958 = vmatpush3.bf16.msra.mxu0 %v1024_v27  ;;  %1008 = vmatpush3.bf16.msra.mxu1 %v1024_v27  ;;  %v399_v62 = vmax.f32 %v367_v55, 0.0  ;;  %v369_v63 = vadd.f32 %v1115_v9, %v330_v56  ;;  %v1186_v3 = vadd.f32 %v1115_v9, %v320_v48  ;;  %v370_v5 = vadd.f32 %v1115_v9, %v331_v59  ;;  %v287_v56 = vld [vmem:[%s1098_s9 + $0x70] sm:$0xff] }
  0x1c   : > { %959 = vmatprep.subr.bf16.mxu0 %v1025_v35  ;;  %1001 = vmatprep.subr.bf16.mxu1 %v1025_v35  ;;  %v400_v4 = vmax.f32 %v368_v58, 0.0  ;;  %v371_v7 = vadd.f32 %v1115_v9, %v332_v60  ;;  %v360_v10 = vadd.f32 %v1115_v9, %v321_v54  ;;  %v372_v12 = vadd.f32 %v1115_v9, %v333_v0  ;;  %v288_v58 = vld [vmem:[%s1098_s9 + $0x78] sm:$0xff]  ;;  %v303_v0 = vld [vmem:[%s1098_s9 + $0xf0] sm:$0xff] }
  0x1d   : > { %v401_v11 = vmax.f32 %v369_v63, 0.0  ;;  %v335_v13 = vmul.f32 %v1108_v6, %v296_v61  ;;  %v402_v17 = vmax.f32 %v370_v5, 0.0  ;;  %v336_v19 = vmul.f32 %v1108_v6, %v297_v2 }
  0x1e   : > { %v423_v16 = vpack.c.bf16 %v400_v4, %v399_v62  ;;  %v403_v18 = vmax.f32 %v371_v7, 0.0  ;;  %v404_v22 = vmax.f32 %v372_v12, 0.0  ;;  %v373_v23 = vadd.f32 %v1115_v9, %v334_v1  ;;  %v304_v1 = vld [vmem:[%s1098_s9 + $0xf8] sm:$0xff] }
  0x1f   : > { %960 = vmatpush3.bf16.msra.mxu0 %v1025_v35  ;;  %1009 = vmatpush3.bf16.msra.mxu1 %v1025_v35  ;;  %v374_v24 = vadd.f32 %v1115_v9, %v335_v13  ;;  %v337_v25 = vmul.f32 %v1108_v6, %v298_v8  ;;  %v417_v26 = vpack.c.bf16 %v388_v53, %v387_v47  ;;  %v390_v27 = vmax.f32 %v1158_v43, 0.0 }
  0x20   : > { %961 = vmatprep.subr.bf16.mxu0 %v1026_v52  ;;  %1002 = vmatprep.subr.bf16.mxu1 %v1026_v52  ;;  %v424_v28 = vpack.c.bf16 %v402_v17, %v401_v11  ;;  %v375_v29 = vadd.f32 %v1115_v9, %v336_v19  ;;  %v322_v32 = vmul.f32 %v1108_v6, %v283_v14  ;;  %v391_v38 = vmax.f32 %v1186_v3, 0.0 }
  0x21   : > { %v323_v33 = vmul.f32 %v1108_v6, %v284_v15  ;;  %979 = vmatprep.mubr.bf16.mxu1 %v423_v16  ;;  %v425_v34 = vpack.c.bf16 %v404_v22, %v403_v18  ;;  %v376_v35 = vadd.f32 %v1115_v9, %v337_v25  ;;  %v392_v40 = vmax.f32 %v360_v10, 0.0 }
  0x22   : > { %v324_v41 = vmul.f32 %v1108_v6, %v285_v20  ;;  %v325_v42 = vmul.f32 %v1108_v6, %v286_v21  ;;  %v405_v43 = vmax.f32 %v373_v23, 0.0  ;;  %v406_v44 = vmax.f32 %v374_v24, 0.0 }
  0x23   : > { %962 = vmatpush3.bf16.msra.mxu0 %v1026_v52  ;;  %1010 = vmatpush3.bf16.msra.mxu1 %v1026_v52  ;;  %v338_v45 = vmul.f32 %v1108_v6, %v299_v30  ;;  %v339_v47 = vmul.f32 %v1108_v6, %v300_v31  ;;  %v407_v48 = vmax.f32 %v375_v29, 0.0  ;;  %v408_v49 = vmax.f32 %v376_v35, 0.0 }
  0x24   : > { %v340_v50 = vmul.f32 %v1108_v6, %v301_v36  ;;  %v341_v51 = vmul.f32 %v1108_v6, %v302_v37  ;;  %v361_v52 = vadd.f32 %v1115_v9, %v322_v32  ;;  %v362_v53 = vadd.f32 %v1115_v9, %v323_v33 }
  0x25   : > { %v363_v54 = vadd.f32 %v1115_v9, %v324_v41  ;;  %v364_v55 = vadd.f32 %v1115_v9, %v325_v42  ;;  %v426_v59 = vpack.c.bf16 %v406_v44, %v405_v43  ;;  %v377_v60 = vadd.f32 %v1115_v9, %v338_v45 }
  0x26   : > { %964 = vmatmul.mubr.bf16.vlgmr.msra.gmra.mrb[0].mxu0 %v1162_v46  ;;  %980 = vmatmul.mubr.bf16.vlgmr.msra.gmra.mrb[0].mxu1 %v424_v28  ;;  %v418_v46 = vpack.c.bf16 %v390_v27, %v389_v57  ;;  %v378_v61 = vadd.f32 %v1115_v9, %v339_v47  ;;  %v419_v62 = vpack.c.bf16 %v392_v40, %v391_v38  ;;  %v393_v2 = vmax.f32 %v361_v52, 0.0 }
  0x27   : > { %967 = vmatprep.mubr.bf16.mxu0 %v417_v26  ;;  %983 = vmatprep.mubr.bf16.mxu1 %v425_v34  ;;  %v427_v63 = vpack.c.bf16 %v408_v49, %v407_v48  ;;  %v379_v39 = vadd.f32 %v1115_v9, %v340_v50  ;;  %v380_v57 = vadd.f32 %v1115_v9, %v341_v51  ;;  %v394_v3 = vmax.f32 %v362_v53, 0.0 }
  0x28   : > { %v326_v4 = vmul.f32 %v1108_v6, %v287_v56  ;;  %v327_v5 = vmul.f32 %v1108_v6, %v288_v58  ;;  %v409_v7 = vmax.f32 %v377_v60, 0.0  ;;  %v410_v8 = vmax.f32 %v378_v61, 0.0 }
  0x29   : > { %v342_v10 = vmul.f32 %v1108_v6, %v303_v0  ;;  %v343_v11 = vmul.f32 %v1108_v6, %v304_v1  ;;  %v395_v12 = vmax.f32 %v363_v54, 0.0  ;;  %v396_v13 = vmax.f32 %v364_v55, 0.0 }
  0x2a   : > { %v411_v14 = vmax.f32 %v379_v39, 0.0  ;;  %v412_v15 = vmax.f32 %v380_v57, 0.0  ;;  %v420_v16 = vpack.c.bf16 %v394_v3, %v393_v2  ;;  %v365_v17 = vadd.f32 %v1115_v9, %v326_v4 }
  0x2b   : > { %v366_v18 = vadd.f32 %v1115_v9, %v327_v5  ;;  %v428_v19 = vpack.c.bf16 %v410_v8, %v409_v7  ;;  %v381_v20 = vadd.f32 %v1115_v9, %v342_v10  ;;  %v382_v21 = vadd.f32 %v1115_v9, %v343_v11 }
  0x2c   : > { %v421_v22 = vpack.c.bf16 %v396_v13, %v395_v12  ;;  %v429_v23 = vpack.c.bf16 %v412_v15, %v411_v14  ;;  %v397_v6 = vmax.f32 %v365_v17, 0.0 }
  0x2d   : > { %v398_v24 = vmax.f32 %v366_v18, 0.0  ;;  %v413_v25 = vmax.f32 %v381_v20, 0.0  ;;  %v414_v26 = vmax.f32 %v382_v21, 0.0 }
  0x2e   : > { %968 = vmatmul.mubr.bf16.gmra.mrb[4].mxu0 %v418_v46  ;;  %984 = vmatmul.mubr.bf16.gmra.mrb[4].mxu1 %v426_v59 }
  0x2f   : > { %971 = vmatprep.mubr.bf16.mxu0 %v419_v62  ;;  %987 = vmatprep.mubr.bf16.mxu1 %v427_v63  ;;  %v422_v27 = vpack.c.bf16 %v398_v24, %v397_v6  ;;  %v430_v28 = vpack.c.bf16 %v414_v26, %v413_v25 }
  0x36   : > { %972 = vmatmul.mubr.bf16.gmra.mrb[8].mxu0 %v420_v16  ;;  %988 = vmatmul.mubr.bf16.gmra.mrb[8].mxu1 %v428_v19 }
  0x37   : > { %975 = vmatprep.mubr.bf16.mxu0 %v421_v22  ;;  %991 = vmatprep.mubr.bf16.mxu1 %v429_v23 }
  0x3e   : > { %976 = vmatmul.mubr.bf16.gmra.mrb[12].mxu0 %v422_v27  ;;  %992 = vmatmul.mubr.bf16.gmra.mrb[12].mxu1 %v430_v28 }
  0xf9   : > { %v965_v9 = vpop.f32.mrb[0].mxu0  ;;  %v1248_v29 = vpop.f32.mrb[0].mxu1 }
  0xfa   : > { %658 = vst [vmem:[%s1246_s29 + $0x10] sm:$0xff] %v965_v9  ;;  %v529_v30 = vpop.f32.mrb[1].mxu0  ;;  %674 = vst [vmem:[%s1246_s29 + $0x90] sm:$0xff] %v1248_v29  ;;  %v1253_v31 = vpop.f32.mrb[1].mxu1  ;;  %v728_v40 = vmul.f32 %v965_v9, %v965_v9 }
  0xfb   : > { %656 = vst [vmem:[%s1246_s29] sm:$0xff] %v529_v30  ;;  %v966_v32 = vpop.f32.mrb[2].mxu0  ;;  %672 = vst [vmem:[%s1246_s29 + $0x80] sm:$0xff] %v1253_v31  ;;  %v1258_v33 = vpop.f32.mrb[2].mxu1  ;;  %v726_v36 = vmul.f32 %v529_v30, %v529_v30 }
  0xfc   : > { %659 = vst [vmem:[%s1246_s29 + $0x18] sm:$0xff] %v966_v32  ;;  %v532_v34 = vpop.f32.mrb[3].mxu0  ;;  %675 = vst [vmem:[%s1246_s29 + $0x98] sm:$0xff] %v1258_v33  ;;  %v1263_v35 = vpop.f32.mrb[3].mxu1  ;;  %v729_v43 = vmul.f32 %v966_v32, %v966_v32 }
  0xfd   : > { %657 = vst [vmem:[%s1246_s29 + $0x8] sm:$0xff] %v532_v34  ;;  %v688_v37 = vadd.f32 %v532_v34, %v529_v30  ;;  %v727_v38 = vmul.f32 %v532_v34, %v532_v34  ;;  %673 = vst [vmem:[%s1246_s29 + $0x88] sm:$0xff] %v1263_v35 }
  0xff   : > { %v689_v41 = vadd.f32 %v965_v9, %v688_v37  ;;  %v758_v42 = vadd.f32 %v727_v38, %v726_v36 }
 0x101   : > { %v759_v44 = vadd.f32 %v758_v42, %v728_v40  ;;  %v969_v45 = vpop.f32.mrb[4].mxu0  ;;  %v690_v47 = vadd.f32 %v966_v32, %v689_v41  ;;  %v1268_v48 = vpop.f32.mrb[4].mxu1 }
 0x102   : > { %662 = vst [vmem:[%s1246_s29 + $0x30] sm:$0xff] %v969_v45  ;;  %v545_v49 = vpop.f32.mrb[5].mxu0  ;;  %678 = vst [vmem:[%s1246_s29 + $0xb0] sm:$0xff] %v1268_v48  ;;  %v1273_v50 = vpop.f32.mrb[5].mxu1  ;;  %v732_v61 = vmul.f32 %v969_v45, %v969_v45 }
 0x103   : > { %660 = vst [vmem:[%s1246_s29 + $0x20] sm:$0xff] %v545_v49  ;;  %v691_v51 = vadd.f32 %v690_v47, %v545_v49  ;;  %v730_v46 = vmul.f32 %v545_v49, %v545_v49  ;;  %v760_v52 = vadd.f32 %v759_v44, %v729_v43  ;;  %v970_v53 = vpop.f32.mrb[6].mxu0  ;;  %676 = vst [vmem:[%s1246_s29 + $0xa0] sm:$0xff] %v1273_v50  ;;  %v1278_v54 = vpop.f32.mrb[6].mxu1 }
 0x104   : > { %663 = vst [vmem:[%s1246_s29 + $0x38] sm:$0xff] %v970_v53  ;;  %v548_v55 = vpop.f32.mrb[7].mxu0  ;;  %679 = vst [vmem:[%s1246_s29 + $0xb8] sm:$0xff] %v1278_v54  ;;  %v1283_v56 = vpop.f32.mrb[7].mxu1  ;;  %v733_v39 = vmul.f32 %v970_v53, %v970_v53  ;;  %v742_v47 = vmul.f32 %v1253_v31, %v1253_v31 }
 0x105   : > { %v761_v58 = vadd.f32 %v760_v52, %v730_v46  ;;  %661 = vst [vmem:[%s1246_s29 + $0x28] sm:$0xff] %v548_v55  ;;  %v692_v59 = vadd.f32 %v691_v51, %v548_v55  ;;  %v731_v60 = vmul.f32 %v548_v55, %v548_v55  ;;  %677 = vst [vmem:[%s1246_s29 + $0xa8] sm:$0xff] %v1283_v56 }
 0x106   : > { %v744_v55 = vmul.f32 %v1248_v29, %v1248_v29 }
 0x107   : > { %v693_v62 = vadd.f32 %v969_v45, %v692_v59  ;;  %v762_v63 = vadd.f32 %v761_v58, %v731_v60  ;;  %v745_v60 = vmul.f32 %v1258_v33, %v1258_v33 }
 0x109   : > { %v763_v57 = vadd.f32 %v762_v63, %v732_v61  ;;  %v973_v0 = vpop.f32.mrb[8].mxu0  ;;  %v694_v1 = vadd.f32 %v970_v53, %v693_v62  ;;  %v1288_v2 = vpop.f32.mrb[8].mxu1  ;;  %v743_v53 = vmul.f32 %v1263_v35, %v1263_v35 }
 0x10a   : > { %666 = vst [vmem:[%s1246_s29 + $0x50] sm:$0xff] %v973_v0  ;;  %v561_v3 = vpop.f32.mrb[9].mxu0  ;;  %682 = vst [vmem:[%s1246_s29 + $0xd0] sm:$0xff] %v1288_v2  ;;  %v1293_v4 = vpop.f32.mrb[9].mxu1  ;;  %v736_v17 = vmul.f32 %v973_v0, %v973_v0 }
 0x10b   : > { %664 = vst [vmem:[%s1246_s29 + $0x40] sm:$0xff] %v561_v3  ;;  %v695_v5 = vadd.f32 %v694_v1, %v561_v3  ;;  %v734_v7 = vmul.f32 %v561_v3, %v561_v3  ;;  %v764_v8 = vadd.f32 %v763_v57, %v733_v39  ;;  %v974_v10 = vpop.f32.mrb[10].mxu0  ;;  %680 = vst [vmem:[%s1246_s29 + $0xc0] sm:$0xff] %v1293_v4  ;;  %v1298_v11 = vpop.f32.mrb[10].mxu1 }
 0x10c   : > { %667 = vst [vmem:[%s1246_s29 + $0x58] sm:$0xff] %v974_v10  ;;  %v564_v12 = vpop.f32.mrb[11].mxu0  ;;  %683 = vst [vmem:[%s1246_s29 + $0xd8] sm:$0xff] %v1298_v11  ;;  %v1303_v13 = vpop.f32.mrb[11].mxu1  ;;  %v737_v20 = vmul.f32 %v974_v10, %v974_v10 }
 0x10d   : > { %v765_v14 = vadd.f32 %v764_v8, %v734_v7  ;;  %665 = vst [vmem:[%s1246_s29 + $0x48] sm:$0xff] %v564_v12  ;;  %v696_v15 = vadd.f32 %v695_v5, %v564_v12  ;;  %v735_v16 = vmul.f32 %v564_v12, %v564_v12  ;;  %681 = vst [vmem:[%s1246_s29 + $0xc8] sm:$0xff] %v1303_v13 }
 0x10f   : > { %v697_v18 = vadd.f32 %v973_v0, %v696_v15  ;;  %v766_v19 = vadd.f32 %v765_v14, %v735_v16  ;;  %v747_v0 = vmul.f32 %v1283_v56, %v1283_v56  ;;  %v751_v14 = vmul.f32 %v1303_v13, %v1303_v13 }
 0x111   : > { %v767_v21 = vadd.f32 %v766_v19, %v736_v17  ;;  %v977_v22 = vpop.f32.mrb[12].mxu0  ;;  %v698_v23 = vadd.f32 %v974_v10, %v697_v18  ;;  %v1308_v6 = vpop.f32.mrb[12].mxu1 }
 0x112   : > { %670 = vst [vmem:[%s1246_s29 + $0x70] sm:$0xff] %v977_v22  ;;  %v577_v24 = vpop.f32.mrb[13].mxu0  ;;  %686 = vst [vmem:[%s1246_s29 + $0xf0] sm:$0xff] %v1308_v6  ;;  %v641_v25 = vpop.f32.mrb[13].mxu1  ;;  %v740_v40 = vmul.f32 %v977_v22, %v977_v22 }
 0x113   : > { %668 = vst [vmem:[%s1246_s29 + $0x60] sm:$0xff] %v577_v24  ;;  %v699_v26 = vadd.f32 %v698_v23, %v577_v24  ;;  %v738_v27 = vmul.f32 %v577_v24, %v577_v24  ;;  %v768_v28 = vadd.f32 %v767_v21, %v737_v20  ;;  %v978_v9 = vpop.f32.mrb[14].mxu0  ;;  %684 = vst [vmem:[%s1246_s29 + $0xe0] sm:$0xff] %v641_v25  ;;  %v994_v30 = vpop.f32.mrb[14].mxu1 }
 0x114   : > { %671 = vst [vmem:[%s1246_s29 + $0x78] sm:$0xff] %v978_v9  ;;  %v580_v32 = vpop.f32.mrb[15].mxu0  ;;  %687 = vst [vmem:[%s1246_s29 + $0xf8] sm:$0xff] %v994_v30  ;;  %v644_v34 = vpop.f32.mrb[15].mxu1  ;;  %v741_v43 = vmul.f32 %v978_v9, %v978_v9  ;;  %v754_v18 = vmul.f32 %v641_v25, %v641_v25  ;;  %v756_v23 = vmul.f32 %v1308_v6, %v1308_v6 }
 0x115   : > { %v769_v36 = vadd.f32 %v768_v28, %v738_v27  ;;  %669 = vst [vmem:[%s1246_s29 + $0x68] sm:$0xff] %v580_v32  ;;  %v700_v37 = vadd.f32 %v699_v26, %v580_v32  ;;  %v739_v38 = vmul.f32 %v580_v32, %v580_v32  ;;  %685 = vst [vmem:[%s1246_s29 + $0xe8] sm:$0xff] %v644_v34 }
 0x116   : > { %v757_v26 = vmul.f32 %v994_v30, %v994_v30 }
 0x117   : > { %v701_v41 = vadd.f32 %v977_v22, %v700_v37  ;;  %v770_v42 = vadd.f32 %v769_v36, %v739_v38 }
 0x119   : > { %v771_v44 = vadd.f32 %v770_v42, %v740_v40  ;;  %v702_v45 = vadd.f32 %v978_v9, %v701_v41 }
 0x11b   : > { %v703_v49 = vadd.f32 %v702_v45, %v1253_v31  ;;  %v772_v51 = vadd.f32 %v771_v44, %v741_v43  ;;  %v746_v31 = vmul.f32 %v1273_v50, %v1273_v50 }
 0x11d   : > { %v773_v46 = vadd.f32 %v772_v51, %v742_v47  ;;  %v704_v52 = vadd.f32 %v703_v49, %v1263_v35 }
 0x11f   : > { %v705_v58 = vadd.f32 %v1248_v29, %v704_v52  ;;  %v774_v59 = vadd.f32 %v773_v46, %v743_v53  ;;  %v748_v29 = vmul.f32 %v1268_v48, %v1268_v48 }
 0x121   : > { %v775_v61 = vadd.f32 %v774_v59, %v744_v55  ;;  %v706_v62 = vadd.f32 %v1258_v33, %v705_v58  ;;  %v749_v33 = vmul.f32 %v1278_v54, %v1278_v54 }
 0x123   : > { %v707_v63 = vadd.f32 %v706_v62, %v1273_v50  ;;  %v776_v39 = vadd.f32 %v775_v61, %v745_v60  ;;  %v750_v50 = vmul.f32 %v1293_v4, %v1293_v4 }
 0x125   : > { %v777_v57 = vadd.f32 %v776_v39, %v746_v31  ;;  %v708_v35 = vadd.f32 %v707_v63, %v1283_v56 }
 0x127   : > { %v709_v1 = vadd.f32 %v1268_v48, %v708_v35  ;;  %v778_v3 = vadd.f32 %v777_v57, %v747_v0  ;;  %v752_v48 = vmul.f32 %v1288_v2, %v1288_v2 }
 0x129   : > { %v779_v5 = vadd.f32 %v778_v3, %v748_v29  ;;  %v710_v7 = vadd.f32 %v1278_v54, %v709_v1  ;;  %v753_v54 = vmul.f32 %v1298_v11, %v1298_v11 }
 0x12b   : > { %v711_v8 = vadd.f32 %v710_v7, %v1293_v4  ;;  %v780_v10 = vadd.f32 %v779_v5, %v749_v33 }
 0x12d   : > { %v781_v12 = vadd.f32 %v780_v10, %v750_v50  ;;  %v712_v56 = vadd.f32 %v711_v8, %v1303_v13  ;;  %v755_v13 = vmul.f32 %v644_v34, %v644_v34 }
 0x12f   : > { %v713_v15 = vadd.f32 %v1288_v2, %v712_v56  ;;  %v782_v16 = vadd.f32 %v781_v12, %v751_v14 }
 0x131   : > { %v783_v17 = vadd.f32 %v782_v16, %v752_v48  ;;  %v714_v4 = vadd.f32 %v1298_v11, %v713_v15 }
 0x133   : > { %v715_v19 = vadd.f32 %v714_v4, %v641_v25  ;;  %v784_v20 = vadd.f32 %v783_v17, %v753_v54 }
 0x135   : > { %v785_v21 = vadd.f32 %v784_v20, %v754_v18  ;;  %v716_v22 = vadd.f32 %v715_v19, %v644_v34 }
 0x137   : > { %v717_v2 = vadd.f32 %v1308_v6, %v716_v22  ;;  %v786_v24 = vadd.f32 %v785_v21, %v755_v13 }
 0x139   : > { %v718_v27 = vadd.f32 %v994_v30, %v717_v2  ;;  %v787_v28 = vadd.f32 %v786_v24, %v756_v23 }
 0x13b   : > { %v719_v9 = vrot.slane %v718_v27, 4  ;;  %v788_v32 = vadd.f32 %v787_v28, %v757_v26 }
 0x13d   : > { %v720_v11 = vadd.f32 %v719_v9, %v718_v27  ;;  %v789_v36 = vrot.slane %v788_v32, 4 }
 0x13f   : > { %v721_v25 = vrot.slane %v720_v11, 2  ;;  %v790_v37 = vadd.f32 %v789_v36, %v788_v32 }
 0x141   : > { %v722_v38 = vadd.f32 %v721_v25, %v720_v11  ;;  %v791_v40 = vrot.slane %v790_v37, 2 }
 0x143   : > { %v723_v34 = vrot.slane %v722_v38, 1  ;;  %v792_v41 = vadd.f32 %v791_v40, %v790_v37 }
 0x145   : > { %v724_v6 = vadd.f32 %v723_v34, %v722_v38  ;;  %v793_v42 = vrot.slane %v792_v41, 1 }
 0x147   : > { %725 = vst [vmem:[%s268_s7] sm:$0x1] %v724_v6  ;;  %v794_v30 = vadd.f32 %v793_v42, %v792_v41 }
 0x149   : > { %795 = vst [vmem:[%s271_s10] sm:$0x1] %v794_v30 }
 0x14a PF: > { %s17_s21 = sadd.s32 1, %s1033_s21  }
 0x14b   : > { %p14_p5 = scmp.ge.s32.totalorder %s17_s21, 4  }
 0x14d   :  { %16 = sbr.rel (!%p14_p5) target bundleno = 1 (0x1), region = 90 }

// kernel: mbblock_forward.5
= control target key start
LH: loop header
LB: loop body
LE: loop exit
PB: predicated region body
PF: predicated region fallthrough
CT: control target
= control target key end

     0   :  { %s2376_s21 = smov 0   ;;  %s3561_s0 = inlined_call_operand.vmem [shape: f32[2,256,128], index: 0, kind: input, shape index: {}]   ;;  %s3562_s1 = inlined_call_operand.vmem [shape: f32[1,128], index: 1, kind: input, shape index: {}]   ;;  %s3563_s2 = inlined_call_operand.vmem [shape: f32[1,128], index: 2, kind: input, shape index: {}]   ;;  %s3564_s3 = inlined_call_operand.vmem [shape: f32[9,128], index: 3, kind: input, shape index: {}]   ;;  %s3565_s4 = inlined_call_operand.vmem [shape: f32[2,256,128], index: 4, kind: output, shape index: {0}]   ;;  %s3566_s5 = inlined_call_operand.vmem [shape: f32[2,1,128], index: 5, kind: output, shape index: {1}]   ;;  %s3567_s6 = inlined_call_operand.vmem [shape: f32[2,1,128], index: 6, kind: output, shape index: {2}]  }
   0x1 LB: > { %s2254_s22 = sadd.s32 4294967295, %s2338_s21   ;;  %p2258_p0 = scmp.ge.s32.totalorder %s2338_s21, 1  ;;  %s2338_s21 = sphi %s2376_s21, %s17_s21  }
   0x2   : > { %p217_p1 = scmp.lt.s32.totalorder %s2338_s21, 3 }
   0x4   : > { %p218_p2 = pnand %p2258_p0, %p217_p1 }
   0x6   : > { %221 = sbr.rel (%p218_p2) target bundleno = 284 (0x11c), region = 36 }
   0xd   : > { %p253_p3 = scmp.lt.s32.totalorder %s2254_s22, 1  ;;  %v449_v0 = vlaneseq  ;;  %v3568_v1 = vmov 0.0   ;;  %v2398_v3 = vld [vmem:[%s3562_s1] ss:$0 sm:$0xff] }
   0xe   : > { %411 = vst [vmem:[#allocation2] sm:$0xff] %v3568_v1  ;;  %412 = vst [vmem:[#allocation2 + $0x8] sm:$0xff] %v3568_v1  ;;  %v2411_v5 = vld [vmem:[%s3563_s2] ss:$0 sm:$0xff] }
   0xf   : > { %413 = vst [vmem:[#allocation2 + $0x10] sm:$0x1] %v3568_v1  ;;  %414 = vst [vmem:[#allocation2 + $0x111] sm:$0xff] %v3568_v1  ;;  %s3580_s22 = smov (!%p253_p3, %s2254_s22), 1  ;;  %v2392_v2 = vshrl.u32 %v449_v0, 7 }
  0x10   : > { %415 = vst [vmem:[#allocation2 + $0x119] sm:$0xff] %v3568_v1  ;;  %416 = vst [vmem:[#allocation2 + $0x121] sm:$0x1] %v3568_v1  ;;  %s2308_s23 = sshll.u32 %s3580_s22, 8  ;;  %v2490_v59 = vld [vmem:[%s3564_s3] ss:$0 sm:$0xff]  ;;  %s265_s10 = scalar_lea.vmem %s3566_s5, %s3580_s22 }
  0x11   : > { %v486_v4 = vand.u32 15, %v2392_v2  ;;  %s2406_s28 = scalar_lea.vmem %s3561_s0, %s2308_s23  ;;  %v2417_v9 = vadd.s32 8, %v2392_v2  ;;  %s2642_s7 = scalar_lea.vmem %s3565_s4, %s2308_s23 }
  0x12   : > { %v269_v6 = vld [vmem:[%s2406_s28] sm:$0xff]  ;;  %v270_v7 = vld [vmem:[%s2406_s28 + $0x8] sm:$0xff]  ;;  %v271_v8 = vld [vmem:[%s2406_s28 + $0x10] sm:$0xff]  ;;  %s268_s12 = scalar_lea.vmem %s3567_s6, %s3580_s22 }
  0x13   : > { %vm866_vm0 = vcmp.ge.s32.totalorder %v486_v4, 1  ;;  %v308_v10 = vmul.f32 %v2398_v3, %v269_v6  ;;  %v309_v11 = vmul.f32 %v2398_v3, %v270_v7  ;;  %v310_v12 = vmul.f32 %v2398_v3, %v271_v8  ;;  %v272_v13 = vld [vmem:[%s2406_s28 + $0x18] sm:$0xff]  ;;  %v273_v14 = vld [vmem:[%s2406_s28 + $0x20] sm:$0xff]  ;;  %v274_v15 = vld [vmem:[%s2406_s28 + $0x28] sm:$0xff] }
  0x14   : > { %v2426_v16 = vsel %vm866_vm0, 1.0, %v3568_v1  ;;  %v311_v17 = vmul.f32 %v2398_v3, %v272_v13  ;;  %v312_v18 = vmul.f32 %v2398_v3, %v273_v14  ;;  %v313_v19 = vmul.f32 %v2398_v3, %v274_v15  ;;  %v275_v20 = vld [vmem:[%s2406_s28 + $0x30] sm:$0xff]  ;;  %v276_v21 = vld [vmem:[%s2406_s28 + $0x38] sm:$0xff]  ;;  %v277_v31 = vld [vmem:[%s2406_s28 + $0x40] sm:$0xff] }
  0x15   : > { %v2434_v22 = vmul.f32 0.0, %v2426_v16  ;;  %v347_v23 = vadd.f32 %v2411_v5, %v308_v10  ;;  %v348_v24 = vadd.f32 %v2411_v5, %v309_v11  ;;  %v349_v25 = vadd.f32 %v2411_v5, %v310_v12  ;;  %v278_v32 = vld [vmem:[%s2406_s28 + $0x48] sm:$0xff]  ;;  %v279_v33 = vld [vmem:[%s2406_s28 + $0x50] sm:$0xff]  ;;  %v280_v38 = vld [vmem:[%s2406_s28 + $0x58] sm:$0xff] }
  0x16   : > { %v314_v26 = vmul.f32 %v2398_v3, %v275_v20  ;;  %v350_v27 = vadd.f32 %v2411_v5, %v311_v17  ;;  %v351_v28 = vadd.f32 %v2411_v5, %v312_v18  ;;  %v352_v29 = vadd.f32 %v2411_v5, %v313_v19  ;;  %v281_v39 = vld [vmem:[%s2406_s28 + $0x60] sm:$0xff]  ;;  %v282_v40 = vld [vmem:[%s2406_s28 + $0x68] sm:$0xff]  ;;  %v283_v45 = vld [vmem:[%s2406_s28 + $0x70] sm:$0xff] }
  0x17   : > { %v315_v30 = vmul.f32 %v2398_v3, %v276_v21  ;;  %v2447_v34 = vmax.f32 %v347_v23, 0.0  ;;  %v2449_v35 = vmax.f32 %v348_v24, 0.0  ;;  %v2451_v36 = vmax.f32 %v349_v25, 0.0  ;;  %v284_v50 = vld [vmem:[%s2406_s28 + $0x78] sm:$0xff]  ;;  %v285_v0 = vld [vmem:[%s2406_s28 + $0x80] sm:$0xff] }
  0x18   : > { %v353_v37 = vadd.f32 %v2411_v5, %v314_v26  ;;  %v2457_v41 = vmax.f32 %v350_v27, 0.0  ;;  %v2459_v42 = vmax.f32 %v351_v28, 0.0  ;;  %v2461_v43 = vmax.f32 %v352_v29, 0.0  ;;  %v1191_v4 = vld [vmem:[#allocation2 + $0x1] sm:$0xff] }
  0x19   : > { %v354_v44 = vadd.f32 %v2411_v5, %v315_v30  ;;  %417 = vst [vmem:[#allocation2 + $0x11] sm:$0xff] %v2447_v34  ;;  %418 = vst [vmem:[#allocation2 + $0x19] sm:$0xff] %v2449_v35  ;;  %v316_v47 = vmul.f32 %v2398_v3, %v277_v31  ;;  %v317_v48 = vmul.f32 %v2398_v3, %v278_v32  ;;  %v2501_v6 = vld [vmem:[%s3564_s3 + $0x1] ss:$0 sm:$0xff]  ;;  %v1292_v12 = vld [vmem:[#allocation2 + $0x2] sm:$0xff]  ;;  %v1128_v32 = vmul.f32 0.0, %v2490_v59 }
  0x1a   : > { %419 = vst [vmem:[#allocation2 + $0x21] sm:$0xff] %v2451_v36  ;;  %v2468_v46 = vmax.f32 %v353_v37, 0.0  ;;  %v318_v49 = vmul.f32 %v2398_v3, %v279_v33  ;;  %420 = vst [vmem:[#allocation2 + $0x29] sm:$0xff] %v2457_v41  ;;  %v319_v52 = vmul.f32 %v2398_v3, %v280_v38  ;;  %v320_v53 = vmul.f32 %v2398_v3, %v281_v39  ;;  %v2513_v13 = vld [vmem:[%s3564_s3 + $0x2] ss:$0 sm:$0xff]  ;;  %v1192_v33 = vld [vmem:[#allocation2 + $0x9] sm:$0xff] }
  0x1b   : > { %421 = vst [vmem:[#allocation2 + $0x31] sm:$0xff] %v2459_v42  ;;  %422 = vst [vmem:[#allocation2 + $0x39] sm:$0xff] %v2461_v43  ;;  %v2477_v51 = vmax.f32 %v354_v44, 0.0  ;;  %v321_v54 = vmul.f32 %v2398_v3, %v282_v40  ;;  %v355_v55 = vadd.f32 %v2411_v5, %v316_v47  ;;  %v356_v56 = vadd.f32 %v2411_v5, %v317_v48  ;;  %v2542_v27 = vld [vmem:[%s3564_s3 + $0x4] ss:$0 sm:$0xff] }
  0x1c   : > { %423 = vst [vmem:[#allocation2 + $0x41] sm:$0xff] %v2468_v46  ;;  %v357_v57 = vadd.f32 %v2411_v5, %v318_v49  ;;  %v322_v58 = vmul.f32 %v2398_v3, %v283_v45  ;;  %v358_v60 = vadd.f32 %v2411_v5, %v319_v52  ;;  %v359_v61 = vadd.f32 %v2411_v5, %v320_v53  ;;  %v2553_v31 = vld [vmem:[%s3564_s3 + $0x3] ss:$0 sm:$0xff]  ;;  %v2563_v44 = vld [vmem:[%s3564_s3 + $0x5] ss:$0 sm:$0xff] }
  0x1d   : > { %424 = vst [vmem:[#allocation2 + $0x49] sm:$0xff] %v2477_v51  ;;  %v360_v62 = vadd.f32 %v2411_v5, %v321_v54  ;;  %v323_v63 = vmul.f32 %v2398_v3, %v284_v50  ;;  %v2503_v7 = vmax.f32 %v355_v55, 0.0  ;;  %v2505_v8 = vmax.f32 %v356_v56, 0.0 }
  0x1e   : > { %v2507_v10 = vmax.f32 %v357_v57, 0.0  ;;  %v361_v11 = vadd.f32 %v2411_v5, %v322_v58  ;;  %v2515_v14 = vmax.f32 %v358_v60, 0.0  ;;  %v2517_v15 = vmax.f32 %v359_v61, 0.0  ;;  %v2580_v57 = vld [vmem:[%s3564_s3 + $0x7] ss:$0 sm:$0xff] }
  0x1f   : > { %v2519_v17 = vmax.f32 %v360_v62, 0.0  ;;  %v362_v18 = vadd.f32 %v2411_v5, %v323_v63  ;;  %425 = vst [vmem:[#allocation2 + $0x51] sm:$0xff] %v2503_v7  ;;  %426 = vst [vmem:[#allocation2 + $0x59] sm:$0xff] %v2505_v8  ;;  %v324_v20 = vmul.f32 %v2398_v3, %v285_v0  ;;  %v1127_v21 = vmul.f32 %v2490_v59, %v2434_v22 }
  0x20   : > { %427 = vst [vmem:[#allocation2 + $0x61] sm:$0xff] %v2507_v10  ;;  %v2525_v19 = vmax.f32 %v361_v11, 0.0  ;;  %v1228_v23 = vmul.f32 %v2501_v6, %v1191_v4  ;;  %428 = vst [vmem:[#allocation2 + $0x69] sm:$0xff] %v2515_v14  ;;  %v2536_v25 = vld [vmem:[#allocation2 + $0x10] sm:$0xff]  ;;  %v1361_v26 = vmul.f32 %v2513_v13, %v1292_v12  ;;  %v493_v22 = vand.u32 15, %v2417_v9  ;;  %v1061_v55 = vld [vmem:[#allocation2 + $0x18] sm:$0xff] }
  0x21   : > { %429 = vst [vmem:[#allocation2 + $0x71] sm:$0xff] %v2517_v15  ;;  %430 = vst [vmem:[#allocation2 + $0x79] sm:$0xff] %v2519_v17  ;;  %v2534_v24 = vmax.f32 %v362_v18, 0.0  ;;  %v363_v28 = vadd.f32 %v2411_v5, %v324_v20  ;;  %v1427_v30 = vmul.f32 %v2426_v16, %v2536_v25  ;;  %v453_v9 = vadd.s32 24, %v2392_v2  ;;  %v1293_v45 = vld [vmem:[#allocation2 + $0xa] sm:$0xff]  ;;  %v2565_v47 = vld [vmem:[#allocation2 + $0x20] sm:$0xff] }
  0x22   : > { %431 = vst [vmem:[#allocation2 + $0x81] sm:$0xff] %v2525_v19  ;;  %v1260_v29 = vadd.f32 %v1228_v23, %v1127_v21  ;;  %v1535_v40 = vmul.f32 %v2542_v27, %v2447_v34  ;;  %v1294_v48 = vld [vmem:[#allocation2 + $0x12] sm:$0xff]  ;;  %vm963_vm1 = vcmp.lt.s32.totalorder %v493_v22, 15  ;;  %v2568_v49 = vadd.s32 16, %v2392_v2  ;;  %v2600_v12 = vld [vmem:[%s3564_s3 + $0x6] ss:$0 sm:$0xff] }
  0x23   : > { %432 = vst [vmem:[#allocation2 + $0x89] sm:$0xff] %v2534_v24  ;;  %v395_v37 = vmax.f32 %v363_v28, 0.0  ;;  %v1464_v39 = vmul.f32 %v2553_v31, %v1427_v30  ;;  %v2571_v50 = vadd.s32 32, %v2392_v2  ;;  %v1704_v53 = vmul.f32 %v2426_v16, %v2565_v47  ;;  %v2609_v22 = vld [vmem:[#allocation2 + $0x22] sm:$0xff] }
  0x24   : > { %v1393_v38 = vadd.f32 %v1361_v26, %v1260_v29  ;;  %v2281_v54 = vsel %vm963_vm1, 1.0, %v3568_v1  ;;  %v1229_v56 = vmul.f32 %v2501_v6, %v1192_v33  ;;  %v507_v60 = vand.u32 15, %v453_v9  ;;  %v2614_v28 = vld [vmem:[%s3564_s3 + $0x8] ss:$0 sm:$0xff]  ;;  %v1295_v29 = vld [vmem:[#allocation2 + $0x1a] sm:$0xff] }
  0x25   : > { %433 = vst [vmem:[#allocation2 + $0x91] sm:$0xff] %v395_v37  ;;  %v1325_v58 = vmul.f32 %v2281_v54, %v1293_v45  ;;  %v2583_v61 = vadd.s32 40, %v2392_v2  ;;  %v2586_v62 = vadd.s32 48, %v2392_v2  ;;  %v2590_v16 = vmul.f32 %v2501_v6, %v2447_v34 }
  0x26   : > { %v1496_v52 = vadd.f32 %v1464_v39, %v1393_v38  ;;  %v1638_v0 = vmul.f32 %v2563_v44, %v1294_v48  ;;  %v1261_v4 = vadd.f32 %v1229_v56, %v1128_v32  ;;  %v2595_v11 = vmul.f32 %v2501_v6, %v2451_v36 }
  0x27   : > { %v1130_v18 = vmul.f32 %v2490_v59, %v1061_v55  ;;  %v1231_v20 = vmul.f32 %v2501_v6, %v2449_v35  ;;  %v1362_v34 = vmul.f32 %v2513_v13, %v1325_v58  ;;  %v1741_v23 = vmul.f32 %v2600_v12, %v1704_v53  ;;  %v286_v58 = vld [vmem:[%s2406_s28 + $0x88] sm:$0xff] }
  0x28   : > { %v1567_v63 = vadd.f32 %v1535_v40, %v1496_v52  ;;  %v1812_v26 = vmul.f32 %v2580_v57, %v2451_v36  ;;  %v1465_v30 = vmul.f32 %v2553_v31, %v1061_v55  ;;  %v1536_v33 = vmul.f32 %v2542_v27, %v2449_v35  ;;  %v1063_v52 = vld [vmem:[#allocation2 + $0x28] sm:$0xff] }
  0x29   : > { %v1394_v32 = vadd.f32 %v1362_v34, %v1261_v4  ;;  %v1602_v9 = vmul.f32 %v2281_v54, %v1295_v29  ;;  %vm965_vm2 = vcmp.lt.s32.totalorder %v507_v60, 15  ;;  %v2620_v37 = vmul.f32 %v2513_v13, %v1294_v48  ;;  %v2629_v35 = vld [vmem:[#allocation2 + $0x2a] sm:$0xff] }
  0x2a   : > { %v1670_v21 = vadd.f32 %v1638_v0, %v1567_v63  ;;  %v2624_v38 = vmul.f32 %v2542_v27, %v2451_v36  ;;  %v2282_v40 = vsel %vm965_vm2, 1.0, %v3568_v1  ;;  %v1945_v45 = vmul.f32 %v2614_v28, %v2609_v22  ;;  %v287_v0 = vld [vmem:[%s2406_s28 + $0x90] sm:$0xff] }
  0x2b   : > { %v1497_v53 = vadd.f32 %v1465_v30, %v1394_v32  ;;  %v1263_v55 = vadd.f32 %v1231_v20, %v1130_v18  ;;  %v1327_v56 = vmul.f32 %v2282_v40, %v1295_v29  ;;  %v1467_v60 = vmul.f32 %v2553_v31, %v1063_v52 }
  0x2c   : > { %v1773_v39 = vadd.f32 %v1741_v23, %v1670_v21  ;;  %v1538_v36 = vmul.f32 %v2542_v27, %v2457_v41  ;;  %v1604_v63 = vmul.f32 %v2282_v40, %v2629_v35  ;;  %v1639_v18 = vmul.f32 %v2563_v44, %v1602_v9 }
  0x2d   : > { %v1568_v4 = vadd.f32 %v1536_v33, %v1497_v53  ;;  %v1742_v20 = vmul.f32 %v2600_v12, %v1063_v52  ;;  %v1364_v34 = vmul.f32 %v2513_v13, %v1327_v56  ;;  %v1813_v23 = vmul.f32 %v2580_v57, %v2457_v41 }
  0x2e   : > { %v1844_v48 = vadd.f32 %v1812_v26, %v1773_v39  ;;  %v1909_v26 = vmul.f32 %v2281_v54, %v2629_v35  ;;  %v325_v29 = vmul.f32 %v2398_v3, %v286_v58  ;;  %v326_v39 = vmul.f32 %v2398_v3, %v287_v0  ;;  %v1065_v54 = vld [vmem:[#allocation2 + $0x38] sm:$0xff] }
  0x2f   : > { %v1671_v30 = vadd.f32 %v1639_v18, %v1568_v4  ;;  %v1396_v32 = vadd.f32 %v1364_v34, %v1263_v55  ;;  %v500_v33 = vand.u32 15, %v2568_v49  ;;  %v1132_v9 = vmul.f32 %v2490_v59, %v1063_v52  ;;  %v2659_v58 = vld [vmem:[#allocation2 + $0x3a] sm:$0xff] }
  0x30   : > { %v1977_v21 = vadd.f32 %v1945_v45, %v1844_v48  ;;  %v1233_v53 = vmul.f32 %v2501_v6, %v2457_v41  ;;  %v1641_v45 = vmul.f32 %v2563_v44, %v1604_v63  ;;  %v364_v56 = vadd.f32 %v2411_v5, %v325_v29 }
  0x31   : > { %v1774_v48 = vadd.f32 %v1742_v20, %v1671_v30  ;;  %v1499_v1 = vadd.f32 %v1467_v60, %v1396_v32  ;;  %v365_v55 = vadd.f32 %v2411_v5, %v326_v39  ;;  %vm868_vm3 = vcmp.ge.s32.totalorder %v500_v33, 1 }
  0x32   : > { %2009 = vst [vmem:[%s2642_s7] sm:$0xff] %v1977_v21  ;;  %v1946_v49 = vmul.f32 %v2614_v28, %v1909_v26  ;;  %v1911_v0 = vmul.f32 %v2282_v40, %v2659_v58  ;;  %v2664_v52 = vmax.f32 %v364_v56, 0.0  ;;  %v3575_v4 = vmov 0.0  }
  0x33   : > { %v2266_v41 = vsel %vm868_vm3, 1.0, %v3575_v4  ;;  %v1845_v18 = vadd.f32 %v1813_v23, %v1774_v48  ;;  %v1570_v63 = vadd.f32 %v1538_v36, %v1499_v1  ;;  %v2667_v34 = vmax.f32 %v365_v55, 0.0 }
  0x34   : > { %3574 = vst [vmem:[#allocation3_spill] sm:$0xff] %v2664_v52  ;;  %v1092_v60 = vmul.f32 %v2266_v41, %v2536_v25  ;;  %v1134_v20 = vmul.f32 %v2490_v59, %v1065_v54  ;;  %v1235_v29 = vmul.f32 %v2501_v6, %v2461_v43  ;;  %v1744_v26 = vmul.f32 %v2600_v12, %v1065_v54 }
  0x35   : > { %3576 = vst [vmem:[#allocation4_spill] sm:$0xff] %v2667_v34  ;;  %434 = vst [vmem:[#allocation2 + $0x99] sm:$0xff] %v2664_v52  ;;  %v1429_v40 = vmul.f32 %v2266_v41, %v2565_v47  ;;  %v1978_v30 = vadd.f32 %v1946_v49, %v1845_v18  ;;  %v1673_v32 = vadd.f32 %v1641_v45, %v1570_v63  ;;  %v514_v33 = vand.u32 15, %v2571_v50 }
  0x36   : > { %v1815_v1 = vmul.f32 %v2580_v57, %v2461_v43  ;;  %435 = vst [vmem:[#allocation2 + $0xa1] sm:$0xff] %v2667_v34  ;;  %v1129_v25 = vmul.f32 %v2490_v59, %v1092_v60  ;;  %v2079_v36 = vmul.f32 %v1977_v21, %v1977_v21  ;;  %v1948_v23 = vmul.f32 %v2614_v28, %v1911_v0  ;;  %v1064_v34 = vld [vmem:[#allocation2 + $0x30] sm:$0xff] }
  0x37   : > { %v1466_v39 = vmul.f32 %v2553_v31, %v1429_v40  ;;  %2010 = vst [vmem:[%s2642_s7 + $0x8] sm:$0xff] %v1978_v30  ;;  %v2684_v56 = vadd.f32 %v1978_v30, %v1977_v21  ;;  %v2080_v48 = vmul.f32 %v1978_v30, %v1978_v30  ;;  %v1776_v55 = vadd.f32 %v1744_v26, %v1673_v32  ;;  %v1878_v32 = vld [vmem:[#allocation2 + $0x32] sm:$0xff] }
  0x38   : > { %v1262_v45 = vadd.f32 %v2590_v16, %v1129_v25  ;;  %v1265_v49 = vadd.f32 %v1233_v53, %v1132_v9  ;;  %v2687_v18 = vadd.f32 %v1235_v29, %v1134_v20  ;;  %v1469_v63 = vmul.f32 %v2553_v31, %v1065_v54  ;;  %v2717_v25 = vld [vmem:[#allocation2 + $0x40] sm:$0xff] }
  0x39   : > { %vm870_vm4 = vcmp.ge.s32.totalorder %v514_v33, 1  ;;  %v2690_v60 = vadd.f32 %v2080_v48, %v2079_v36  ;;  %v1847_v0 = vadd.f32 %v1815_v1, %v1776_v55  ;;  %v1540_v26 = vmul.f32 %v2542_v27, %v2461_v43 }
  0x3a   : > { %v1395_v50 = vadd.f32 %v2620_v37, %v1262_v45  ;;  %v2267_v21 = vsel %vm870_vm4, 1.0, %v3575_v4  ;;  %v2698_v16 = vmul.f32 %v2501_v6, %v2459_v42  ;;  %v1706_v29 = vmul.f32 %v2266_v41, %v1064_v34 }
  0x3b   : > { %v1094_v9 = vmul.f32 %v2267_v21, %v2565_v47  ;;  %v1431_v53 = vmul.f32 %v2267_v21, %v1064_v34  ;;  %v2701_v54 = vadd.f32 %v1948_v23, %v1847_v0  ;;  %v521_v40 = vand.u32 15, %v2583_v61 }
  0x3c   : > { %v1498_v20 = vadd.f32 %v1466_v39, %v1395_v50  ;;  %v1365_v37 = vmul.f32 %v2513_v13, %v2609_v22  ;;  %v1539_v30 = vmul.f32 %v2542_v27, %v2459_v42  ;;  %v1640_v43 = vmul.f32 %v2563_v44, %v2609_v22 }
  0x3d   : > { %v1131_v1 = vmul.f32 %v2490_v59, %v1094_v9  ;;  %2012 = vst [vmem:[%s2642_s7 + $0x18] sm:$0xff] %v2701_v54  ;;  %v1814_v41 = vmul.f32 %v2580_v57, %v2459_v42  ;;  %v1947_v61 = vmul.f32 %v2614_v28, %v1878_v32  ;;  %vm967_vm5 = vcmp.lt.s32.totalorder %v521_v40, 15  ;;  %v2736_v9 = vld [vmem:[#allocation2 + $0x42] sm:$0xff] }
  0x3e   : > { %v1569_v47 = vadd.f32 %v2624_v38, %v1498_v20  ;;  %v1468_v23 = vmul.f32 %v2553_v31, %v1431_v53  ;;  %v1708_v22 = vmul.f32 %v2267_v21, %v2717_v25  ;;  %v2283_v39 = vsel %vm967_vm5, 1.0, %v3575_v4 }
  0x3f   : > { %v1264_v36 = vadd.f32 %v2595_v11, %v1131_v1  ;;  %v1743_v48 = vmul.f32 %v2600_v12, %v1706_v29  ;;  %v2726_v38 = vmul.f32 %v2501_v6, %v2468_v46  ;;  %v1329_v42 = vmul.f32 %v2283_v39, %v2629_v35 }
  0x40   : > { %v1672_v33 = vadd.f32 %v1640_v43, %v1569_v47  ;;  %v1367_v55 = vmul.f32 %v2513_v13, %v1878_v32  ;;  %v2732_v11 = vmul.f32 %v2542_v27, %v2468_v46  ;;  %v1606_v0 = vmul.f32 %v2283_v39, %v2659_v58  ;;  %v2747_v47 = vld [vmem:[#allocation2 + $0x4a] sm:$0xff] }
  0x41   : > { %v1397_v45 = vadd.f32 %v1365_v37, %v1264_v36  ;;  %v1642_v21 = vmul.f32 %v2563_v44, %v1878_v32  ;;  %v1366_v53 = vmul.f32 %v2513_v13, %v1329_v42  ;;  %v528_v20 = vand.u32 15, %v2586_v62  ;;  %v288_v36 = vld [vmem:[%s2406_s28 + $0x98] sm:$0xff] }
  0x42   : > { %v1775_v50 = vadd.f32 %v1743_v48, %v1672_v33  ;;  %v1745_v29 = vmul.f32 %v2600_v12, %v1708_v22  ;;  %v1816_v40 = vmul.f32 %v2580_v57, %v2468_v46  ;;  %v1949_v37 = vmul.f32 %v2614_v28, %v2736_v9  ;;  %v1067_v48 = vld [vmem:[#allocation2 + $0x48] sm:$0xff] }
  0x43   : > { %v1500_v35 = vadd.f32 %v1468_v23, %v1397_v45  ;;  %v2082_v43 = vmul.f32 %v2701_v54, %v2701_v54  ;;  %v1398_v32 = vadd.f32 %v1366_v53, %v1265_v49  ;;  %vm872_vm6 = vcmp.ge.s32.totalorder %v528_v20, 1 }
  0x44   : > { %v1846_v1 = vadd.f32 %v1814_v41, %v1775_v50  ;;  %v1643_v23 = vmul.f32 %v2563_v44, %v1606_v0  ;;  %v1913_v22 = vmul.f32 %v2283_v39, %v2747_v47  ;;  %v2268_v46 = vsel %vm872_vm6, 1.0, %v3575_v4 }
  0x45   : > { %v1571_v62 = vadd.f32 %v1539_v30, %v1500_v35  ;;  %v1501_v42 = vadd.f32 %v1469_v63, %v1398_v32  ;;  %v1096_v45 = vmul.f32 %v2268_v46, %v1064_v34  ;;  %v1433_v41 = vmul.f32 %v2268_v46, %v2717_v25  ;;  %v289_v35 = vld [vmem:[%s2406_s28 + $0xa0] sm:$0xff] }
  0x46   : > { %v1979_v33 = vadd.f32 %v1947_v61, %v1846_v1  ;;  %v1746_v50 = vmul.f32 %v2600_v12, %v1067_v48  ;;  %v1817_v53 = vmul.f32 %v2580_v57, %v2477_v51  ;;  %v327_v30 = vmul.f32 %v2398_v3, %v288_v36 }
  0x47   : > { %v1674_v49 = vadd.f32 %v1642_v21, %v1571_v62  ;;  %v1572_v20 = vadd.f32 %v1540_v26, %v1501_v42  ;;  %v1133_v61 = vmul.f32 %v2490_v59, %v1096_v45  ;;  %v1950_v34 = vmul.f32 %v2614_v28, %v1913_v22 }
  0x48   : > { %2011 = vst [vmem:[%s2642_s7 + $0x10] sm:$0xff] %v1979_v33  ;;  %v2042_v39 = vadd.f32 %v2684_v56, %v1979_v33  ;;  %v2081_v0 = vmul.f32 %v1979_v33, %v1979_v33  ;;  %v1470_v21 = vmul.f32 %v2553_v31, %v1433_v41  ;;  %v366_v1 = vadd.f32 %v2411_v5, %v327_v30  ;;  %v2768_v33 = vld [vmem:[#allocation2 + $0x50] sm:$0xff] }
  0x49   : > { %v1777_v63 = vadd.f32 %v1745_v29, %v1674_v49  ;;  %v1675_v36 = vadd.f32 %v1643_v23, %v1572_v20  ;;  %v1266_v52 = vadd.f32 %v2698_v16, %v1133_v61  ;;  %v328_v29 = vmul.f32 %v2398_v3, %v289_v35 }
  0x4a   : > { %v2043_v32 = vadd.f32 %v2042_v39, %v2701_v54  ;;  %v2112_v62 = vadd.f32 %v2690_v60, %v2081_v0  ;;  %v2770_v26 = vmax.f32 %v366_v1, 0.0  ;;  %v457_v22 = vadd.s32 56, %v2392_v2 }
  0x4b   : > { %v1848_v56 = vadd.f32 %v1816_v40, %v1777_v63  ;;  %v1778_v45 = vadd.f32 %v1746_v50, %v1675_v36  ;;  %v1399_v41 = vadd.f32 %v1367_v55, %v1266_v52  ;;  %v1710_v54 = vmul.f32 %v2268_v46, %v2768_v33  ;;  %v1069_v36 = vld [vmem:[#allocation2 + $0x58] sm:$0xff] }
  0x4c   : > { %v2113_v42 = vadd.f32 %v2112_v62, %v2082_v43  ;;  %v1136_v60 = vmul.f32 %v2490_v59, %v1067_v48  ;;  %436 = vst [vmem:[#allocation2 + $0xa9] sm:$0xff] %v2770_v26  ;;  %v367_v16 = vadd.f32 %v2411_v5, %v328_v29  ;;  %v535_v40 = vand.u32 15, %v457_v22  ;;  %v2799_v62 = vld [vmem:[#allocation2 + $0x52] sm:$0xff] }
  0x4d   : > { %v1981_v49 = vadd.f32 %v1949_v37, %v1848_v56  ;;  %v1237_v23 = vmul.f32 %v2501_v6, %v2477_v51  ;;  %v1849_v30 = vadd.f32 %v1817_v53, %v1778_v45  ;;  %v1502_v39 = vadd.f32 %v1470_v21, %v1399_v41  ;;  %v290_v41 = vld [vmem:[%s2406_s28 + $0xa8] sm:$0xff] }
  0x4e   : > { %v1644_v43 = vmul.f32 %v2563_v44, %v2736_v9  ;;  %v2783_v37 = vmax.f32 %v367_v16, 0.0  ;;  %vm969_vm7 = vcmp.lt.s32.totalorder %v535_v40, 15  ;;  %v1747_v0 = vmul.f32 %v2600_v12, %v1710_v54  ;;  %v291_v54 = vld [vmem:[%s2406_s28 + $0xb0] sm:$0xff] }
  0x4f   : > { %2013 = vst [vmem:[%s2642_s7 + $0x20] sm:$0xff] %v1981_v49  ;;  %v2044_v52 = vadd.f32 %v2043_v32, %v1981_v49  ;;  %v2083_v55 = vmul.f32 %v1981_v49, %v1981_v49  ;;  %v1982_v46 = vadd.f32 %v1950_v34, %v1849_v30  ;;  %v1573_v50 = vadd.f32 %v2732_v11, %v1502_v39 }
  0x50   : > { %v2284_v20 = vsel %vm969_vm7, 1.0, %v3575_v4  ;;  %v1471_v53 = vmul.f32 %v2553_v31, %v1067_v48  ;;  %v1818_v35 = vmul.f32 %v2580_v57, %v2503_v7  ;;  %437 = vst [vmem:[#allocation2 + $0xb1] sm:$0xff] %v2783_v37  ;;  %v2795_v32 = vadd.f32 %v1237_v23, %v1136_v60 }
  0x51   : > { %v2114_v61 = vadd.f32 %v2113_v42, %v2083_v55  ;;  %v1331_v63 = vmul.f32 %v2284_v20, %v2659_v58  ;;  %2014 = vst [vmem:[%s2642_s7 + $0x28] sm:$0xff] %v1982_v46  ;;  %v2045_v34 = vadd.f32 %v2044_v52, %v1982_v46  ;;  %v2084_v21 = vmul.f32 %v1982_v46, %v1982_v46 }
  0x52   : > { %v1676_v11 = vadd.f32 %v1644_v43, %v1573_v50  ;;  %v1608_v1 = vmul.f32 %v2284_v20, %v2747_v47  ;;  %v1542_v48 = vmul.f32 %v2542_v27, %v2477_v51  ;;  %v458_v58 = vadd.s32 64, %v2392_v2 }
  0x53   : > { %v1368_v56 = vmul.f32 %v2513_v13, %v1331_v63  ;;  %v2115_v29 = vadd.f32 %v2114_v61, %v2084_v21  ;;  %v2805_v22 = vmul.f32 %v2501_v6, %v2503_v7  ;;  %v1951_v45 = vmul.f32 %v2614_v28, %v2799_v62 }
  0x54   : > { %v1779_v42 = vadd.f32 %v1747_v0, %v1676_v11  ;;  %v1369_v51 = vmul.f32 %v2513_v13, %v2736_v9  ;;  %v2815_v49 = vmul.f32 %v2542_v27, %v2503_v7  ;;  %v542_v16 = vand.u32 15, %v458_v58 }
  0x55   : > { %v1400_v60 = vadd.f32 %v1368_v56, %v2687_v18  ;;  %v1138_v23 = vmul.f32 %v2490_v59, %v1069_v36  ;;  %v1239_v30 = vmul.f32 %v2501_v6, %v2505_v8  ;;  %v1645_v39 = vmul.f32 %v2563_v44, %v1608_v1  ;;  %v2825_v18 = vld [vmem:[#allocation2 + $0x5a] sm:$0xff] }
  0x56   : > { %v1850_v40 = vadd.f32 %v1818_v35, %v1779_v42  ;;  %vm874_vm8 = vcmp.ge.s32.totalorder %v542_v16, 1  ;;  %v329_v9 = vmul.f32 %v2398_v3, %v290_v41  ;;  %v330_v52 = vmul.f32 %v2398_v3, %v291_v54 }
  0x57   : > { %v1503_v43 = vadd.f32 %v1471_v53, %v1400_v60  ;;  %v1748_v55 = vmul.f32 %v2600_v12, %v1069_v36  ;;  %v2269_v46 = vsel %vm874_vm8, 1.0, %v3575_v4  ;;  %v459_v50 = vadd.s32 72, %v2392_v2 }
  0x58   : > { %v1983_v7 = vadd.f32 %v1951_v45, %v1850_v40  ;;  %v1915_v61 = vmul.f32 %v2284_v20, %v2825_v18  ;;  %v1098_v35 = vmul.f32 %v2269_v46, %v2717_v25  ;;  %v1435_v53 = vmul.f32 %v2269_v46, %v2768_v33 }
  0x59   : > { %v1574_v0 = vadd.f32 %v1542_v48, %v1503_v43  ;;  %v368_v11 = vadd.f32 %v2411_v5, %v329_v9  ;;  %v369_v1 = vadd.f32 %v2411_v5, %v330_v52  ;;  %v1473_v56 = vmul.f32 %v2553_v31, %v1069_v36 }
  0x5a   : > { %2015 = vst [vmem:[%s2642_s7 + $0x30] sm:$0xff] %v1983_v7  ;;  %v2046_v63 = vadd.f32 %v2045_v34, %v1983_v7  ;;  %v2085_v21 = vmul.f32 %v1983_v7, %v1983_v7  ;;  %v1819_v42 = vmul.f32 %v2580_v57, %v2505_v8  ;;  %v1135_v48 = vmul.f32 %v2490_v59, %v1098_v35 }
  0x5b   : > { %v1677_v58 = vadd.f32 %v1645_v39, %v1574_v0  ;;  %v2839_v45 = vmax.f32 %v368_v11, 0.0  ;;  %v2841_v25 = vmax.f32 %v369_v1, 0.0  ;;  %v549_v41 = vand.u32 15, %v459_v50  ;;  %v2850_v39 = vld [vmem:[#allocation2 + $0x60] sm:$0xff] }
  0x5c   : > { %v2116_v20 = vadd.f32 %v2115_v29, %v2085_v21  ;;  %v1952_v54 = vmul.f32 %v2614_v28, %v1915_v61  ;;  %v1268_v60 = vadd.f32 %v2726_v38, %v1135_v48  ;;  %v1472_v16 = vmul.f32 %v2553_v31, %v1435_v53  ;;  %v2872_v0 = vld [vmem:[#allocation2 + $0x62] sm:$0xff] }
  0x5d   : > { %v1780_v34 = vadd.f32 %v1748_v55, %v1677_v58  ;;  %v2846_v36 = vadd.f32 %v1239_v30, %v1138_v23  ;;  %v1544_v40 = vmul.f32 %v2542_v27, %v2505_v8  ;;  %v2854_v29 = vmul.f32 %v2501_v6, %v2507_v10  ;;  %438 = vst [vmem:[#allocation2 + $0xb9] sm:$0xff] %v2839_v45  ;;  %v1071_v61 = vld [vmem:[#allocation2 + $0x68] sm:$0xff] }
  0x5e   : > { %439 = vst [vmem:[#allocation2 + $0xc1] sm:$0xff] %v2841_v25  ;;  %vm971_vm9 = vcmp.lt.s32.totalorder %v549_v41, 15  ;;  %v1401_v38 = vadd.f32 %v1369_v51, %v1268_v60  ;;  %v1712_v9 = vmul.f32 %v2269_v46, %v2850_v39  ;;  %v1371_v8 = vmul.f32 %v2513_v13, %v2799_v62  ;;  %v2885_v41 = vld [vmem:[#allocation2 + $0x6a] sm:$0xff] }
  0x5f   : > { %v1851_v43 = vadd.f32 %v1819_v42, %v1780_v34  ;;  %v2285_v23 = vsel %vm971_vm9, 1.0, %v3575_v4  ;;  %v2864_v30 = vmul.f32 %v2542_v27, %v2507_v10  ;;  %v460_v7 = vadd.s32 80, %v2392_v2  ;;  %v292_v34 = vld [vmem:[%s2406_s28 + $0xb8] sm:$0xff] }
  0x60   : > { %v1333_v52 = vmul.f32 %v2285_v23, %v2747_v47  ;;  %v1504_v50 = vadd.f32 %v1472_v16, %v1401_v38  ;;  %v1646_v51 = vmul.f32 %v2563_v44, %v2799_v62  ;;  %v1820_v46 = vmul.f32 %v2580_v57, %v2507_v10 }
  0x61   : > { %v1984_v55 = vadd.f32 %v1952_v54, %v1851_v43  ;;  %v1953_v35 = vmul.f32 %v2614_v28, %v2872_v0  ;;  %v1610_v53 = vmul.f32 %v2285_v23, %v2825_v18  ;;  %v556_v21 = vand.u32 15, %v460_v7  ;;  %v293_v54 = vld [vmem:[%s2406_s28 + $0xc0] sm:$0xff] }
  0x62   : > { %v1370_v47 = vmul.f32 %v2513_v13, %v1333_v52  ;;  %v1575_v62 = vadd.f32 %v2815_v49, %v1504_v50  ;;  %v1749_v10 = vmul.f32 %v2600_v12, %v1712_v9  ;;  %v1140_v58 = vmul.f32 %v2490_v59, %v1071_v61 }
  0x63   : > { %2016 = vst [vmem:[%s2642_s7 + $0x38] sm:$0xff] %v1984_v55  ;;  %v2047_v11 = vadd.f32 %v2046_v63, %v1984_v55  ;;  %v2086_v1 = vmul.f32 %v1984_v55, %v1984_v55  ;;  %v1241_v42 = vmul.f32 %v2501_v6, %v2515_v14  ;;  %vm876_vm10 = vcmp.ge.s32.totalorder %v556_v21, 1 }
  0x64   : > { %v1402_v48 = vadd.f32 %v1370_v47, %v2795_v32  ;;  %v1678_v16 = vadd.f32 %v1646_v51, %v1575_v62  ;;  %v1917_v63 = vmul.f32 %v2285_v23, %v2885_v41  ;;  %v2270_v49 = vsel %vm876_vm10, 1.0, %v3575_v4 }
  0x65   : > { %v2117_v60 = vadd.f32 %v2116_v20, %v2086_v1  ;;  %v1647_v38 = vmul.f32 %v2563_v44, %v1610_v53  ;;  %v1100_v9 = vmul.f32 %v2270_v49, %v2768_v33  ;;  %v1437_v52 = vmul.f32 %v2270_v49, %v2850_v39 }
  0x66   : > { %v1505_v43 = vadd.f32 %v1473_v56, %v1402_v48  ;;  %v1781_v7 = vadd.f32 %v1749_v10, %v1678_v16  ;;  %v331_v32 = vmul.f32 %v2398_v3, %v292_v34  ;;  %v332_v55 = vmul.f32 %v2398_v3, %v293_v54  ;;  %v2906_v34 = vld [vmem:[#allocation2 + $0x70] sm:$0xff] }
  0x67   : > { %v461_v50 = vadd.s32 88, %v2392_v2  ;;  %v1750_v51 = vmul.f32 %v2600_v12, %v1071_v61  ;;  %v1821_v23 = vmul.f32 %v2580_v57, %v2515_v14  ;;  %v1137_v56 = vmul.f32 %v2490_v59, %v1100_v9 }
  0x68   : > { %v1576_v20 = vadd.f32 %v1544_v40, %v1505_v43  ;;  %v1852_v47 = vadd.f32 %v1820_v46, %v1781_v7  ;;  %v370_v33 = vadd.f32 %v2411_v5, %v331_v32  ;;  %v371_v53 = vadd.f32 %v2411_v5, %v332_v55 }
  0x69   : > { %v563_v21 = vand.u32 15, %v461_v50  ;;  %v1954_v62 = vmul.f32 %v2614_v28, %v1917_v63  ;;  %v1270_v10 = vadd.f32 %v2805_v22, %v1137_v56  ;;  %v1474_v40 = vmul.f32 %v2553_v31, %v1437_v52 }
  0x6a   : > { %v1679_v1 = vadd.f32 %v1647_v38, %v1576_v20  ;;  %v1985_v48 = vadd.f32 %v1953_v35, %v1852_v47  ;;  %v2908_v54 = vmax.f32 %v370_v33, 0.0  ;;  %v2910_v16 = vmax.f32 %v371_v53, 0.0 }
  0x6b   : > { %vm973_vm11 = vcmp.lt.s32.totalorder %v563_v21, 15  ;;  %v1403_v43 = vadd.f32 %v1371_v8, %v1270_v10  ;;  %v1714_v9 = vmul.f32 %v2270_v49, %v2906_v34  ;;  %v1475_v22 = vmul.f32 %v2553_v31, %v1071_v61  ;;  %v294_v21 = vld [vmem:[%s2406_s28 + $0xc8] sm:$0xff] }
  0x6c   : > { %v1782_v46 = vadd.f32 %v1750_v51, %v1679_v1  ;;  %v2286_v38 = vsel %vm973_vm11, 1.0, %v3575_v4  ;;  %2017 = vst [vmem:[%s2642_s7 + $0x40] sm:$0xff] %v1985_v48  ;;  %v2048_v63 = vadd.f32 %v2047_v11, %v1985_v48  ;;  %v2087_v7 = vmul.f32 %v1985_v48, %v1985_v48  ;;  %440 = vst [vmem:[#allocation2 + $0xc9] sm:$0xff] %v2908_v54  ;;  %v1073_v51 = vld [vmem:[#allocation2 + $0x78] sm:$0xff]  ;;  %v295_v1 = vld [vmem:[%s2406_s28 + $0xd0] sm:$0xff] }
  0x6d   : > { %441 = vst [vmem:[#allocation2 + $0xd1] sm:$0xff] %v2910_v16  ;;  %v1335_v35 = vmul.f32 %v2286_v38, %v2825_v18  ;;  %v1546_v52 = vmul.f32 %v2542_v27, %v2515_v14  ;;  %v1506_v8 = vadd.f32 %v1474_v40, %v1403_v43  ;;  %v1648_v4 = vmul.f32 %v2563_v44, %v2872_v0  ;;  %v2948_v40 = vld [vmem:[#allocation2 + $0x7a] sm:$0xff] }
  0x6e   : > { %v1853_v32 = vadd.f32 %v1821_v23, %v1782_v46  ;;  %v2118_v49 = vadd.f32 %v2117_v60, %v2087_v7  ;;  %v2923_v11 = vadd.f32 %v1241_v42, %v1140_v58  ;;  %v1612_v55 = vmul.f32 %v2286_v38, %v2885_v41  ;;  %v2937_v60 = vld [vmem:[#allocation2 + $0x72] sm:$0xff] }
  0x6f   : > { %v1372_v61 = vmul.f32 %v2513_v13, %v1335_v35  ;;  %v2929_v18 = vmul.f32 %v2501_v6, %v2517_v15  ;;  %v1577_v14 = vadd.f32 %v2864_v30, %v1506_v8  ;;  %v1751_v20 = vmul.f32 %v2600_v12, %v1714_v9  ;;  %v2956_v8 = vld [vmem:[#allocation2] sm:$0xff] }
  0x70   : > { %v1986_v50 = vadd.f32 %v1954_v62, %v1853_v32  ;;  %v1373_v58 = vmul.f32 %v2513_v13, %v2872_v0  ;;  %v1822_v42 = vmul.f32 %v2580_v57, %v2517_v15  ;;  %v462_v56 = vadd.s32 96, %v2392_v2 }
  0x71   : > { %v1404_v23 = vadd.f32 %v1372_v61, %v2846_v36  ;;  %v1680_v53 = vadd.f32 %v1648_v4, %v1577_v14  ;;  %v1955_v30 = vmul.f32 %v2614_v28, %v2937_v60  ;;  %v1142_v0 = vmul.f32 %v2490_v59, %v1073_v51 }
  0x72   : > { %2018 = vst [vmem:[%s2642_s7 + $0x48] sm:$0xff] %v1986_v50  ;;  %v2049_v47 = vadd.f32 %v2048_v63, %v1986_v50  ;;  %v2088_v33 = vmul.f32 %v1986_v50, %v1986_v50  ;;  %v1649_v10 = vmul.f32 %v2563_v44, %v1612_v55  ;;  %v570_v48 = vand.u32 15, %v462_v56 }
  0x73   : > { %v1507_v62 = vadd.f32 %v1475_v22, %v1404_v23  ;;  %v1783_v46 = vadd.f32 %v1751_v20, %v1680_v53  ;;  %v1752_v43 = vmul.f32 %v2600_v12, %v1073_v51  ;;  %v1919_v9 = vmul.f32 %v2286_v38, %v2948_v40 }
  0x74   : > { %v2119_v36 = vadd.f32 %v2118_v49, %v2088_v33  ;;  %vm878_vm12 = vcmp.ge.s32.totalorder %v570_v48, 1  ;;  %v333_v7 = vmul.f32 %v2398_v3, %v294_v21  ;;  %v334_v35 = vmul.f32 %v2398_v3, %v295_v1 }
  0x75   : > { %v1578_v63 = vadd.f32 %v1546_v52, %v1507_v62  ;;  %v1854_v32 = vadd.f32 %v1822_v42, %v1783_v46  ;;  %v1243_v22 = vmul.f32 %v2501_v6, %v2519_v17  ;;  %v2271_v4 = vsel %vm878_vm12, 1.0, %v2956_v8  ;;  %v2980_v46 = vld [vmem:[#allocation2 + $0x80] sm:$0xff] }
  0x76   : > { %v463_v49 = vadd.s32 104, %v2392_v2  ;;  %v1823_v38 = vmul.f32 %v2580_v57, %v2519_v17  ;;  %v1102_v52 = vmul.f32 %v2271_v4, %v2850_v39  ;;  %v1439_v55 = vmul.f32 %v2271_v4, %v2906_v34 }
  0x77   : > { %v1681_v61 = vadd.f32 %v1649_v10, %v1578_v63  ;;  %v1987_v3 = vadd.f32 %v1955_v30, %v1854_v32  ;;  %v372_v50 = vadd.f32 %v2411_v5, %v333_v7  ;;  %v373_v14 = vadd.f32 %v2411_v5, %v334_v35 }
  0x78   : > { %v577_v20 = vand.u32 15, %v463_v49  ;;  %v1547_v42 = vmul.f32 %v2542_v27, %v2517_v15  ;;  %v1956_v56 = vmul.f32 %v2614_v28, %v1919_v9  ;;  %v1139_v33 = vmul.f32 %v2490_v59, %v1102_v52  ;;  %v296_v52 = vld [vmem:[%s2406_s28 + $0xd8] sm:$0xff] }
  0x79   : > { %v1784_v23 = vadd.f32 %v1752_v43, %v1681_v61  ;;  %2019 = vst [vmem:[%s2642_s7 + $0x50] sm:$0xff] %v1987_v3  ;;  %v2050_v53 = vadd.f32 %v2049_v47, %v1987_v3  ;;  %v2089_v21 = vmul.f32 %v1987_v3, %v1987_v3  ;;  %v2971_v39 = vmax.f32 %v372_v50, 0.0 }
  0x7a   : > { %v2973_v1 = vmax.f32 %v373_v14, 0.0  ;;  %v1272_v62 = vadd.f32 %v2854_v29, %v1139_v33  ;;  %v1476_v5 = vmul.f32 %v2553_v31, %v1439_v55  ;;  %vm975_vm13 = vcmp.lt.s32.totalorder %v577_v20, 15  ;;  %v297_v20 = vld [vmem:[%s2406_s28 + $0xe0] sm:$0xff] }
  0x7b   : > { %v1855_v30 = vadd.f32 %v1823_v38, %v1784_v23  ;;  %v2120_v15 = vadd.f32 %v2119_v36, %v2089_v21  ;;  %v2977_v10 = vadd.f32 %v1243_v22, %v1142_v0  ;;  %v1477_v48 = vmul.f32 %v2553_v31, %v1073_v51  ;;  %442 = vst [vmem:[#allocation2 + $0xd9] sm:$0xff] %v2971_v39  ;;  %v2997_v22 = vld [vmem:[#allocation2 + $0x82] sm:$0xff] }
  0x7c   : > { %443 = vst [vmem:[#allocation2 + $0xe1] sm:$0xff] %v2973_v1  ;;  %v2287_v47 = vsel %vm975_vm13, 1.0, %v2956_v8  ;;  %v1405_v9 = vadd.f32 %v1373_v58, %v1272_v62  ;;  %v1716_v29 = vmul.f32 %v2271_v4, %v2980_v46  ;;  %v1548_v0 = vmul.f32 %v2542_v27, %v2519_v17 }
  0x7d   : > { %v1988_v43 = vadd.f32 %v1956_v56, %v1855_v30  ;;  %v1337_v63 = vmul.f32 %v2287_v47, %v2885_v41  ;;  %v2991_v51 = vmul.f32 %v2501_v6, %v2525_v19  ;;  %v1650_v36 = vmul.f32 %v2563_v44, %v2937_v60  ;;  %v1075_v41 = vld [vmem:[#allocation2 + $0x88] sm:$0xff] }
  0x7e   : > { %v1614_v7 = vmul.f32 %v2287_v47, %v2948_v40  ;;  %v1508_v32 = vadd.f32 %v1476_v5, %v1405_v9  ;;  %v1375_v17 = vmul.f32 %v2513_v13, %v2937_v60  ;;  %v1824_v49 = vmul.f32 %v2580_v57, %v2525_v19  ;;  %v3016_v30 = vld [vmem:[#allocation2 + $0x8a] sm:$0xff] }
  0x7f   : > { %2020 = vst [vmem:[%s2642_s7 + $0x58] sm:$0xff] %v1988_v43  ;;  %v2051_v58 = vadd.f32 %v2050_v53, %v1988_v43  ;;  %v2090_v35 = vmul.f32 %v1988_v43, %v1988_v43  ;;  %v1374_v4 = vmul.f32 %v2513_v13, %v1337_v63  ;;  %v1957_v61 = vmul.f32 %v2614_v28, %v2997_v22  ;;  %v3031_v43 = vld [vmem:[%s3563_s2] ss:$0 sm:$0xff] }
  0x80   : > { %v464_v38 = vadd.s32 112, %v2392_v2  ;;  %v1579_v3 = vadd.f32 %v1547_v42, %v1508_v32  ;;  %v1753_v50 = vmul.f32 %v2600_v12, %v1716_v29  ;;  %v1144_v23 = vmul.f32 %v2490_v59, %v1075_v41  ;;  %v3021_v42 = vld [vmem:[%s3562_s1] ss:$0 sm:$0xff] }
  0x81   : > { %v2121_v55 = vadd.f32 %v2120_v15, %v2090_v35  ;;  %v1406_v14 = vadd.f32 %v1374_v4, %v2923_v11  ;;  %v1245_v13 = vmul.f32 %v2501_v6, %v2534_v24  ;;  %v1754_v60 = vmul.f32 %v2600_v12, %v1075_v41 }
  0x82   : > { %v584_v56 = vand.u32 15, %v464_v38  ;;  %v1682_v33 = vadd.f32 %v1650_v36, %v1579_v3  ;;  %v1651_v21 = vmul.f32 %v2563_v44, %v1614_v7  ;;  %v335_v11 = vmul.f32 %v3021_v42, %v296_v52  ;;  %v3047_v52 = vld [vmem:[%s3564_s3] ss:$0 sm:$0xff] }
  0x83   : > { %v1509_v53 = vadd.f32 %v1477_v48, %v1406_v14  ;;  %v1921_v59 = vmul.f32 %v2287_v47, %v3016_v30  ;;  %v336_v6 = vmul.f32 %v3021_v42, %v297_v20  ;;  %v465_v62 = vadd.s32 120, %v2392_v2  ;;  %v1209_v20 = vld [vmem:[#allocation2 + $0x91] sm:$0xff] }
  0x84   : > { %vm880_vm14 = vcmp.ge.s32.totalorder %v584_v56, 1  ;;  %v1785_v5 = vadd.f32 %v1753_v50, %v1682_v33  ;;  %v374_v9 = vadd.f32 %v3031_v43, %v335_v11  ;;  %v1825_v29 = vmul.f32 %v2580_v57, %v2534_v24  ;;  %v3063_v11 = vld [vmem:[#allocation2 + $0x90] sm:$0xff] }
  0x85   : > { %v1580_v15 = vadd.f32 %v1548_v0, %v1509_v53  ;;  %v2272_v48 = vsel %vm880_vm14, 1.0, %v2956_v8  ;;  %v375_v36 = vadd.f32 %v3031_v43, %v336_v6  ;;  %v591_v32 = vand.u32 15, %v465_v62 }
  0x86   : > { %v1104_v47 = vmul.f32 %v2272_v48, %v2906_v34  ;;  %v1441_v63 = vmul.f32 %v2272_v48, %v2980_v46  ;;  %v1856_v7 = vadd.f32 %v1824_v49, %v1785_v5  ;;  %v3039_v35 = vmax.f32 %v374_v9, 0.0 }
  0x87   : > { %v1683_v0 = vadd.f32 %v1651_v21, %v1580_v15  ;;  %v1549_v4 = vmul.f32 %v2542_v27, %v2525_v19  ;;  %v1479_v38 = vmul.f32 %v2553_v31, %v1075_v41  ;;  %v3050_v3 = vmax.f32 %v375_v36, 0.0  ;;  %v1890_v36 = vld [vmem:[#allocation2 + $0x92] sm:$0xff] }
  0x88   : > { %v1141_v34 = vmul.f32 %v3047_v52, %v1104_v47  ;;  %v1989_v49 = vadd.f32 %v1957_v61, %v1856_v7  ;;  %v1958_v14 = vmul.f32 %v2614_v28, %v1921_v59  ;;  %444 = vst [vmem:[#allocation2 + $0xe9] sm:$0xff] %v3039_v35  ;;  %vm977_vm15 = vcmp.lt.s32.totalorder %v591_v32, 15 }
  0x89   : > { %v1786_v50 = vadd.f32 %v1754_v60, %v1683_v0  ;;  %v1550_v19 = vmul.f32 %v2542_v27, %v2534_v24  ;;  %v1478_v56 = vmul.f32 %v2553_v31, %v1441_v63  ;;  %445 = vst [vmem:[#allocation2 + $0xf1] sm:$0xff] %v3050_v3  ;;  %v2288_v33 = vsel %vm977_vm15, 1.0, %v2956_v8  ;;  %v3068_v24 = vld [vmem:[%s3564_s3 + $0x1] ss:$0 sm:$0xff] }
  0x8a   : > { %v1274_v41 = vadd.f32 %v2929_v18, %v1141_v34  ;;  %2021 = vst [vmem:[%s2642_s7 + $0x60] sm:$0xff] %v1989_v49  ;;  %v2052_v61 = vadd.f32 %v2051_v58, %v1989_v49  ;;  %v2091_v60 = vmul.f32 %v1989_v49, %v1989_v49  ;;  %v3061_v53 = vadd.f32 %v1245_v13, %v1144_v23  ;;  %v3078_v13 = vld [vmem:[%s3564_s3 + $0x2] ss:$0 sm:$0xff] }
  0x8b   : > { %v1857_v21 = vadd.f32 %v1825_v29, %v1786_v50  ;;  %v3071_v27 = vmul.f32 %v3068_v24, %v1209_v20  ;;  %v1718_v18 = vmul.f32 %v2272_v48, %v3063_v11  ;;  %v1339_v58 = vmul.f32 %v2288_v33, %v2948_v40  ;;  %v3093_v29 = vld [vmem:[%s3564_s3 + $0x4] ss:$0 sm:$0xff]  ;;  %v3577_v50 = vld [vmem:[#allocation3_spill] sm:$0xff] }
  0x8c   : > { %v1407_v31 = vadd.f32 %v1375_v17, %v1274_v41  ;;  %v2122_v59 = vadd.f32 %v2121_v55, %v2091_v60  ;;  %v3082_v6 = vmul.f32 %v3078_v13, %v2997_v22  ;;  %v1652_v62 = vmul.f32 %v2563_v44, %v2997_v22  ;;  %v1077_v17 = vld [vmem:[#allocation2 + $0x98] sm:$0xff] }
  0x8d   : > { %v1990_v23 = vadd.f32 %v1958_v14, %v1857_v21  ;;  %v1376_v15 = vmul.f32 %v3078_v13, %v1339_v58  ;;  %v1616_v40 = vmul.f32 %v2288_v33, %v3016_v30  ;;  %v466_v55 = vadd.s32 128, %v2392_v2 }
  0x8e   : > { %v1510_v5 = vadd.f32 %v1478_v56, %v1407_v31  ;;  %v3096_v47 = vmul.f32 %v3093_v29, %v1209_v20  ;;  %v1826_v44 = vmul.f32 %v2580_v57, %v1209_v20  ;;  %v1755_v63 = vmul.f32 %v2600_v12, %v1718_v18  ;;  %v3108_v57 = vld [vmem:[%s3564_s3 + $0x5] ss:$0 sm:$0xff]  ;;  %v3111_v20 = vld [vmem:[#allocation2 + $0x9a] sm:$0xff] }
  0x8f   : > { %2022 = vst [vmem:[%s2642_s7 + $0x68] sm:$0xff] %v1990_v23  ;;  %v2053_v48 = vadd.f32 %v2052_v61, %v1990_v23  ;;  %v2092_v9 = vmul.f32 %v1990_v23, %v1990_v23  ;;  %v1408_v7 = vadd.f32 %v1376_v15, %v2977_v10  ;;  %v598_v0 = vand.u32 15, %v466_v55  ;;  %v3124_v23 = vld [vmem:[%s3564_s3 + $0x3] ss:$0 sm:$0xff] }
  0x90   : > { %v1581_v22 = vadd.f32 %v1549_v4, %v1510_v5  ;;  %v1959_v34 = vmul.f32 %v2614_v28, %v1890_v36  ;;  %v1146_v49 = vmul.f32 %v3047_v52, %v1077_v17  ;;  %v1247_v14 = vmul.f32 %v3068_v24, %v3577_v50 }
  0x91   : > { %v2123_v32 = vadd.f32 %v2122_v59, %v2092_v9  ;;  %v1511_v56 = vadd.f32 %v1479_v38, %v1408_v7  ;;  %v1653_v4 = vmul.f32 %v3108_v57, %v1616_v40  ;;  %vm882_vm0 = vcmp.ge.s32.totalorder %v598_v0, 1  ;;  %v3143_v7 = vld [vmem:[#allocation2 + $0xa0] sm:$0xff] }
  0x92   : > { %v1684_v41 = vadd.f32 %v1652_v62, %v1581_v22  ;;  %v1756_v10 = vmul.f32 %v2600_v12, %v1077_v17  ;;  %v1923_v61 = vmul.f32 %v2288_v33, %v3111_v20  ;;  %v2273_v60 = vsel %vm882_vm0, 1.0, %v2956_v8 }
  0x93   : > { %v467_v21 = vadd.s32 136, %v2392_v2  ;;  %v1582_v38 = vadd.f32 %v1550_v19, %v1511_v56  ;;  %v1106_v18 = vmul.f32 %v2273_v60, %v2980_v46  ;;  %v1443_v58 = vmul.f32 %v2273_v60, %v3063_v11  ;;  %v3132_v46 = vld [vmem:[%s3564_s3 + $0x7] ss:$0 sm:$0xff] }
  0x94   : > { %v1787_v31 = vadd.f32 %v1755_v63, %v1684_v41  ;;  %v3119_v59 = vadd.f32 %v1247_v14, %v1146_v49  ;;  %v1481_v12 = vmul.f32 %v3124_v23, %v1077_v17  ;;  %v1552_v33 = vmul.f32 %v3093_v29, %v3577_v50  ;;  %v3578_v17 = vld [vmem:[#allocation4_spill] sm:$0xff] }
  0x95   : > { %v605_v62 = vand.u32 15, %v467_v21  ;;  %v1685_v15 = vadd.f32 %v1653_v4, %v1582_v38  ;;  %v1827_v19 = vmul.f32 %v3132_v46, %v3577_v50  ;;  %v1143_v40 = vmul.f32 %v3047_v52, %v1106_v18  ;;  %v3159_v21 = vld [vmem:[#allocation2 + $0xa2] sm:$0xff] }
  0x96   : > { %v1858_v5 = vadd.f32 %v1826_v44, %v1787_v31  ;;  %v1960_v55 = vmul.f32 %v2614_v28, %v1923_v61  ;;  %v3140_v9 = vmul.f32 %v3068_v24, %v3578_v17  ;;  %v1480_v44 = vmul.f32 %v3124_v23, %v1443_v58  ;;  %v3155_v61 = vld [vmem:[#allocation2 + $0xa8] sm:$0xff] }
  0x97   : > { %vm979_vm1 = vcmp.lt.s32.totalorder %v605_v62, 15  ;;  %v1788_v63 = vadd.f32 %v1756_v10, %v1685_v15  ;;  %v1276_v0 = vadd.f32 %v2991_v51, %v1143_v40  ;;  %v3148_v50 = vmul.f32 %v3078_v13, %v1890_v36  ;;  %v298_v15 = vld [vmem:[%s2406_s28 + $0xe8] sm:$0xff] }
  0x98   : > { %v1991_v22 = vadd.f32 %v1959_v34, %v1858_v5  ;;  %v2289_v49 = vsel %vm979_vm1, 1.0, %v2956_v8  ;;  %v1654_v28 = vmul.f32 %v3108_v57, %v1890_v36  ;;  %v1720_v14 = vmul.f32 %v2273_v60, %v3143_v7 }
  0x99   : > { %v1341_v41 = vmul.f32 %v2289_v49, %v3016_v30  ;;  %v1859_v34 = vadd.f32 %v1827_v19, %v1788_v63  ;;  %v1409_v10 = vadd.f32 %v3082_v6, %v1276_v0  ;;  %v1828_v51 = vmul.f32 %v3132_v46, %v3578_v17  ;;  %v3167_v6 = vld [vmem:[%s3564_s3 + $0x8] ss:$0 sm:$0xff] }
  0x9a   : > { %2023 = vst [vmem:[%s2642_s7 + $0x70] sm:$0xff] %v1991_v22  ;;  %v2054_v56 = vadd.f32 %v2053_v48, %v1991_v22  ;;  %v2093_v4 = vmul.f32 %v1991_v22, %v1991_v22  ;;  %v1618_v60 = vmul.f32 %v2289_v49, %v3111_v20  ;;  %v468_v30 = vadd.s32 144, %v2392_v2 }
  0x9b   : > { %v1378_v36 = vmul.f32 %v3078_v13, %v1341_v41  ;;  %v1992_v31 = vadd.f32 %v1960_v55, %v1859_v34  ;;  %v1512_v38 = vadd.f32 %v1480_v44, %v1409_v10  ;;  %v1961_v18 = vmul.f32 %v3167_v6, %v3159_v21  ;;  %v3182_v44 = vld [vmem:[%s3564_s3 + $0x6] ss:$0 sm:$0xff]  ;;  %v299_v41 = vld [vmem:[%s2406_s28 + $0xf0] sm:$0xff] }
  0x9c   : > { %v2124_v48 = vadd.f32 %v2123_v32, %v2093_v4  ;;  %v1148_v58 = vmul.f32 %v3047_v52, %v3155_v61  ;;  %v1249_v62 = vmul.f32 %v3068_v24, %v2770_v26  ;;  %v612_v32 = vand.u32 15, %v468_v30  ;;  %v3189_v34 = vld [vmem:[#allocation2 + $0xaa] sm:$0xff] }
  0x9d   : > { %v1410_v5 = vadd.f32 %v1378_v36, %v3061_v53  ;;  %2024 = vst [vmem:[%s2642_s7 + $0x78] sm:$0xff] %v1992_v31  ;;  %v2055_v19 = vadd.f32 %v2054_v56, %v1992_v31  ;;  %v2094_v40 = vmul.f32 %v1992_v31, %v1992_v31  ;;  %v1583_v55 = vadd.f32 %v3096_v47, %v1512_v38 }
  0x9e   : > { %v1757_v22 = vmul.f32 %v3182_v44, %v1720_v14  ;;  %v1655_v0 = vmul.f32 %v3108_v57, %v1618_v60  ;;  %v1758_v53 = vmul.f32 %v3182_v44, %v3155_v61  ;;  %vm884_vm2 = vcmp.ge.s32.totalorder %v612_v32, 1 }
  0x9f   : > { %v1513_v63 = vadd.f32 %v1481_v12, %v1410_v5  ;;  %v2125_v4 = vadd.f32 %v2124_v48, %v2094_v40  ;;  %v1686_v56 = vadd.f32 %v1654_v28, %v1583_v55  ;;  %v2274_v47 = vsel %vm884_vm2, 1.0, %v2956_v8 }
  0xa0   : > { %v337_v10 = vmul.f32 %v3021_v42, %v298_v15  ;;  %v1925_v30 = vmul.f32 %v2289_v49, %v3189_v34  ;;  %v1108_v12 = vmul.f32 %v2274_v47, %v3063_v11  ;;  %v1445_v14 = vmul.f32 %v2274_v47, %v3143_v7 }
  0xa1   : > { %v1584_v36 = vadd.f32 %v1552_v33, %v1513_v63  ;;  %v1789_v60 = vadd.f32 %v1757_v22, %v1686_v56  ;;  %v338_v38 = vmul.f32 %v3021_v42, %v299_v41  ;;  %v469_v28 = vadd.s32 152, %v2392_v2  ;;  %v3212_v56 = vld [vmem:[#allocation2 + $0xb0] sm:$0xff] }
  0xa2   : > { %v376_v31 = vadd.f32 %v3031_v43, %v337_v10  ;;  %v1553_v48 = vmul.f32 %v3093_v29, %v3578_v17  ;;  %v1829_v33 = vmul.f32 %v3132_v46, %v2770_v26  ;;  %v1145_v49 = vmul.f32 %v3047_v52, %v1108_v12 }
  0xa3   : > { %v1687_v5 = vadd.f32 %v1655_v0, %v1584_v36  ;;  %v1860_v32 = vadd.f32 %v1828_v51, %v1789_v60  ;;  %v377_v15 = vadd.f32 %v3031_v43, %v338_v38  ;;  %v619_v40 = vand.u32 15, %v469_v28 }
  0xa4   : > { %v3204_v11 = vmax.f32 %v376_v31, 0.0  ;;  %v1962_v22 = vmul.f32 %v3167_v6, %v1925_v30  ;;  %v1278_v63 = vadd.f32 %v3071_v27, %v1145_v49  ;;  %v1482_v17 = vmul.f32 %v3124_v23, %v1445_v14  ;;  %v1894_v49 = vld [vmem:[#allocation2 + $0xb2] sm:$0xff] }
  0xa5   : > { %v1790_v55 = vadd.f32 %v1758_v53, %v1687_v5  ;;  %v1993_v0 = vadd.f32 %v1961_v18, %v1860_v32  ;;  %v3210_v41 = vadd.f32 %v1249_v62, %v1148_v58  ;;  %v3215_v51 = vmax.f32 %v377_v15, 0.0  ;;  %v1081_v5 = vld [vmem:[#allocation2 + $0xb8] sm:$0xff] }
  0xa6   : > { %446 = vst [vmem:[#allocation2 + $0xf9] sm:$0xff] %v3204_v11  ;;  %vm981_vm3 = vcmp.lt.s32.totalorder %v619_v40, 15  ;;  %v1411_v36 = vadd.f32 %v3148_v50, %v1278_v63  ;;  %v1722_v53 = vmul.f32 %v2274_v47, %v3212_v56  ;;  %v1483_v58 = vmul.f32 %v3124_v23, %v3155_v61  ;;  %v300_v40 = vld [vmem:[%s2406_s28 + $0xf8] sm:$0xff] }
  0xa7   : > { %v1861_v10 = vadd.f32 %v1829_v33, %v1790_v55  ;;  %v2290_v27 = vsel %vm981_vm3, 1.0, %v2956_v8  ;;  %2025 = vst [vmem:[%s2642_s7 + $0x80] sm:$0xff] %v1993_v0  ;;  %v2056_v30 = vadd.f32 %v2055_v19, %v1993_v0  ;;  %v2095_v18 = vmul.f32 %v1993_v0, %v1993_v0  ;;  %447 = vst [vmem:[#allocation2 + $0x101] sm:$0xff] %v3215_v51 }
  0xa8   : > { %v1343_v62 = vmul.f32 %v2290_v27, %v3111_v20  ;;  %v1554_v12 = vmul.f32 %v3093_v29, %v2770_v26  ;;  %v1514_v50 = vadd.f32 %v1482_v17, %v1411_v36  ;;  %v1656_v47 = vmul.f32 %v3108_v57, %v3159_v21 }
  0xa9   : > { %v1994_v14 = vadd.f32 %v1962_v22, %v1861_v10  ;;  %v2126_v60 = vadd.f32 %v2125_v4, %v2095_v18  ;;  %v3231_v19 = vmul.f32 %v3068_v24, %v2783_v37  ;;  %v1620_v31 = vmul.f32 %v2290_v27, %v3189_v34 }
  0xaa   : > { %v1380_v61 = vmul.f32 %v3078_v13, %v1343_v62  ;;  %v1585_v26 = vadd.f32 %v1553_v48, %v1514_v50  ;;  %v1759_v28 = vmul.f32 %v3182_v44, %v1722_v53  ;;  %v1381_v33 = vmul.f32 %v3078_v13, %v3159_v21  ;;  %v3257_v53 = vld [vmem:[#allocation2 + $0xba] sm:$0xff] }
  0xab   : > { %2026 = vst [vmem:[%s2642_s7 + $0x88] sm:$0xff] %v1994_v14  ;;  %v3236_v20 = vadd.f32 %v2056_v30, %v1994_v14  ;;  %v2096_v38 = vmul.f32 %v1994_v14, %v1994_v14  ;;  %v3243_v4 = vmul.f32 %v3093_v29, %v2783_v37  ;;  %v470_v15 = vadd.s32 160, %v2392_v2 }
  0xac   : > { %v1412_v32 = vadd.f32 %v1380_v61, %v3119_v59  ;;  %v1688_v22 = vadd.f32 %v1656_v47, %v1585_v26  ;;  %v1830_v48 = vmul.f32 %v3132_v46, %v2783_v37  ;;  %v1963_v63 = vmul.f32 %v3167_v6, %v1894_v49 }
  0xad   : > { %v3248_v55 = vadd.f32 %v2126_v60, %v2096_v38  ;;  %v1150_v21 = vmul.f32 %v3047_v52, %v1081_v5  ;;  %v1657_v0 = vmul.f32 %v3108_v57, %v1620_v31  ;;  %v626_v10 = vand.u32 15, %v470_v15  ;;  %v1083_v38 = vld [vmem:[#allocation2 + $0xc8] sm:$0xff] }
  0xae   : > { %v1515_v17 = vadd.f32 %v1483_v58, %v1412_v32  ;;  %v1791_v36 = vadd.f32 %v1759_v28, %v1688_v22  ;;  %v1251_v59 = vmul.f32 %v3068_v24, %v2839_v45  ;;  %v339_v30 = vmul.f32 %v3021_v42, %v300_v40  ;;  %v3275_v40 = vld [vmem:[#allocation2 + $0xc0] sm:$0xff] }
  0xaf   : > { %v471_v18 = vadd.s32 168, %v2392_v2  ;;  %v1760_v37 = vmul.f32 %v3182_v44, %v1081_v5  ;;  %v1927_v14 = vmul.f32 %v2290_v27, %v3257_v53  ;;  %vm886_vm4 = vcmp.ge.s32.totalorder %v626_v10, 1 }
  0xb0   : > { %v1586_v62 = vadd.f32 %v1554_v12, %v1515_v17  ;;  %v1862_v58 = vadd.f32 %v1830_v48, %v1791_v36  ;;  %v2275_v50 = vsel %vm886_vm4, 1.0, %v2956_v8  ;;  %v378_v47 = vadd.f32 %v3031_v43, %v339_v30 }
  0xb1   : > { %v633_v60 = vand.u32 15, %v471_v18  ;;  %v1831_v31 = vmul.f32 %v3132_v46, %v2839_v45  ;;  %v1110_v42 = vmul.f32 %v2275_v50, %v3143_v7  ;;  %v1447_v12 = vmul.f32 %v2275_v50, %v3212_v56 }
  0xb2   : > { %v1689_v61 = vadd.f32 %v1657_v0, %v1586_v62  ;;  %v1995_v26 = vadd.f32 %v1963_v63, %v1862_v58  ;;  %v1485_v27 = vmul.f32 %v3124_v23, %v1081_v5  ;;  %v3270_v28 = vmax.f32 %v378_v47, 0.0 }
  0xb3   : > { %vm983_vm5 = vcmp.lt.s32.totalorder %v633_v60, 15  ;;  %v3272_v32 = vadd.f32 %v1251_v59, %v1150_v21  ;;  %v1964_v15 = vmul.f32 %v3167_v6, %v1927_v14  ;;  %v1147_v22 = vmul.f32 %v3047_v52, %v1110_v42 }
  0xb4   : > { %v1792_v43 = vadd.f32 %v1760_v37, %v1689_v61  ;;  %2027 = vst [vmem:[%s2642_s7 + $0x90] sm:$0xff] %v1995_v26  ;;  %v1724_v7 = vmul.f32 %v2275_v50, %v3275_v40  ;;  %448 = vst [vmem:[#allocation2 + $0x109] sm:$0xff] %v3270_v28  ;;  %v2291_v48 = vsel %vm983_vm5, 1.0, %v2956_v8  ;;  %v1152_v5 = vmul.f32 %v3047_v52, %v1083_v38  ;;  %v3299_v37 = vld [vmem:[#allocation2 + $0xc2] sm:$0xff] }
  0xb5   : > { %v1253_v63 = vmul.f32 %v3068_v24, %v2908_v54  ;;  %v1280_v17 = vadd.f32 %v3140_v9, %v1147_v22  ;;  %v1484_v0 = vmul.f32 %v3124_v23, %v1447_v12  ;;  %v1345_v10 = vmul.f32 %v2291_v48, %v3189_v34 }
  0xb6   : > { %v1863_v21 = vadd.f32 %v1831_v31, %v1792_v43  ;;  %v1556_v36 = vmul.f32 %v3093_v29, %v2839_v45  ;;  %v3292_v59 = vmul.f32 %v3068_v24, %v2841_v25  ;;  %v1383_v30 = vmul.f32 %v3078_v13, %v1894_v49 }
  0xb7   : > { %v3297_v18 = vmul.f32 %v3093_v29, %v2841_v25  ;;  %v1413_v9 = vadd.f32 %v1381_v33, %v1280_v17  ;;  %v1382_v14 = vmul.f32 %v3078_v13, %v1345_v10  ;;  %v1622_v34 = vmul.f32 %v2291_v48, %v3257_v53 }
  0xb8   : > { %v1996_v62 = vadd.f32 %v1964_v15, %v1863_v21  ;;  %v1658_v45 = vmul.f32 %v3108_v57, %v1894_v49  ;;  %v1832_v58 = vmul.f32 %v3132_v46, %v2841_v25  ;;  %v1965_v50 = vmul.f32 %v3167_v6, %v3299_v37 }
  0xb9   : > { %v472_v47 = vadd.s32 176, %v2392_v2  ;;  %v1516_v60 = vadd.f32 %v1484_v0, %v1413_v9  ;;  %v1761_v33 = vmul.f32 %v3182_v44, %v1724_v7  ;;  %v3311_v61 = vadd.f32 %v1253_v63, %v1152_v5 }
  0xba   : > { %2028 = vst [vmem:[%s2642_s7 + $0x98] sm:$0xff] %v1996_v62  ;;  %v1414_v31 = vadd.f32 %v1382_v14, %v3210_v41  ;;  %v2058_v42 = vadd.f32 %v3236_v20, %v1995_v26  ;;  %v2097_v12 = vmul.f32 %v1995_v26, %v1995_v26  ;;  %v1487_v49 = vmul.f32 %v3124_v23, %v1083_v38  ;;  %v3324_v41 = vld [vmem:[#allocation2 + $0xca] sm:$0xff] }
  0xbb   : > { %v640_v43 = vand.u32 15, %v472_v47  ;;  %v1587_v25 = vadd.f32 %v3243_v4, %v1516_v60  ;;  %v3319_v22 = vmul.f32 %v3093_v29, %v2908_v54  ;;  %v1659_v21 = vmul.f32 %v3108_v57, %v1622_v34 }
  0xbc   : > { %v1517_v15 = vadd.f32 %v1485_v27, %v1414_v31  ;;  %v2128_v7 = vadd.f32 %v3248_v55, %v2097_v12  ;;  %v1762_v5 = vmul.f32 %v3182_v44, %v1083_v38  ;;  %v473_v20 = vadd.s32 184, %v2392_v2  ;;  %v3344_v31 = vld [vmem:[#allocation2 + $0xd0] sm:$0xff] }
  0xbd   : > { %vm888_vm6 = vcmp.ge.s32.totalorder %v640_v43, 1  ;;  %v1690_v26 = vadd.f32 %v1658_v45, %v1587_v25  ;;  %v1929_v4 = vmul.f32 %v2291_v48, %v3324_v41  ;;  %v1833_v17 = vmul.f32 %v3132_v46, %v2908_v54  ;;  %v1085_v48 = vld [vmem:[#allocation2 + $0xd8] sm:$0xff] }
  0xbe   : > { %v1588_v63 = vadd.f32 %v1556_v36, %v1517_v15  ;;  %v2276_v27 = vsel %vm888_vm6, 1.0, %v2956_v8  ;;  %v647_v10 = vand.u32 15, %v473_v20  ;;  %v3335_v14 = vmul.f32 %v3068_v24, %v2910_v16 }
  0xbf   : > { %v1112_v0 = vmul.f32 %v2276_v27, %v3212_v56  ;;  %v1449_v55 = vmul.f32 %v2276_v27, %v3275_v40  ;;  %v1793_v38 = vadd.f32 %v1761_v33, %v1690_v26  ;;  %v3339_v36 = vmul.f32 %v3078_v13, %v3299_v37 }
  0xc0   : > { %v1691_v9 = vadd.f32 %v1659_v21, %v1588_v63  ;;  %v2059_v34 = vadd.f32 %v2058_v42, %v1996_v62  ;;  %v2098_v45 = vmul.f32 %v1996_v62, %v1996_v62  ;;  %vm985_vm7 = vcmp.lt.s32.totalorder %v647_v10, 15 }
  0xc1   : > { %v1149_v54 = vmul.f32 %v3047_v52, %v1112_v0  ;;  %v1864_v56 = vadd.f32 %v1832_v58, %v1793_v38  ;;  %v1966_v60 = vmul.f32 %v3167_v6, %v1929_v4  ;;  %v2292_v33 = vsel %vm985_vm7, 1.0, %v2956_v8 }
  0xc2   : > { %v1794_v47 = vadd.f32 %v1762_v5, %v1691_v9  ;;  %v1486_v43 = vmul.f32 %v3124_v23, %v1449_v55  ;;  %v1154_v25 = vmul.f32 %v3047_v52, %v1085_v48  ;;  %v1347_v62 = vmul.f32 %v2292_v33, %v3257_v53  ;;  %v3366_v55 = vld [vmem:[#allocation2 + $0xda] sm:$0xff] }
  0xc3   : > { %v1282_v12 = vadd.f32 %v3231_v19, %v1149_v54  ;;  %v1997_v42 = vadd.f32 %v1965_v50, %v1864_v56  ;;  %v1726_v58 = vmul.f32 %v2276_v27, %v3344_v31  ;;  %v1255_v21 = vmul.f32 %v3068_v24, %v2971_v39 }
  0xc4   : > { %v1865_v15 = vadd.f32 %v1833_v17, %v1794_v47  ;;  %v1384_v20 = vmul.f32 %v3078_v13, %v1347_v62  ;;  %v1624_v26 = vmul.f32 %v2292_v33, %v3324_v41  ;;  %v474_v19 = vadd.s32 192, %v2392_v2  ;;  %v1898_v17 = vld [vmem:[#allocation2 + $0xd2] sm:$0xff] }
  0xc5   : > { %v1415_v5 = vadd.f32 %v1383_v30, %v1282_v12  ;;  %v2129_v63 = vadd.f32 %v2128_v7, %v2098_v45  ;;  %2029 = vst [vmem:[%s2642_s7 + $0xa0] sm:$0xff] %v1997_v42  ;;  %v3359_v53 = vmul.f32 %v3093_v29, %v2910_v16  ;;  %v1660_v50 = vmul.f32 %v3108_v57, %v3299_v37 }
  0xc6   : > { %v1998_v4 = vadd.f32 %v1966_v60, %v1865_v15  ;;  %v1834_v30 = vmul.f32 %v3132_v46, %v2910_v16  ;;  %v1416_v0 = vadd.f32 %v1384_v20, %v3272_v32  ;;  %v654_v10 = vand.u32 15, %v474_v19  ;;  %v3393_v19 = vld [vmem:[#allocation2 + $0xe0] sm:$0xff] }
  0xc7   : > { %v1518_v27 = vadd.f32 %v1486_v43, %v1415_v5  ;;  %v1763_v7 = vmul.f32 %v3182_v44, %v1726_v58  ;;  %v1967_v38 = vmul.f32 %v3167_v6, %v1898_v17  ;;  %v3371_v9 = vadd.f32 %v1255_v21, %v1154_v25 }
  0xc8   : > { %2030 = vst [vmem:[%s2642_s7 + $0xa8] sm:$0xff] %v1998_v4  ;;  %v1931_v45 = vmul.f32 %v2292_v33, %v3366_v55  ;;  %v1519_v54 = vadd.f32 %v1487_v49, %v1416_v0  ;;  %v1661_v16 = vmul.f32 %v3108_v57, %v1624_v26  ;;  %vm890_vm8 = vcmp.ge.s32.totalorder %v654_v10, 1 }
  0xc9   : > { %v1589_v37 = vadd.f32 %v3297_v18, %v1518_v27  ;;  %v2060_v56 = vadd.f32 %v2059_v34, %v1997_v42  ;;  %v1489_v32 = vmul.f32 %v3124_v23, %v1085_v48  ;;  %v1764_v47 = vmul.f32 %v3182_v44, %v1085_v48 }
  0xca   : > { %v2277_v60 = vsel %vm890_vm8, 1.0, %v2956_v8  ;;  %v1590_v43 = vadd.f32 %v3319_v22, %v1519_v54  ;;  %v2099_v62 = vmul.f32 %v1997_v42, %v1997_v42  ;;  %v1560_v18 = vmul.f32 %v3093_v29, %v2971_v39  ;;  %v1087_v54 = vld [vmem:[#allocation2 + $0xe8] sm:$0xff] }
  0xcb   : > { %v1692_v12 = vadd.f32 %v1660_v50, %v1589_v37  ;;  %v1114_v25 = vmul.f32 %v2277_v60, %v3275_v40  ;;  %v1451_v33 = vmul.f32 %v2277_v60, %v3344_v31  ;;  %v1835_v49 = vmul.f32 %v3132_v46, %v2971_v39 }
  0xcc   : > { %v475_v34 = vadd.s32 200, %v2392_v2  ;;  %v1693_v48 = vadd.f32 %v1661_v16, %v1590_v43  ;;  %v1968_v58 = vmul.f32 %v3167_v6, %v1931_v45  ;;  %v2130_v22 = vadd.f32 %v2129_v63, %v2099_v62 }
  0xcd   : > { %v1795_v15 = vadd.f32 %v1763_v7, %v1692_v12  ;;  %v1151_v21 = vmul.f32 %v3047_v52, %v1114_v25  ;;  %v2061_v5 = vadd.f32 %v2060_v56, %v1998_v4  ;;  %v3391_v40 = vmul.f32 %v3068_v24, %v2973_v1 }
  0xce   : > { %v661_v42 = vand.u32 15, %v475_v34  ;;  %v1796_v26 = vadd.f32 %v1764_v47, %v1693_v48  ;;  %v1488_v50 = vmul.f32 %v3124_v23, %v1451_v33  ;;  %v2100_v27 = vmul.f32 %v1998_v4, %v1998_v4  ;;  %v3430_v48 = vld [vmem:[#allocation2 + $0xea] sm:$0xff] }
  0xcf   : > { %v1866_v20 = vadd.f32 %v1834_v30, %v1795_v15  ;;  %v1284_v39 = vadd.f32 %v3292_v59, %v1151_v21  ;;  %v3398_v0 = vmul.f32 %v3078_v13, %v1898_v17  ;;  %v1728_v63 = vmul.f32 %v2277_v60, %v3393_v19  ;;  %v1900_v60 = vld [vmem:[#allocation2 + $0xe2] sm:$0xff] }
  0xd0   : > { %vm987_vm9 = vcmp.lt.s32.totalorder %v661_v42, 15  ;;  %v1867_v7 = vadd.f32 %v1835_v49, %v1796_v26  ;;  %v2131_v37 = vadd.f32 %v2130_v22, %v2100_v27  ;;  %v3405_v59 = vmul.f32 %v3093_v29, %v2973_v1 }
  0xd1   : > { %v1999_v10 = vadd.f32 %v1967_v38, %v1866_v20  ;;  %v1417_v45 = vadd.f32 %v3339_v36, %v1284_v39  ;;  %v2293_v30 = vsel %vm987_vm9, 1.0, %v2956_v8  ;;  %v476_v16 = vadd.s32 208, %v2392_v2 }
  0xd2   : > { %v1349_v4 = vmul.f32 %v2293_v30, %v3324_v41  ;;  %v2000_v56 = vadd.f32 %v1968_v58, %v1867_v7  ;;  %v1662_v38 = vmul.f32 %v3108_v57, %v1898_v17  ;;  %v1836_v36 = vmul.f32 %v3132_v46, %v2973_v1 }
  0xd3   : > { %2031 = vst [vmem:[%s2642_s7 + $0xb0] sm:$0xff] %v1999_v10  ;;  %v1520_v47 = vadd.f32 %v1488_v50, %v1417_v45  ;;  %v1969_v12 = vmul.f32 %v3167_v6, %v1900_v60  ;;  %v1626_v25 = vmul.f32 %v2293_v30, %v3366_v55  ;;  %v668_v33 = vand.u32 15, %v476_v16 }
  0xd4   : > { %v1386_v43 = vmul.f32 %v3078_v13, %v1349_v4  ;;  %2032 = vst [vmem:[%s2642_s7 + $0xb8] sm:$0xff] %v2000_v56  ;;  %v1765_v62 = vmul.f32 %v3182_v44, %v1728_v63  ;;  %v1156_v49 = vmul.f32 %v3047_v52, %v1087_v54  ;;  %v1257_v17 = vmul.f32 %v3068_v24, %v3039_v35 }
  0xd5   : > { %v1591_v41 = vadd.f32 %v3359_v53, %v1520_v47  ;;  %v3424_v34 = vmul.f32 %v3124_v23, %v1087_v54  ;;  %v3428_v15 = vmul.f32 %v3093_v29, %v3039_v35  ;;  %vm892_vm10 = vcmp.ge.s32.totalorder %v668_v33, 1  ;;  %v1088_v47 = vld [vmem:[#allocation2 + $0xf0] sm:$0xff] }
  0xd6   : > { %v1418_v1 = vadd.f32 %v1386_v43, %v3311_v61  ;;  %v2062_v53 = vadd.f32 %v2061_v5, %v1999_v10  ;;  %v1933_v21 = vmul.f32 %v2293_v30, %v3430_v48  ;;  %v2278_v22 = vsel %vm892_vm10, 1.0, %v2956_v8 }
  0xd7   : > { %v1694_v58 = vadd.f32 %v1662_v38, %v1591_v41  ;;  %v1663_v20 = vmul.f32 %v3108_v57, %v1626_v25  ;;  %v1116_v61 = vmul.f32 %v2278_v22, %v3344_v31  ;;  %v1453_v26 = vmul.f32 %v2278_v22, %v3393_v19 }
  0xd8   : > { %v1521_v42 = vadd.f32 %v1489_v32, %v1418_v1  ;;  %v2101_v39 = vmul.f32 %v1999_v10, %v1999_v10  ;;  %v3437_v27 = vadd.f32 %v1257_v17, %v1156_v49  ;;  %v1766_v63 = vmul.f32 %v3182_v44, %v1087_v54 }
  0xd9   : > { %v1797_v50 = vadd.f32 %v1765_v62, %v1694_v58  ;;  %v1837_v5 = vmul.f32 %v3132_v46, %v3039_v35  ;;  %v1153_v45 = vmul.f32 %v3047_v52, %v1116_v61  ;;  %v477_v32 = vadd.s32 216, %v2392_v2 }
  0xda   : > { %v1592_v7 = vadd.f32 %v1560_v18, %v1521_v42  ;;  %v2132_v30 = vadd.f32 %v2131_v37, %v2101_v39  ;;  %v2063_v4 = vadd.f32 %v2062_v53, %v2000_v56  ;;  %v1970_v31 = vmul.f32 %v3167_v6, %v1933_v21  ;;  %v1089_v21 = vld [vmem:[#allocation2 + $0xf8] sm:$0xff] }
  0xdb   : > { %v1868_v16 = vadd.f32 %v1836_v36, %v1797_v50  ;;  %v1286_v38 = vadd.f32 %v3335_v14, %v1153_v45  ;;  %v1490_v54 = vmul.f32 %v3124_v23, %v1453_v26  ;;  %v675_v18 = vand.u32 15, %v477_v32  ;;  %v1902_v26 = vld [vmem:[#allocation2 + $0xf2] sm:$0xff] }
  0xdc   : > { %v1695_v10 = vadd.f32 %v1663_v20, %v1592_v7  ;;  %v2102_v43 = vmul.f32 %v2000_v56, %v2000_v56  ;;  %v3449_v35 = vmul.f32 %v3068_v24, %v3050_v3  ;;  %v1730_v33 = vmul.f32 %v2278_v22, %v1088_v47 }
  0xdd   : > { %v2001_v25 = vadd.f32 %v1969_v12, %v1868_v16  ;;  %v3452_v36 = vmul.f32 %v3078_v13, %v1900_v60  ;;  %v1419_v41 = vadd.f32 %v3398_v0, %v1286_v38  ;;  %vm989_vm11 = vcmp.lt.s32.totalorder %v675_v18, 15  ;;  %v3487_v38 = vld [vmem:[#allocation2 + $0xfa] sm:$0xff] }
  0xde   : > { %v1798_v37 = vadd.f32 %v1766_v63, %v1695_v10  ;;  %v2133_v62 = vadd.f32 %v2132_v30, %v2102_v43  ;;  %v3458_v14 = vmul.f32 %v3093_v29, %v3050_v3  ;;  %v2294_v56 = vsel %vm989_vm11, 1.0, %v2956_v8 }
  0xdf   : > { %2033 = vst [vmem:[%s2642_s7 + $0xc0] sm:$0xff] %v2001_v25  ;;  %v478_v12 = vadd.s32 224, %v2392_v2  ;;  %v1522_v17 = vadd.f32 %v1490_v54, %v1419_v41  ;;  %v1664_v1 = vmul.f32 %v3108_v57, %v1900_v60  ;;  %v1351_v53 = vmul.f32 %v2294_v56, %v3366_v55 }
  0xe0   : > { %v1869_v49 = vadd.f32 %v1837_v5, %v1798_v37  ;;  %v1767_v0 = vmul.f32 %v3182_v44, %v1730_v33  ;;  %v1838_v58 = vmul.f32 %v3132_v46, %v3050_v3  ;;  %v480_v22 = vadd.s32 240, %v2392_v2 }
  0xe1   : > { %v682_v42 = vand.u32 15, %v478_v12  ;;  %v1593_v61 = vadd.f32 %v3405_v59, %v1522_v17  ;;  %v1388_v39 = vmul.f32 %v3078_v13, %v1351_v53  ;;  %v1628_v60 = vmul.f32 %v2294_v56, %v3430_v48  ;;  %v1425_v12 = vld [vmem:[#allocation2 + $0x100] sm:$0xff] }
  0xe2   : > { %v2002_v20 = vadd.f32 %v1970_v31, %v1869_v49  ;;  %v1971_v50 = vmul.f32 %v3167_v6, %v1902_v26  ;;  %v3473_v55 = vmul.f32 %v3047_v52, %v1089_v21  ;;  %v696_v63 = vand.u32 15, %v480_v22 }
  0xe3   : > { %vm894_vm12 = vcmp.ge.s32.totalorder %v682_v42, 1  ;;  %v1696_v3 = vadd.f32 %v1664_v1, %v1593_v61  ;;  %v3478_v7 = vmul.f32 %v3068_v24, %v3204_v11  ;;  %v1420_v59 = vadd.f32 %v1388_v39, %v3371_v9 }
  0xe4   : > { %2034 = vst [vmem:[%s2642_s7 + $0xc8] sm:$0xff] %v2002_v20  ;;  %v3482_v5 = vmul.f32 %v3124_v23, %v1089_v21  ;;  %v2064_v45 = vadd.f32 %v2063_v4, %v2001_v25  ;;  %v2103_v32 = vmul.f32 %v2001_v25, %v2001_v25  ;;  %vm896_vm13 = vcmp.ge.s32.totalorder %v696_v63, 1 }
  0xe5   : > { %v2279_v30 = vsel %vm894_vm12, 1.0, %v2956_v8  ;;  %v1799_v16 = vadd.f32 %v1767_v0, %v1696_v3  ;;  %v1523_v31 = vadd.f32 %v3424_v34, %v1420_v59  ;;  %v1665_v10 = vmul.f32 %v3108_v57, %v1628_v60 }
  0xe6   : > { %v2280_v24 = vsel %vm896_vm13, 1.0, %v2956_v8  ;;  %v3492_v9 = vmul.f32 %v3093_v29, %v3204_v11  ;;  %v1935_v54 = vmul.f32 %v2294_v56, %v3487_v38  ;;  %v1118_v4 = vmul.f32 %v2279_v30, %v3393_v19 }
  0xe7   : > { %v1455_v18 = vmul.f32 %v2279_v30, %v1088_v47  ;;  %v2134_v43 = vadd.f32 %v2133_v62, %v2103_v32  ;;  %v1870_v25 = vadd.f32 %v1838_v58, %v1799_v16  ;;  %v1594_v33 = vadd.f32 %v3428_v15, %v1523_v31  ;;  %v1702_v32 = vld [vmem:[#allocation2 + $0x110] sm:$0xff] }
  0xe8   : > { %v1768_v34 = vmul.f32 %v3182_v44, %v1089_v21  ;;  %v1839_v37 = vmul.f32 %v3132_v46, %v3204_v11  ;;  %v1120_v8 = vmul.f32 %v2280_v24, %v1088_v47  ;;  %v1155_v41 = vmul.f32 %v3047_v52, %v1118_v4 }
  0xe9   : > { %v479_v49 = vadd.s32 232, %v2392_v2  ;;  %v2065_v56 = vadd.f32 %v2064_v45, %v2002_v20  ;;  %v2104_v17 = vmul.f32 %v2002_v20, %v2002_v20  ;;  %v2003_v19 = vadd.f32 %v1971_v50, %v1870_v25  ;;  %v2331_v50 = vld [vmem:[#allocation2] sm:$0xff] }
  0xea   : > { %v1697_v1 = vadd.f32 %v1665_v10, %v1594_v33  ;;  %v1972_v62 = vmul.f32 %v3167_v6, %v1935_v54  ;;  %v1288_v15 = vadd.f32 %v3391_v40, %v1155_v41  ;;  %v1492_v53 = vmul.f32 %v3124_v23, %v1455_v18  ;;  %v1904_v54 = vld [vmem:[#allocation2 + $0x102] sm:$0xff] }
  0xeb   : > { %v689_v0 = vand.u32 15, %v479_v49  ;;  %v2135_v58 = vadd.f32 %v2134_v43, %v2104_v17  ;;  %2035 = vst [vmem:[%s2642_s7 + $0xd0] sm:$0xff] %v2003_v19  ;;  %v1391_v47 = vmul.f32 %v3078_v13, %v1902_v26  ;;  %v1457_v21 = vmul.f32 %v2280_v24, %v1425_v12 }
  0xec   : > { %v1800_v11 = vadd.f32 %v1768_v34, %v1697_v1  ;;  %v1421_v22 = vadd.f32 %v3452_v36, %v1288_v15  ;;  %v1732_v42 = vmul.f32 %v2279_v30, %v1425_v12  ;;  %v1157_v20 = vmul.f32 %v3047_v52, %v1120_v8  ;;  %v1426_v12 = vld [vmem:[#allocation2 + $0x108] sm:$0xff] }
  0xed   : > { %vm991_vm14 = vcmp.lt.s32.totalorder %v689_v0, 15  ;;  %v2066_v61 = vadd.f32 %v2065_v56, %v2003_v19  ;;  %v2105_v39 = vmul.f32 %v2003_v19, %v2003_v19  ;;  %v1565_v3 = vmul.f32 %v3093_v29, %v3215_v51 }
  0xee   : > { %v1871_v60 = vadd.f32 %v1839_v37, %v1800_v11  ;;  %v2295_v40 = vsel %vm991_vm14, 1.0, %v2331_v50  ;;  %v1524_v63 = vadd.f32 %v1492_v53, %v1421_v22  ;;  %v1666_v59 = vmul.f32 %v3108_v57, %v1902_v26  ;;  %v1905_v37 = vld [vmem:[#allocation2 + $0x10a] sm:$0xff] }
  0xef   : > { %v1353_v45 = vmul.f32 %v2295_v40, %v3430_v48  ;;  %v2136_v36 = vadd.f32 %v2135_v58, %v2105_v39  ;;  %v1290_v16 = vadd.f32 %v3449_v35, %v1157_v20  ;;  %v1494_v52 = vmul.f32 %v3124_v23, %v1457_v21  ;;  %v1906_v58 = vld [vmem:[#allocation2 + $0x112] sm:$0xff] }
  0xf0   : > { %v2004_v30 = vadd.f32 %v1972_v62, %v1871_v60  ;;  %v1595_v31 = vadd.f32 %v3458_v14, %v1524_v63  ;;  %v1769_v10 = vmul.f32 %v3182_v44, %v1732_v42  ;;  %v1630_v18 = vmul.f32 %v2295_v40, %v3487_v38 }
  0xf1   : > { %v1390_v4 = vmul.f32 %v3078_v13, %v1353_v45  ;;  %v1423_v48 = vadd.f32 %v1391_v47, %v1290_v16  ;;  %v1734_v25 = vmul.f32 %v2280_v24, %v1702_v32  ;;  %v1840_v35 = vmul.f32 %v3132_v46, %v3215_v51  ;;  %v1703_v45 = vld [vmem:[#allocation2 + $0x118] sm:$0xff] }
  0xf2   : > { %2036 = vst [vmem:[%s2642_s7 + $0xd8] sm:$0xff] %v2004_v30  ;;  %v2067_v26 = vadd.f32 %v2066_v61, %v2004_v30  ;;  %v2106_v43 = vmul.f32 %v2004_v30, %v2004_v30  ;;  %v1698_v33 = vadd.f32 %v1666_v59, %v1595_v31  ;;  %v481_v14 = vadd.s32 248, %v2392_v2 }
  0xf3   : > { %v1422_v34 = vadd.f32 %v1390_v4, %v3437_v27  ;;  %v1973_v41 = vmul.f32 %v3167_v6, %v1904_v54  ;;  %v1526_v49 = vadd.f32 %v1494_v52, %v1423_v48  ;;  %v1668_v56 = vmul.f32 %v3108_v57, %v1904_v54 }
  0xf4   : > { %v2137_v8 = vadd.f32 %v2136_v36, %v2106_v43  ;;  %v1801_v17 = vadd.f32 %v1769_v10, %v1698_v33  ;;  %v1667_v24 = vmul.f32 %v3108_v57, %v1630_v18  ;;  %v703_v1 = vand.u32 15, %v481_v14  ;;  %v1907_v36 = vld [vmem:[#allocation2 + $0x11a] sm:$0xff] }
  0xf5   : > { %v1525_v19 = vadd.f32 %v3482_v5, %v1422_v34  ;;  %v1291_v51 = vadd.f32 %v3478_v7, %v3473_v55  ;;  %v1937_v27 = vmul.f32 %v2295_v40, %v1905_v37  ;;  %v1597_v62 = vadd.f32 %v1565_v3, %v1526_v49 }
  0xf6   : > { %v1771_v2 = vmul.f32 %v3182_v44, %v1734_v25  ;;  %v1872_v15 = vadd.f32 %v1840_v35, %v1801_v17  ;;  %v1770_v0 = vmul.f32 %v3182_v44, %v1426_v12  ;;  %vm993_vm15 = vcmp.lt.s32.totalorder %v703_v1, 15 }
  0xf7   : > { %v1596_v53 = vadd.f32 %v3492_v9, %v1525_v19  ;;  %v1495_v5 = vmul.f32 %v3124_v23, %v1426_v12  ;;  %v1700_v11 = vadd.f32 %v1668_v56, %v1597_v62  ;;  %v1842_v47 = vmul.f32 %v2331_v50, %v3132_v46 }
  0xf8   : > { %v2296_v21 = vsel %vm993_vm15, 1.0, %v2331_v50  ;;  %v2005_v22 = vadd.f32 %v1973_v41, %v1872_v15  ;;  %v1841_v7 = vmul.f32 %v3132_v46, %v3270_v28  ;;  %v1974_v9 = vmul.f32 %v3167_v6, %v1937_v27 }
  0xf9   : > { %v1699_v55 = vadd.f32 %v1667_v24, %v1596_v53  ;;  %v1355_v42 = vmul.f32 %v2296_v21, %v3487_v38  ;;  %v1803_v20 = vadd.f32 %v1771_v2, %v1700_v11  ;;  %v1975_v61 = vmul.f32 %v3167_v6, %v1906_v58 }
  0xfa   : > { %v1632_v39 = vmul.f32 %v2296_v21, %v1905_v37  ;;  %2037 = vst [vmem:[%s2642_s7 + $0xe0] sm:$0xff] %v2005_v22  ;;  %v2068_v23 = vadd.f32 %v2067_v26, %v2005_v22  ;;  %v2107_v60 = vmul.f32 %v2005_v22, %v2005_v22  ;;  %v1566_v46 = vmul.f32 %v3093_v29, %v3270_v28 }
  0xfb   : > { %v1802_v40 = vadd.f32 %v1770_v0, %v1699_v55  ;;  %v1392_v50 = vmul.f32 %v3078_v13, %v1355_v42  ;;  %v1874_v63 = vadd.f32 %v1842_v47, %v1803_v20  ;;  %v1772_v31 = vmul.f32 %v3182_v44, %v1703_v45 }
  0xfc   : > { %v2138_v3 = vadd.f32 %v2137_v8, %v2107_v60  ;;  %v1669_v52 = vmul.f32 %v3108_v57, %v1632_v39  ;;  %v1939_v4 = vmul.f32 %v2296_v21, %v1907_v36 }
  0xfd   : > { %v1873_v38 = vadd.f32 %v1841_v7, %v1802_v40  ;;  %v1424_v59 = vadd.f32 %v1392_v50, %v1291_v51  ;;  %v2007_v32 = vadd.f32 %v1975_v61, %v1874_v63 }
  0xfe   : > { %v1976_v48 = vmul.f32 %v3167_v6, %v1939_v4 }
  0xff   : > { %v2006_v30 = vadd.f32 %v1974_v9, %v1873_v38  ;;  %v1527_v16 = vadd.f32 %v1495_v5, %v1424_v59  ;;  %2039 = vst [vmem:[%s2642_s7 + $0xf0] sm:$0xff] %v2007_v32  ;;  %v2109_v28 = vmul.f32 %v2007_v32, %v2007_v32 }
 0x101   : > { %2038 = vst [vmem:[%s2642_s7 + $0xe8] sm:$0xff] %v2006_v30  ;;  %v2069_v13 = vadd.f32 %v2068_v23, %v2006_v30  ;;  %v2108_v10 = vmul.f32 %v2006_v30, %v2006_v30  ;;  %v1598_v54 = vadd.f32 %v1566_v46, %v1527_v16 }
 0x103   : > { %v2139_v18 = vadd.f32 %v2138_v3, %v2108_v10  ;;  %v2070_v29 = vadd.f32 %v2069_v13, %v2007_v32  ;;  %v1701_v26 = vadd.f32 %v1669_v52, %v1598_v54 }
 0x105   : > { %v1804_v43 = vadd.f32 %v1772_v31, %v1701_v26  ;;  %v2140_v25 = vadd.f32 %v2139_v18, %v2109_v28 }
 0x107   : > { %v1875_v33 = vadd.f32 %v1842_v47, %v1804_v43 }
 0x109   : > { %v2008_v57 = vadd.f32 %v1976_v48, %v1875_v33 }
 0x10b   : > { %2040 = vst [vmem:[%s2642_s7 + $0xf8] sm:$0xff] %v2008_v57  ;;  %v2110_v35 = vmul.f32 %v2008_v57, %v2008_v57  ;;  %v2071_v44 = vadd.f32 %v2070_v29, %v2008_v57 }
 0x10d   : > { %v2072_v34 = vrot.slane %v2071_v44, 4  ;;  %v2141_v37 = vadd.f32 %v2140_v25, %v2110_v35 }
 0x10f   : > { %v2073_v14 = vadd.f32 %v2072_v34, %v2071_v44  ;;  %v2142_v8 = vrot.slane %v2141_v37, 4 }
 0x111   : > { %v2074_v41 = vrot.slane %v2073_v14, 2  ;;  %v2143_v12 = vadd.f32 %v2142_v8, %v2141_v37 }
 0x113   : > { %v2075_v49 = vadd.f32 %v2074_v41, %v2073_v14  ;;  %v2144_v56 = vrot.slane %v2143_v12, 2 }
 0x115   : > { %v2076_v17 = vrot.slane %v2075_v49, 1  ;;  %v2145_v19 = vadd.f32 %v2144_v56, %v2143_v12 }
 0x117   : > { %v2077_v6 = vadd.f32 %v2076_v17, %v2075_v49  ;;  %v2146_v24 = vrot.slane %v2145_v19, 1 }
 0x119   : > { %2078 = vst [vmem:[%s265_s10] sm:$0x1] %v2077_v6  ;;  %v2147_v1 = vadd.f32 %v2146_v24, %v2145_v19 }
 0x11b   : > { %2148 = vst [vmem:[%s268_s12] sm:$0x1] %v2147_v1 }
 0x11c PF: > { %s17_s21 = sadd.s32 1, %s2338_s21  }
 0x11d   : > { %p14_p4 = scmp.ge.s32.totalorder %s17_s21, 4  }
 0x11f   :  { %16 = sbr.rel (!%p14_p4) target bundleno = 1 (0x1), region = 90 }

</bundles_post_ra>
